<compile_context>
chip_gen: v6e
topology: v6e:2x2x1
jax: 0.10.0
libtpu: 0.0.40
codegen_flags: <defaults>
</compile_context>

<pallas_src>
import functools

import jax
import jax.numpy as jnp
from jax.experimental import pallas as pl
from jax.experimental.pallas import tpu as pltpu


_LN_EPS = 1e-12            # hazdzz/STGCN layers.py uses nn.LayerNorm(..., eps=1e-12)
_MXU_DTYPE = jnp.bfloat16  # MXU operand dtype; accumulation stays f32


# =====================================================================================
# In-kernel building blocks (activations carried time-major: (T, V, C))
# =====================================================================================

def _mdot(a, b):
    """MXU matmul: bf16 operands, f32 accumulation."""
    return jnp.dot(a.astype(_MXU_DTYPE), b.astype(_MXU_DTYPE),
                   preferred_element_type=jnp.float32)


def _temporal_glu(x, w_ref, b_ref, kt):
    """Causal temporal conv + GLU.  x: (T, V, Cin) -> (T-Kt+1, V, Cout).

    Kt per-tap MXU matmuls accumulated in f32 (no window-concat temporary).  The Align
    residual of the GLU 'P' half is pre-folded into tap Kt-1 of w_ref, so
    (P + align(x)) * sigmoid(Q) is just GLU of the accumulated pre-activation.
    """
    t, v, c_in = x.shape
    c_out = w_ref.shape[-1] // 2
    t1 = t - (kt - 1)
    acc = None
    for k in range(kt):
        xk = x[k:k + t1].reshape(t1 * v, c_in)
        wk = w_ref[k]                                    # (Cin, 2*Cout)
        if c_in == 1:
            # Degenerate K=1 contraction: outer product on the VPU instead of a K=1 MXU op.
            yk = xk * wk.astype(jnp.float32)
        else:
            yk = _mdot(xk, wk)
        acc = yk if acc is None else acc + yk
    y = acc + b_ref[...]                                 # bias added once, outside the tap loop
    p = y[:, :c_out] * jax.nn.sigmoid(y[:, c_out:])      # GLU (sigmoid -> EUP)
    return p.reshape(t1, v, c_out)


def _graph_conv_relu(h, gso_ref, gca_w_ref, gca_b_ref, gc_w_ref, gc_b_ref):
    """GraphConvLayer (graph_conv) + residual + ReLU.  h: (T, V, C0) -> (T, V, C1)."""
    t, v, c0 = h.shape
    c1 = gca_w_ref.shape[-1]
    # Align (identity / zero-pad / 1x1 conv) folded into one matmul.
    hg = _mdot(h.reshape(t * v, c0), gca_w_ref[...]) + gca_b_ref[...]        # (T*V, C1)
    gso = gso_ref[...]                                                        # (V, V) bf16
    # gso @ x_t per time step as plain 2-D MXU matmuls (no (T, V, V) broadcast of gso).
    # TODO(synk): fuse into one (V, V) @ (V, T*C1) matmul once the relayout path is validated.
    fm = jnp.concatenate(
        [_mdot(gso, hg[tt * v:(tt + 1) * v]) for tt in range(t)], axis=0)     # (T*V, C1)
    g = _mdot(fm, gc_w_ref[...]) + gc_b_ref[...] + hg                         # weight+bias+residual
    return jnp.maximum(g, 0.0).reshape(t, v, c1)                              # ReLU from STConvBlock


def _layer_norm_vc(x, g_ref, b_ref, eps):
    """LayerNorm over (V, C) jointly per time step.  x: (T, V, C); gamma/beta: (V, C)."""
    t, v, c = x.shape
    n = v * c
    mean = jnp.sum(jnp.sum(x, axis=2, keepdims=True), axis=1, keepdims=True) / n
    d = x - mean
    var = jnp.sum(jnp.sum(d * d, axis=2, keepdims=True), axis=1, keepdims=True) / n
    return d * jax.lax.rsqrt(var + eps) * g_ref[...] + b_ref[...]


def _fc_head(x, fc1_w_ref, fc1_b_ref, fc2_w_ref, fc2_b_ref):
    """fc1 + ReLU + fc2 applied per (t, v) position.  x: (T, V, C) -> (T, V, C_end)."""
    t, v, c = x.shape
    r = jnp.maximum(_mdot(x.reshape(t * v, c), fc1_w_ref[...]) + fc1_b_ref[...], 0.0)
    out = _mdot(r, fc2_w_ref[...]) + fc2_b_ref[...]
    return out.reshape(t, v, out.shape[-1])


# =====================================================================================
# Fused whole-network kernel (one batch element per grid step)
# =====================================================================================

def _stgcn_kernel(*refs, kt, ko, n_st, eps):
    """STGCNGraphConv.forward (eval mode) for one batch element, fully VMEM-resident."""
    x_ref, gso_ref = refs[0], refs[1]
    o_ref = refs[-1]
    w = refs[2:-1]

    x = x_ref[0]                                          # (T, V, Cin) f32
    i = 0
    for _ in range(n_st):                                 # STConvBlock x n_st
        (tc1_w, tc1_b, gca_w, gca_b, gc_w, gc_b,
         tc2_w, tc2_b, ln_g, ln_b) = w[i:i + 10]
        i += 10
        x = _temporal_glu(x, tc1_w, tc1_b, kt)
        x = _graph_conv_relu(x, gso_ref, gca_w, gca_b, gc_w, gc_b)
        x = _temporal_glu(x, tc2_w, tc2_b, kt)
        x = _layer_norm_vc(x, ln_g, ln_b, eps)            # dropout == identity in eval mode

    if ko > 1:                                            # OutputBlock
        (tc_w, tc_b, ln_g, ln_b, fc1_w, fc1_b, fc2_w, fc2_b) = w[i:i + 8]
        x = _temporal_glu(x, tc_w, tc_b, ko)
        x = _layer_norm_vc(x, ln_g, ln_b, eps)
        x = _fc_head(x, fc1_w, fc1_b, fc2_w, fc2_b)
    elif ko == 0:                                         # bare fc1 -> ReLU -> fc2 head
        (fc1_w, fc1_b, fc2_w, fc2_b) = w[i:i + 4]
        x = _fc_head(x, fc1_w, fc1_b, fc2_w, fc2_b)
    # Ko == 1: pass-through, matching the reference forward().

    o_ref[0] = x.astype(o_ref.dtype)


# =====================================================================================
# Wrapper: weight folding, bf16 pre-cast, pallas_call plumbing
# =====================================================================================

def _full_spec(shape):
    """BlockSpec covering a whole (small, VMEM-resident) array; constant across grid steps."""
    zeros = (0,) * len(shape)
    return pl.BlockSpec(shape, lambda b: zeros)


def _align_matrix(align_p, c_in, c_out):
    """layers.Align as  x @ A + b : identity / zero-pad / learned 1x1 conv (c_in > c_out)."""
    if c_in > c_out:
        return align_p["w"], align_p["b"]
    return jnp.eye(c_in, c_out, dtype=jnp.float32), jnp.zeros((1, c_out), jnp.float32)


def _fold_temporal(p, kt, c_in, c_out):
    """Fold the Align residual of the GLU 'P' half into tap Kt-1 of the causal-conv weight."""
    a, ab = _align_matrix(p.get("align"), c_in, c_out)
    w = p["w"].at[kt - 1, :, :c_out].add(a)               # (Kt, Cin, 2*Cout)
    b = p["b"].at[:, :c_out].add(ab)                      # (1, 2*Cout)
    return w, b


def stgcn_graph_conv_forward(x_nchw, params, gso, *, kt, ko, eps=_LN_EPS):
    """STGCNGraphConv.forward (eval mode).  x_nchw: (B, Cin, T, V) -> (B, C_end, T_out, V)."""
    B, c_in, T, V = x_nchw.shape
    # NCHW -> channels-last (B, T, V, C); done exactly once per inference, outside the kernel.
    x = jnp.transpose(x_nchw, (0, 2, 3, 1)).astype(jnp.float32)

    inputs = [x, gso.astype(_MXU_DTYPE)]
    in_specs = [pl.BlockSpec((1, T, V, c_in), lambda b: (b, 0, 0, 0)),
                _full_spec((V, V))]

    def add(arr):
        inputs.append(arr)
        in_specs.append(_full_spec(arr.shape))

    c_prev, t_cur = c_in, T
    for blk in params["st_blocks"]:
        c0 = blk["tc1"]["w"].shape[-1] // 2
        c1 = blk["gc"]["w"].shape[0]
        c2 = blk["tc2"]["w"].shape[-1] // 2
        tc1_w, tc1_b = _fold_temporal(blk["tc1"], kt, c_prev, c0)
        gca_w, gca_b = _align_matrix(blk["gc"].get("align"), c0, c1)
        tc2_w, tc2_b = _fold_temporal(blk["tc2"], kt, c1, c2)
        for a in (tc1_w.astype(_MXU_DTYPE), tc1_b,
                  gca_w.astype(_MXU_DTYPE), gca_b,
                  blk["gc"]["w"].astype(_MXU_DTYPE), blk["gc"]["b"],
                  tc2_w.astype(_MXU_DTYPE), tc2_b,
                  blk["ln_g"], blk["ln_b"]):
            add(a)
        c_prev, t_cur = c2, t_cur - 2 * (kt - 1)

    if ko > 1:
        ob = params["output"]
        c0 = ob["tc1"]["w"].shape[-1] // 2
        tc_w, tc_b = _fold_temporal(ob["tc1"], ko, c_prev, c0)
        for a in (tc_w.astype(_MXU_DTYPE), tc_b, ob["ln_g"], ob["ln_b"],
                  ob["fc1_w"].astype(_MXU_DTYPE), ob["fc1_b"],
                  ob["fc2_w"].astype(_MXU_DTYPE), ob["fc2_b"]):
            add(a)
        c_end, t_out = ob["fc2_w"].shape[1], t_cur - (ko - 1)
    elif ko == 0:
        for a in (params["fc1_w"].astype(_MXU_DTYPE), params["fc1_b"],
                  params["fc2_w"].astype(_MXU_DTYPE), params["fc2_b"]):
            add(a)
        c_end, t_out = params["fc2_w"].shape[1], t_cur
    else:  # Ko == 1: reference forward() passes x through unchanged
        c_end, t_out = c_prev, t_cur

    out = pl.pallas_call(
        functools.partial(_stgcn_kernel, kt=kt, ko=ko,
                          n_st=len(params["st_blocks"]), eps=eps),
        out_shape=jax.ShapeDtypeStruct((B, t_out, V, c_end), jnp.float32),
        grid=(B,),
        in_specs=in_specs,
        out_specs=pl.BlockSpec((1, t_out, V, c_end), lambda b: (b, 0, 0, 0)),
        compiler_params=pltpu.CompilerParams(
            dimension_semantics=("parallel",),
            # Explicit budget: working set is well under 2 MiB here; 32 MiB leaves headroom even
            # against v7x's 64 MiB physical VMEM while staying valid on v5e/v6e.
            vmem_limit_bytes=32 * 1024 * 1024),
    )(*inputs)

    return jnp.transpose(out, (0, 3, 1, 2))               # back to NCHW: (B, C_end, T_out, V)


# =====================================================================================
# Deterministic parameter initialization (shapes follow the nn.Module __init__)
# =====================================================================================

def _init_temporal(nrm, kt, c_in, c_out):
    p = {"w": nrm((kt, c_in, 2 * c_out)), "b": nrm((1, 2 * c_out))}
    if c_in > c_out:  # Align uses a 1x1 conv only when c_in > c_out
        p["align"] = {"w": nrm((c_in, c_out)), "b": nrm((1, c_out))}
    return p


def _init_graph(nrm, c_in, c_out):
    p = {"w": nrm((c_out, c_out)), "b": nrm((1, c_out))}
    if c_in > c_out:
        p["align"] = {"w": nrm((c_in, c_out)), "b": nrm((1, c_out))}
    return p


def init_params(key, kt, n_vertex, blocks, ko):
    kit = iter(jax.random.split(key, 128))

    def nrm(shape, scale=0.1):
        return (scale * jax.random.normal(next(kit), shape)).astype(jnp.float32)

    params = {"st_blocks": []}
    last_c = blocks[0][-1]
    for l in range(len(blocks) - 3):
        ch = blocks[l + 1]
        params["st_blocks"].append({
            "tc1": _init_temporal(nrm, kt, last_c, ch[0]),
            "gc": _init_graph(nrm, ch[0], ch[1]),
            "tc2": _init_temporal(nrm, kt, ch[1], ch[2]),
            "ln_g": (1.0 + nrm((n_vertex, ch[2]))).astype(jnp.float32),
            "ln_b": nrm((n_vertex, ch[2])),
        })
        last_c = ch[2]

    if ko > 1:
        params["output"] = {
            "tc1": _init_temporal(nrm, ko, last_c, blocks[-2][0]),
            "ln_g": (1.0 + nrm((n_vertex, blocks[-2][0]))).astype(jnp.float32),
            "ln_b": nrm((n_vertex, blocks[-2][0])),
            "fc1_w": nrm((blocks[-2][0], blocks[-2][1])),
            "fc1_b": nrm((1, blocks[-2][1])),
            "fc2_w": nrm((blocks[-2][1], blocks[-1][0])),
            "fc2_b": nrm((1, blocks[-1][0])),
        }
    elif ko == 0:
        params["fc1_w"] = nrm((blocks[-3][-1], blocks[-2][0]))
        params["fc1_b"] = nrm((1, blocks[-2][0]))
        params["fc2_w"] = nrm((blocks[-2][0], blocks[-1][0]))
        params["fc2_b"] = nrm((1, blocks[-1][0]))
    return params


# =====================================================================================

if __name__ == "__main__":
    # Small config consistent with the module (args.*): act_func='glu',
    # graph_conv_type='graph_conv', enable_bias=True, eval-mode dropout.
    Kt = 3
    n_his = 12
    n_vertex = 16
    batch = 2
    blocks = [[1], [16, 8, 16], [16, 8, 16], [32, 32], [1]]
    Ko = n_his - (len(blocks) - 3) * 2 * (Kt - 1)  # = 4 -> OutputBlock path

    key = jax.random.PRNGKey(0)
    kx, kg, kp = jax.random.split(key, 3)
    x_nchw = jax.random.normal(kx, (batch, blocks[0][-1], n_his, n_vertex),
                               dtype=jnp.float32)
    # dense graph shift operator (args.gso), (V, V)
    gso = (jax.random.normal(kg, (n_vertex, n_vertex), dtype=jnp.float32)
           / jnp.sqrt(float(n_vertex)))

    params = init_params(kp, Kt, n_vertex, blocks, Ko)

    fwd = jax.jit(functools.partial(stgcn_graph_conv_forward, kt=Kt, ko=Ko))
    out = fwd(x_nchw, params, gso)
    jax.block_until_ready(out)

    expected_t = 1 if Ko > 1 else n_his
    assert out.shape == (batch, blocks[-1][0], expected_t, n_vertex), out.shape
    assert bool(jnp.all(jnp.isfinite(out)))
    print("KERNEL_OK")
</pallas_src>

<mosaic_0001>
module attributes {stable_mosaic.version = 11 : i64} {
  func.func @_stgcn_kernel(%arg0: i32, %arg1: memref<1x12x16x1xf32, #tpu.memory_space<vmem>>, %arg2: memref<16x16xbf16, #tpu.memory_space<vmem>>, %arg3: memref<3x1x32xbf16, #tpu.memory_space<vmem>>, %arg4: memref<1x32xf32, #tpu.memory_space<vmem>>, %arg5: memref<16x8xbf16, #tpu.memory_space<vmem>>, %arg6: memref<1x8xf32, #tpu.memory_space<vmem>>, %arg7: memref<8x8xbf16, #tpu.memory_space<vmem>>, %arg8: memref<1x8xf32, #tpu.memory_space<vmem>>, %arg9: memref<3x8x32xbf16, #tpu.memory_space<vmem>>, %arg10: memref<1x32xf32, #tpu.memory_space<vmem>>, %arg11: memref<16x16xf32, #tpu.memory_space<vmem>>, %arg12: memref<16x16xf32, #tpu.memory_space<vmem>>, %arg13: memref<3x16x32xbf16, #tpu.memory_space<vmem>>, %arg14: memref<1x32xf32, #tpu.memory_space<vmem>>, %arg15: memref<16x8xbf16, #tpu.memory_space<vmem>>, %arg16: memref<1x8xf32, #tpu.memory_space<vmem>>, %arg17: memref<8x8xbf16, #tpu.memory_space<vmem>>, %arg18: memref<1x8xf32, #tpu.memory_space<vmem>>, %arg19: memref<3x8x32xbf16, #tpu.memory_space<vmem>>, %arg20: memref<1x32xf32, #tpu.memory_space<vmem>>, %arg21: memref<16x16xf32, #tpu.memory_space<vmem>>, %arg22: memref<16x16xf32, #tpu.memory_space<vmem>>, %arg23: memref<4x16x64xbf16, #tpu.memory_space<vmem>>, %arg24: memref<1x64xf32, #tpu.memory_space<vmem>>, %arg25: memref<16x32xf32, #tpu.memory_space<vmem>>, %arg26: memref<16x32xf32, #tpu.memory_space<vmem>>, %arg27: memref<32x32xbf16, #tpu.memory_space<vmem>>, %arg28: memref<1x32xf32, #tpu.memory_space<vmem>>, %arg29: memref<32x1xbf16, #tpu.memory_space<vmem>>, %arg30: memref<1x1xf32, #tpu.memory_space<vmem>>, %arg31: memref<1x1x16x1xf32, #tpu.memory_space<vmem>>) attributes {dimension_semantics = [#tpu.dimension_semantics<parallel>], iteration_bounds = array<i64: 2>, scalar_prefetch = 0 : i64, scratch_operands = 0 : i64, tpu.core_type = #tpu.core_type<tc>, window_params = [{transform_indices = @transform_0, window_bounds = array<i64: 1, 12, 16, 1>}, {pipeline_mode = #tpu.pipeline_mode<synchronous>, transform_indices = @transform_1, window_bounds = array<i64: 16, 16>}, {pipeline_mode = #tpu.pipeline_mode<synchronous>, transform_indices = @transform_2, window_bounds = array<i64: 3, 1, 32>}, {pipeline_mode = #tpu.pipeline_mode<synchronous>, transform_indices = @transform_3, window_bounds = array<i64: 1, 32>}, {pipeline_mode = #tpu.pipeline_mode<synchronous>, transform_indices = @transform_4, window_bounds = array<i64: 16, 8>}, {pipeline_mode = #tpu.pipeline_mode<synchronous>, transform_indices = @transform_5, window_bounds = array<i64: 1, 8>}, {pipeline_mode = #tpu.pipeline_mode<synchronous>, transform_indices = @transform_6, window_bounds = array<i64: 8, 8>}, {pipeline_mode = #tpu.pipeline_mode<synchronous>, transform_indices = @transform_7, window_bounds = array<i64: 1, 8>}, {pipeline_mode = #tpu.pipeline_mode<synchronous>, transform_indices = @transform_8, window_bounds = array<i64: 3, 8, 32>}, {pipeline_mode = #tpu.pipeline_mode<synchronous>, transform_indices = @transform_9, window_bounds = array<i64: 1, 32>}, {pipeline_mode = #tpu.pipeline_mode<synchronous>, transform_indices = @transform_10, window_bounds = array<i64: 16, 16>}, {pipeline_mode = #tpu.pipeline_mode<synchronous>, transform_indices = @transform_11, window_bounds = array<i64: 16, 16>}, {pipeline_mode = #tpu.pipeline_mode<synchronous>, transform_indices = @transform_12, window_bounds = array<i64: 3, 16, 32>}, {pipeline_mode = #tpu.pipeline_mode<synchronous>, transform_indices = @transform_13, window_bounds = array<i64: 1, 32>}, {pipeline_mode = #tpu.pipeline_mode<synchronous>, transform_indices = @transform_14, window_bounds = array<i64: 16, 8>}, {pipeline_mode = #tpu.pipeline_mode<synchronous>, transform_indices = @transform_15, window_bounds = array<i64: 1, 8>}, {pipeline_mode = #tpu.pipeline_mode<synchronous>, transform_indices = @transform_16, window_bounds = array<i64: 8, 8>}, {pipeline_mode = #tpu.pipeline_mode<synchronous>, transform_indices = @transform_17, window_bounds = array<i64: 1, 8>}, {pipeline_mode = #tpu.pipeline_mode<synchronous>, transform_indices = @transform_18, window_bounds = array<i64: 3, 8, 32>}, {pipeline_mode = #tpu.pipeline_mode<synchronous>, transform_indices = @transform_19, window_bounds = array<i64: 1, 32>}, {pipeline_mode = #tpu.pipeline_mode<synchronous>, transform_indices = @transform_20, window_bounds = array<i64: 16, 16>}, {pipeline_mode = #tpu.pipeline_mode<synchronous>, transform_indices = @transform_21, window_bounds = array<i64: 16, 16>}, {pipeline_mode = #tpu.pipeline_mode<synchronous>, transform_indices = @transform_22, window_bounds = array<i64: 4, 16, 64>}, {pipeline_mode = #tpu.pipeline_mode<synchronous>, transform_indices = @transform_23, window_bounds = array<i64: 1, 64>}, {pipeline_mode = #tpu.pipeline_mode<synchronous>, transform_indices = @transform_24, window_bounds = array<i64: 16, 32>}, {pipeline_mode = #tpu.pipeline_mode<synchronous>, transform_indices = @transform_25, window_bounds = array<i64: 16, 32>}, {pipeline_mode = #tpu.pipeline_mode<synchronous>, transform_indices = @transform_26, window_bounds = array<i64: 32, 32>}, {pipeline_mode = #tpu.pipeline_mode<synchronous>, transform_indices = @transform_27, window_bounds = array<i64: 1, 32>}, {pipeline_mode = #tpu.pipeline_mode<synchronous>, transform_indices = @transform_28, window_bounds = array<i64: 32, 1>}, {pipeline_mode = #tpu.pipeline_mode<synchronous>, transform_indices = @transform_29, window_bounds = array<i64: 1, 1>}, {transform_indices = @transform_30, window_bounds = array<i64: 1, 1, 16, 1>}]} {
    %c0 = arith.constant 0 : index
    %c0_0 = arith.constant 0 : index
    %c0_1 = arith.constant 0 : index
    %c0_2 = arith.constant 0 : index
    %0 = vector.load %arg1[%c0, %c0_0, %c0_1, %c0_2] : memref<1x12x16x1xf32, #tpu.memory_space<vmem>>, vector<1x12x16x1xf32>
    %1 = vector.shape_cast %0 : vector<1x12x16x1xf32> to vector<12x16x1xf32>
    %2 = vector.extract_strided_slice %1 {offsets = [0, 0, 0], sizes = [10, 16, 1], strides = [1, 1, 1]} : vector<12x16x1xf32> to vector<10x16x1xf32>
    %3 = vector.shape_cast %2 : vector<10x16x1xf32> to vector<160x1xf32>
    %c0_3 = arith.constant 0 : index
    %c0_4 = arith.constant 0 : index
    %c0_5 = arith.constant 0 : index
    %4 = vector.load %arg3[%c0_3, %c0_4, %c0_5] : memref<3x1x32xbf16, #tpu.memory_space<vmem>>, vector<1x1x32xbf16>
    %5 = vector.shape_cast %4 : vector<1x1x32xbf16> to vector<1x32xbf16>
    %6 = arith.extf %5 : vector<1x32xbf16> to vector<1x32xf32>
    %7 = vector.broadcast %3 : vector<160x1xf32> to vector<160x32xf32>
    %8 = vector.broadcast %6 : vector<1x32xf32> to vector<160x32xf32>
    %9 = arith.mulf %7, %8 : vector<160x32xf32>
    %10 = vector.extract_strided_slice %1 {offsets = [1, 0, 0], sizes = [10, 16, 1], strides = [1, 1, 1]} : vector<12x16x1xf32> to vector<10x16x1xf32>
    %11 = vector.shape_cast %10 : vector<10x16x1xf32> to vector<160x1xf32>
    %c1 = arith.constant 1 : index
    %c0_6 = arith.constant 0 : index
    %c0_7 = arith.constant 0 : index
    %12 = vector.load %arg3[%c1, %c0_6, %c0_7] : memref<3x1x32xbf16, #tpu.memory_space<vmem>>, vector<1x1x32xbf16>
    %13 = vector.shape_cast %12 : vector<1x1x32xbf16> to vector<1x32xbf16>
    %14 = arith.extf %13 : vector<1x32xbf16> to vector<1x32xf32>
    %15 = vector.broadcast %11 : vector<160x1xf32> to vector<160x32xf32>
    %16 = vector.broadcast %14 : vector<1x32xf32> to vector<160x32xf32>
    %17 = arith.mulf %15, %16 : vector<160x32xf32>
    %18 = arith.addf %9, %17 : vector<160x32xf32>
    %19 = vector.extract_strided_slice %1 {offsets = [2, 0, 0], sizes = [10, 16, 1], strides = [1, 1, 1]} : vector<12x16x1xf32> to vector<10x16x1xf32>
    %20 = vector.shape_cast %19 : vector<10x16x1xf32> to vector<160x1xf32>
    %c2 = arith.constant 2 : index
    %c0_8 = arith.constant 0 : index
    %c0_9 = arith.constant 0 : index
    %21 = vector.load %arg3[%c2, %c0_8, %c0_9] : memref<3x1x32xbf16, #tpu.memory_space<vmem>>, vector<1x1x32xbf16>
    %22 = vector.shape_cast %21 : vector<1x1x32xbf16> to vector<1x32xbf16>
    %23 = arith.extf %22 : vector<1x32xbf16> to vector<1x32xf32>
    %24 = vector.broadcast %20 : vector<160x1xf32> to vector<160x32xf32>
    %25 = vector.broadcast %23 : vector<1x32xf32> to vector<160x32xf32>
    %26 = arith.mulf %24, %25 : vector<160x32xf32>
    %27 = arith.addf %18, %26 : vector<160x32xf32>
    %c0_10 = arith.constant 0 : index
    %c0_11 = arith.constant 0 : index
    %28 = vector.load %arg4[%c0_10, %c0_11] : memref<1x32xf32, #tpu.memory_space<vmem>>, vector<1x32xf32>
    %29 = vector.broadcast %28 : vector<1x32xf32> to vector<160x32xf32>
    %30 = arith.addf %27, %29 : vector<160x32xf32>
    %31 = vector.extract_strided_slice %30 {offsets = [0, 0], sizes = [160, 16], strides = [1, 1]} : vector<160x32xf32> to vector<160x16xf32>
    %32 = vector.extract_strided_slice %30 {offsets = [0, 16], sizes = [160, 16], strides = [1, 1]} : vector<160x32xf32> to vector<160x16xf32>
    %33 = arith.negf %32 : vector<160x16xf32>
    %34 = math.exp %33 : vector<160x16xf32>
    %cst = arith.constant 1.000000e+00 : f32
    %35 = vector.broadcast %cst : f32 to vector<160x16xf32>
    %36 = arith.addf %35, %34 : vector<160x16xf32>
    %37 = arith.divf %35, %36 : vector<160x16xf32>
    %38 = arith.mulf %31, %37 : vector<160x16xf32>
    %39 = vector.shape_cast %38 : vector<160x16xf32> to vector<10x16x16xf32>
    %40 = vector.shape_cast %39 : vector<10x16x16xf32> to vector<160x16xf32>
    %c0_12 = arith.constant 0 : index
    %c0_13 = arith.constant 0 : index
    %41 = vector.load %arg5[%c0_12, %c0_13] : memref<16x8xbf16, #tpu.memory_space<vmem>>, vector<16x8xbf16>
    %42 = arith.truncf %40 : vector<160x16xf32> to vector<160x16xbf16>
    %cst_14 = arith.constant dense<0.000000e+00> : vector<160x8xf32>
    %43 = tpu.matmul %42, %41, %cst_14 {dimension_numbers = #tpu.dot_dimension_numbers<[1], [0], [0], [1], [0, 0, 1, 1], [], []>} : vector<160x16xbf16>, vector<16x8xbf16>, vector<160x8xf32> -> vector<160x8xf32>
    %c0_15 = arith.constant 0 : index
    %c0_16 = arith.constant 0 : index
    %44 = vector.load %arg6[%c0_15, %c0_16] : memref<1x8xf32, #tpu.memory_space<vmem>>, vector<1x8xf32>
    %45 = vector.broadcast %44 : vector<1x8xf32> to vector<160x8xf32>
    %46 = arith.addf %43, %45 : vector<160x8xf32>
    %c0_17 = arith.constant 0 : index
    %c0_18 = arith.constant 0 : index
    %47 = vector.load %arg2[%c0_17, %c0_18] : memref<16x16xbf16, #tpu.memory_space<vmem>>, vector<16x16xbf16>
    %48 = vector.extract_strided_slice %46 {offsets = [0, 0], sizes = [16, 8], strides = [1, 1]} : vector<160x8xf32> to vector<16x8xf32>
    %49 = arith.truncf %48 : vector<16x8xf32> to vector<16x8xbf16>
    %cst_19 = arith.constant dense<0.000000e+00> : vector<16x8xf32>
    %50 = tpu.matmul %47, %49, %cst_19 {dimension_numbers = #tpu.dot_dimension_numbers<[1], [0], [0], [1], [0, 0, 1, 1], [], []>} : vector<16x16xbf16>, vector<16x8xbf16>, vector<16x8xf32> -> vector<16x8xf32>
    %51 = vector.extract_strided_slice %46 {offsets = [16, 0], sizes = [16, 8], strides = [1, 1]} : vector<160x8xf32> to vector<16x8xf32>
    %52 = arith.truncf %51 : vector<16x8xf32> to vector<16x8xbf16>
    %cst_20 = arith.constant dense<0.000000e+00> : vector<16x8xf32>
    %53 = tpu.matmul %47, %52, %cst_20 {dimension_numbers = #tpu.dot_dimension_numbers<[1], [0], [0], [1], [0, 0, 1, 1], [], []>} : vector<16x16xbf16>, vector<16x8xbf16>, vector<16x8xf32> -> vector<16x8xf32>
    %54 = vector.extract_strided_slice %46 {offsets = [32, 0], sizes = [16, 8], strides = [1, 1]} : vector<160x8xf32> to vector<16x8xf32>
    %55 = arith.truncf %54 : vector<16x8xf32> to vector<16x8xbf16>
    %cst_21 = arith.constant dense<0.000000e+00> : vector<16x8xf32>
    %56 = tpu.matmul %47, %55, %cst_21 {dimension_numbers = #tpu.dot_dimension_numbers<[1], [0], [0], [1], [0, 0, 1, 1], [], []>} : vector<16x16xbf16>, vector<16x8xbf16>, vector<16x8xf32> -> vector<16x8xf32>
    %57 = vector.extract_strided_slice %46 {offsets = [48, 0], sizes = [16, 8], strides = [1, 1]} : vector<160x8xf32> to vector<16x8xf32>
    %58 = arith.truncf %57 : vector<16x8xf32> to vector<16x8xbf16>
    %cst_22 = arith.constant dense<0.000000e+00> : vector<16x8xf32>
    %59 = tpu.matmul %47, %58, %cst_22 {dimension_numbers = #tpu.dot_dimension_numbers<[1], [0], [0], [1], [0, 0, 1, 1], [], []>} : vector<16x16xbf16>, vector<16x8xbf16>, vector<16x8xf32> -> vector<16x8xf32>
    %60 = vector.extract_strided_slice %46 {offsets = [64, 0], sizes = [16, 8], strides = [1, 1]} : vector<160x8xf32> to vector<16x8xf32>
    %61 = arith.truncf %60 : vector<16x8xf32> to vector<16x8xbf16>
    %cst_23 = arith.constant dense<0.000000e+00> : vector<16x8xf32>
    %62 = tpu.matmul %47, %61, %cst_23 {dimension_numbers = #tpu.dot_dimension_numbers<[1], [0], [0], [1], [0, 0, 1, 1], [], []>} : vector<16x16xbf16>, vector<16x8xbf16>, vector<16x8xf32> -> vector<16x8xf32>
    %63 = vector.extract_strided_slice %46 {offsets = [80, 0], sizes = [16, 8], strides = [1, 1]} : vector<160x8xf32> to vector<16x8xf32>
    %64 = arith.truncf %63 : vector<16x8xf32> to vector<16x8xbf16>
    %cst_24 = arith.constant dense<0.000000e+00> : vector<16x8xf32>
    %65 = tpu.matmul %47, %64, %cst_24 {dimension_numbers = #tpu.dot_dimension_numbers<[1], [0], [0], [1], [0, 0, 1, 1], [], []>} : vector<16x16xbf16>, vector<16x8xbf16>, vector<16x8xf32> -> vector<16x8xf32>
    %66 = vector.extract_strided_slice %46 {offsets = [96, 0], sizes = [16, 8], strides = [1, 1]} : vector<160x8xf32> to vector<16x8xf32>
    %67 = arith.truncf %66 : vector<16x8xf32> to vector<16x8xbf16>
    %cst_25 = arith.constant dense<0.000000e+00> : vector<16x8xf32>
    %68 = tpu.matmul %47, %67, %cst_25 {dimension_numbers = #tpu.dot_dimension_numbers<[1], [0], [0], [1], [0, 0, 1, 1], [], []>} : vector<16x16xbf16>, vector<16x8xbf16>, vector<16x8xf32> -> vector<16x8xf32>
    %69 = vector.extract_strided_slice %46 {offsets = [112, 0], sizes = [16, 8], strides = [1, 1]} : vector<160x8xf32> to vector<16x8xf32>
    %70 = arith.truncf %69 : vector<16x8xf32> to vector<16x8xbf16>
    %cst_26 = arith.constant dense<0.000000e+00> : vector<16x8xf32>
    %71 = tpu.matmul %47, %70, %cst_26 {dimension_numbers = #tpu.dot_dimension_numbers<[1], [0], [0], [1], [0, 0, 1, 1], [], []>} : vector<16x16xbf16>, vector<16x8xbf16>, vector<16x8xf32> -> vector<16x8xf32>
    %72 = vector.extract_strided_slice %46 {offsets = [128, 0], sizes = [16, 8], strides = [1, 1]} : vector<160x8xf32> to vector<16x8xf32>
    %73 = arith.truncf %72 : vector<16x8xf32> to vector<16x8xbf16>
    %cst_27 = arith.constant dense<0.000000e+00> : vector<16x8xf32>
    %74 = tpu.matmul %47, %73, %cst_27 {dimension_numbers = #tpu.dot_dimension_numbers<[1], [0], [0], [1], [0, 0, 1, 1], [], []>} : vector<16x16xbf16>, vector<16x8xbf16>, vector<16x8xf32> -> vector<16x8xf32>
    %75 = vector.extract_strided_slice %46 {offsets = [144, 0], sizes = [16, 8], strides = [1, 1]} : vector<160x8xf32> to vector<16x8xf32>
    %76 = arith.truncf %75 : vector<16x8xf32> to vector<16x8xbf16>
    %cst_28 = arith.constant dense<0.000000e+00> : vector<16x8xf32>
    %77 = tpu.matmul %47, %76, %cst_28 {dimension_numbers = #tpu.dot_dimension_numbers<[1], [0], [0], [1], [0, 0, 1, 1], [], []>} : vector<16x16xbf16>, vector<16x8xbf16>, vector<16x8xf32> -> vector<16x8xf32>
    %78 = tpu.concatenate %50, %53, %56, %59, %62, %65, %68, %71, %74, %77 in 0 : vector<16x8xf32>, vector<16x8xf32>, vector<16x8xf32>, vector<16x8xf32>, vector<16x8xf32>, vector<16x8xf32>, vector<16x8xf32>, vector<16x8xf32>, vector<16x8xf32>, vector<16x8xf32> -> vector<160x8xf32>
    %c0_29 = arith.constant 0 : index
    %c0_30 = arith.constant 0 : index
    %79 = vector.load %arg7[%c0_29, %c0_30] : memref<8x8xbf16, #tpu.memory_space<vmem>>, vector<8x8xbf16>
    %80 = arith.truncf %78 : vector<160x8xf32> to vector<160x8xbf16>
    %cst_31 = arith.constant dense<0.000000e+00> : vector<160x8xf32>
    %81 = tpu.matmul %80, %79, %cst_31 {dimension_numbers = #tpu.dot_dimension_numbers<[1], [0], [0], [1], [0, 0, 1, 1], [], []>} : vector<160x8xbf16>, vector<8x8xbf16>, vector<160x8xf32> -> vector<160x8xf32>
    %c0_32 = arith.constant 0 : index
    %c0_33 = arith.constant 0 : index
    %82 = vector.load %arg8[%c0_32, %c0_33] : memref<1x8xf32, #tpu.memory_space<vmem>>, vector<1x8xf32>
    %83 = vector.broadcast %82 : vector<1x8xf32> to vector<160x8xf32>
    %84 = arith.addf %81, %83 : vector<160x8xf32>
    %85 = arith.addf %84, %46 : vector<160x8xf32>
    %cst_34 = arith.constant 0.000000e+00 : f32
    %86 = vector.broadcast %cst_34 : f32 to vector<160x8xf32>
    %87 = arith.maximumf %85, %86 : vector<160x8xf32>
    %88 = vector.shape_cast %87 : vector<160x8xf32> to vector<10x16x8xf32>
    %89 = vector.extract_strided_slice %88 {offsets = [0, 0, 0], sizes = [8, 16, 8], strides = [1, 1, 1]} : vector<10x16x8xf32> to vector<8x16x8xf32>
    %90 = vector.shape_cast %89 : vector<8x16x8xf32> to vector<128x8xf32>
    %c0_35 = arith.constant 0 : index
    %c0_36 = arith.constant 0 : index
    %c0_37 = arith.constant 0 : index
    %91 = vector.load %arg9[%c0_35, %c0_36, %c0_37] : memref<3x8x32xbf16, #tpu.memory_space<vmem>>, vector<1x8x32xbf16>
    %92 = vector.shape_cast %91 : vector<1x8x32xbf16> to vector<8x32xbf16>
    %93 = arith.truncf %90 : vector<128x8xf32> to vector<128x8xbf16>
    %cst_38 = arith.constant dense<0.000000e+00> : vector<128x32xf32>
    %94 = tpu.matmul %93, %92, %cst_38 {dimension_numbers = #tpu.dot_dimension_numbers<[1], [0], [0], [1], [0, 0, 1, 1], [], []>} : vector<128x8xbf16>, vector<8x32xbf16>, vector<128x32xf32> -> vector<128x32xf32>
    %95 = vector.extract_strided_slice %88 {offsets = [1, 0, 0], sizes = [8, 16, 8], strides = [1, 1, 1]} : vector<10x16x8xf32> to vector<8x16x8xf32>
    %96 = vector.shape_cast %95 : vector<8x16x8xf32> to vector<128x8xf32>
    %c1_39 = arith.constant 1 : index
    %c0_40 = arith.constant 0 : index
    %c0_41 = arith.constant 0 : index
    %97 = vector.load %arg9[%c1_39, %c0_40, %c0_41] : memref<3x8x32xbf16, #tpu.memory_space<vmem>>, vector<1x8x32xbf16>
    %98 = vector.shape_cast %97 : vector<1x8x32xbf16> to vector<8x32xbf16>
    %99 = arith.truncf %96 : vector<128x8xf32> to vector<128x8xbf16>
    %cst_42 = arith.constant dense<0.000000e+00> : vector<128x32xf32>
    %100 = tpu.matmul %99, %98, %cst_42 {dimension_numbers = #tpu.dot_dimension_numbers<[1], [0], [0], [1], [0, 0, 1, 1], [], []>} : vector<128x8xbf16>, vector<8x32xbf16>, vector<128x32xf32> -> vector<128x32xf32>
    %101 = arith.addf %94, %100 : vector<128x32xf32>
    %102 = vector.extract_strided_slice %88 {offsets = [2, 0, 0], sizes = [8, 16, 8], strides = [1, 1, 1]} : vector<10x16x8xf32> to vector<8x16x8xf32>
    %103 = vector.shape_cast %102 : vector<8x16x8xf32> to vector<128x8xf32>
    %c2_43 = arith.constant 2 : index
    %c0_44 = arith.constant 0 : index
    %c0_45 = arith.constant 0 : index
    %104 = vector.load %arg9[%c2_43, %c0_44, %c0_45] : memref<3x8x32xbf16, #tpu.memory_space<vmem>>, vector<1x8x32xbf16>
    %105 = vector.shape_cast %104 : vector<1x8x32xbf16> to vector<8x32xbf16>
    %106 = arith.truncf %103 : vector<128x8xf32> to vector<128x8xbf16>
    %cst_46 = arith.constant dense<0.000000e+00> : vector<128x32xf32>
    %107 = tpu.matmul %106, %105, %cst_46 {dimension_numbers = #tpu.dot_dimension_numbers<[1], [0], [0], [1], [0, 0, 1, 1], [], []>} : vector<128x8xbf16>, vector<8x32xbf16>, vector<128x32xf32> -> vector<128x32xf32>
    %108 = arith.addf %101, %107 : vector<128x32xf32>
    %c0_47 = arith.constant 0 : index
    %c0_48 = arith.constant 0 : index
    %109 = vector.load %arg10[%c0_47, %c0_48] : memref<1x32xf32, #tpu.memory_space<vmem>>, vector<1x32xf32>
    %110 = vector.broadcast %109 : vector<1x32xf32> to vector<128x32xf32>
    %111 = arith.addf %108, %110 : vector<128x32xf32>
    %112 = vector.extract_strided_slice %111 {offsets = [0, 0], sizes = [128, 16], strides = [1, 1]} : vector<128x32xf32> to vector<128x16xf32>
    %113 = vector.extract_strided_slice %111 {offsets = [0, 16], sizes = [128, 16], strides = [1, 1]} : vector<128x32xf32> to vector<128x16xf32>
    %114 = arith.negf %113 : vector<128x16xf32>
    %115 = math.exp %114 : vector<128x16xf32>
    %cst_49 = arith.constant 1.000000e+00 : f32
    %116 = vector.broadcast %cst_49 : f32 to vector<128x16xf32>
    %117 = arith.addf %116, %115 : vector<128x16xf32>
    %118 = arith.divf %116, %117 : vector<128x16xf32>
    %119 = arith.mulf %112, %118 : vector<128x16xf32>
    %120 = vector.shape_cast %119 : vector<128x16xf32> to vector<8x16x16xf32>
    %cst_50 = arith.constant dense<0.000000e+00> : vector<8x16xf32>
    %121 = vector.multi_reduction <add>, %120, %cst_50 [2] : vector<8x16x16xf32> to vector<8x16xf32>
    %122 = vector.shape_cast %121 : vector<8x16xf32> to vector<8x16x1xf32>
    %cst_51 = arith.constant dense<0.000000e+00> : vector<8x1xf32>
    %123 = vector.multi_reduction <add>, %122, %cst_51 [1] : vector<8x16x1xf32> to vector<8x1xf32>
    %124 = vector.shape_cast %123 : vector<8x1xf32> to vector<8x1x1xf32>
    %cst_52 = arith.constant 2.560000e+02 : f32
    %125 = vector.broadcast %cst_52 : f32 to vector<8x1x1xf32>
    %126 = arith.divf %124, %125 : vector<8x1x1xf32>
    %127 = vector.broadcast %126 : vector<8x1x1xf32> to vector<8x16x16xf32>
    %128 = arith.subf %120, %127 : vector<8x16x16xf32>
    %129 = arith.mulf %128, %128 : vector<8x16x16xf32>
    %cst_53 = arith.constant dense<0.000000e+00> : vector<8x16xf32>
    %130 = vector.multi_reduction <add>, %129, %cst_53 [2] : vector<8x16x16xf32> to vector<8x16xf32>
    %131 = vector.shape_cast %130 : vector<8x16xf32> to vector<8x16x1xf32>
    %cst_54 = arith.constant dense<0.000000e+00> : vector<8x1xf32>
    %132 = vector.multi_reduction <add>, %131, %cst_54 [1] : vector<8x16x1xf32> to vector<8x1xf32>
    %133 = vector.shape_cast %132 : vector<8x1xf32> to vector<8x1x1xf32>
    %cst_55 = arith.constant 2.560000e+02 : f32
    %134 = vector.broadcast %cst_55 : f32 to vector<8x1x1xf32>
    %135 = arith.divf %133, %134 : vector<8x1x1xf32>
    %cst_56 = arith.constant 9.99999996E-13 : f32
    %136 = vector.broadcast %cst_56 : f32 to vector<8x1x1xf32>
    %137 = arith.addf %135, %136 : vector<8x1x1xf32>
    %138 = math.rsqrt %137 : vector<8x1x1xf32>
    %139 = vector.broadcast %138 : vector<8x1x1xf32> to vector<8x16x16xf32>
    %140 = arith.mulf %128, %139 : vector<8x16x16xf32>
    %c0_57 = arith.constant 0 : index
    %c0_58 = arith.constant 0 : index
    %141 = vector.load %arg11[%c0_57, %c0_58] : memref<16x16xf32, #tpu.memory_space<vmem>>, vector<16x16xf32>
    %142 = vector.shape_cast %141 : vector<16x16xf32> to vector<1x16x16xf32>
    %143 = vector.broadcast %142 : vector<1x16x16xf32> to vector<8x16x16xf32>
    %144 = arith.mulf %140, %143 : vector<8x16x16xf32>
    %c0_59 = arith.constant 0 : index
    %c0_60 = arith.constant 0 : index
    %145 = vector.load %arg12[%c0_59, %c0_60] : memref<16x16xf32, #tpu.memory_space<vmem>>, vector<16x16xf32>
    %146 = vector.shape_cast %145 : vector<16x16xf32> to vector<1x16x16xf32>
    %147 = vector.broadcast %146 : vector<1x16x16xf32> to vector<8x16x16xf32>
    %148 = arith.addf %144, %147 : vector<8x16x16xf32>
    %149 = vector.extract_strided_slice %148 {offsets = [0, 0, 0], sizes = [6, 16, 16], strides = [1, 1, 1]} : vector<8x16x16xf32> to vector<6x16x16xf32>
    %150 = vector.shape_cast %149 : vector<6x16x16xf32> to vector<96x16xf32>
    %c0_61 = arith.constant 0 : index
    %c0_62 = arith.constant 0 : index
    %c0_63 = arith.constant 0 : index
    %151 = vector.load %arg13[%c0_61, %c0_62, %c0_63] : memref<3x16x32xbf16, #tpu.memory_space<vmem>>, vector<1x16x32xbf16>
    %152 = vector.shape_cast %151 : vector<1x16x32xbf16> to vector<16x32xbf16>
    %153 = arith.truncf %150 : vector<96x16xf32> to vector<96x16xbf16>
    %cst_64 = arith.constant dense<0.000000e+00> : vector<96x32xf32>
    %154 = tpu.matmul %153, %152, %cst_64 {dimension_numbers = #tpu.dot_dimension_numbers<[1], [0], [0], [1], [0, 0, 1, 1], [], []>} : vector<96x16xbf16>, vector<16x32xbf16>, vector<96x32xf32> -> vector<96x32xf32>
    %155 = vector.extract_strided_slice %148 {offsets = [1, 0, 0], sizes = [6, 16, 16], strides = [1, 1, 1]} : vector<8x16x16xf32> to vector<6x16x16xf32>
    %156 = vector.shape_cast %155 : vector<6x16x16xf32> to vector<96x16xf32>
    %c1_65 = arith.constant 1 : index
    %c0_66 = arith.constant 0 : index
    %c0_67 = arith.constant 0 : index
    %157 = vector.load %arg13[%c1_65, %c0_66, %c0_67] : memref<3x16x32xbf16, #tpu.memory_space<vmem>>, vector<1x16x32xbf16>
    %158 = vector.shape_cast %157 : vector<1x16x32xbf16> to vector<16x32xbf16>
    %159 = arith.truncf %156 : vector<96x16xf32> to vector<96x16xbf16>
    %cst_68 = arith.constant dense<0.000000e+00> : vector<96x32xf32>
    %160 = tpu.matmul %159, %158, %cst_68 {dimension_numbers = #tpu.dot_dimension_numbers<[1], [0], [0], [1], [0, 0, 1, 1], [], []>} : vector<96x16xbf16>, vector<16x32xbf16>, vector<96x32xf32> -> vector<96x32xf32>
    %161 = arith.addf %154, %160 : vector<96x32xf32>
    %162 = vector.extract_strided_slice %148 {offsets = [2, 0, 0], sizes = [6, 16, 16], strides = [1, 1, 1]} : vector<8x16x16xf32> to vector<6x16x16xf32>
    %163 = vector.shape_cast %162 : vector<6x16x16xf32> to vector<96x16xf32>
    %c2_69 = arith.constant 2 : index
    %c0_70 = arith.constant 0 : index
    %c0_71 = arith.constant 0 : index
    %164 = vector.load %arg13[%c2_69, %c0_70, %c0_71] : memref<3x16x32xbf16, #tpu.memory_space<vmem>>, vector<1x16x32xbf16>
    %165 = vector.shape_cast %164 : vector<1x16x32xbf16> to vector<16x32xbf16>
    %166 = arith.truncf %163 : vector<96x16xf32> to vector<96x16xbf16>
    %cst_72 = arith.constant dense<0.000000e+00> : vector<96x32xf32>
    %167 = tpu.matmul %166, %165, %cst_72 {dimension_numbers = #tpu.dot_dimension_numbers<[1], [0], [0], [1], [0, 0, 1, 1], [], []>} : vector<96x16xbf16>, vector<16x32xbf16>, vector<96x32xf32> -> vector<96x32xf32>
    %168 = arith.addf %161, %167 : vector<96x32xf32>
    %c0_73 = arith.constant 0 : index
    %c0_74 = arith.constant 0 : index
    %169 = vector.load %arg14[%c0_73, %c0_74] : memref<1x32xf32, #tpu.memory_space<vmem>>, vector<1x32xf32>
    %170 = vector.broadcast %169 : vector<1x32xf32> to vector<96x32xf32>
    %171 = arith.addf %168, %170 : vector<96x32xf32>
    %172 = vector.extract_strided_slice %171 {offsets = [0, 0], sizes = [96, 16], strides = [1, 1]} : vector<96x32xf32> to vector<96x16xf32>
    %173 = vector.extract_strided_slice %171 {offsets = [0, 16], sizes = [96, 16], strides = [1, 1]} : vector<96x32xf32> to vector<96x16xf32>
    %174 = arith.negf %173 : vector<96x16xf32>
    %175 = math.exp %174 : vector<96x16xf32>
    %cst_75 = arith.constant 1.000000e+00 : f32
    %176 = vector.broadcast %cst_75 : f32 to vector<96x16xf32>
    %177 = arith.addf %176, %175 : vector<96x16xf32>
    %178 = arith.divf %176, %177 : vector<96x16xf32>
    %179 = arith.mulf %172, %178 : vector<96x16xf32>
    %180 = vector.shape_cast %179 : vector<96x16xf32> to vector<6x16x16xf32>
    %181 = vector.shape_cast %180 : vector<6x16x16xf32> to vector<96x16xf32>
    %c0_76 = arith.constant 0 : index
    %c0_77 = arith.constant 0 : index
    %182 = vector.load %arg15[%c0_76, %c0_77] : memref<16x8xbf16, #tpu.memory_space<vmem>>, vector<16x8xbf16>
    %183 = arith.truncf %181 : vector<96x16xf32> to vector<96x16xbf16>
    %cst_78 = arith.constant dense<0.000000e+00> : vector<96x8xf32>
    %184 = tpu.matmul %183, %182, %cst_78 {dimension_numbers = #tpu.dot_dimension_numbers<[1], [0], [0], [1], [0, 0, 1, 1], [], []>} : vector<96x16xbf16>, vector<16x8xbf16>, vector<96x8xf32> -> vector<96x8xf32>
    %c0_79 = arith.constant 0 : index
    %c0_80 = arith.constant 0 : index
    %185 = vector.load %arg16[%c0_79, %c0_80] : memref<1x8xf32, #tpu.memory_space<vmem>>, vector<1x8xf32>
    %186 = vector.broadcast %185 : vector<1x8xf32> to vector<96x8xf32>
    %187 = arith.addf %184, %186 : vector<96x8xf32>
    %c0_81 = arith.constant 0 : index
    %c0_82 = arith.constant 0 : index
    %188 = vector.load %arg2[%c0_81, %c0_82] : memref<16x16xbf16, #tpu.memory_space<vmem>>, vector<16x16xbf16>
    %189 = vector.extract_strided_slice %187 {offsets = [0, 0], sizes = [16, 8], strides = [1, 1]} : vector<96x8xf32> to vector<16x8xf32>
    %190 = arith.truncf %189 : vector<16x8xf32> to vector<16x8xbf16>
    %cst_83 = arith.constant dense<0.000000e+00> : vector<16x8xf32>
    %191 = tpu.matmul %188, %190, %cst_83 {dimension_numbers = #tpu.dot_dimension_numbers<[1], [0], [0], [1], [0, 0, 1, 1], [], []>} : vector<16x16xbf16>, vector<16x8xbf16>, vector<16x8xf32> -> vector<16x8xf32>
    %192 = vector.extract_strided_slice %187 {offsets = [16, 0], sizes = [16, 8], strides = [1, 1]} : vector<96x8xf32> to vector<16x8xf32>
    %193 = arith.truncf %192 : vector<16x8xf32> to vector<16x8xbf16>
    %cst_84 = arith.constant dense<0.000000e+00> : vector<16x8xf32>
    %194 = tpu.matmul %188, %193, %cst_84 {dimension_numbers = #tpu.dot_dimension_numbers<[1], [0], [0], [1], [0, 0, 1, 1], [], []>} : vector<16x16xbf16>, vector<16x8xbf16>, vector<16x8xf32> -> vector<16x8xf32>
    %195 = vector.extract_strided_slice %187 {offsets = [32, 0], sizes = [16, 8], strides = [1, 1]} : vector<96x8xf32> to vector<16x8xf32>
    %196 = arith.truncf %195 : vector<16x8xf32> to vector<16x8xbf16>
    %cst_85 = arith.constant dense<0.000000e+00> : vector<16x8xf32>
    %197 = tpu.matmul %188, %196, %cst_85 {dimension_numbers = #tpu.dot_dimension_numbers<[1], [0], [0], [1], [0, 0, 1, 1], [], []>} : vector<16x16xbf16>, vector<16x8xbf16>, vector<16x8xf32> -> vector<16x8xf32>
    %198 = vector.extract_strided_slice %187 {offsets = [48, 0], sizes = [16, 8], strides = [1, 1]} : vector<96x8xf32> to vector<16x8xf32>
    %199 = arith.truncf %198 : vector<16x8xf32> to vector<16x8xbf16>
    %cst_86 = arith.constant dense<0.000000e+00> : vector<16x8xf32>
    %200 = tpu.matmul %188, %199, %cst_86 {dimension_numbers = #tpu.dot_dimension_numbers<[1], [0], [0], [1], [0, 0, 1, 1], [], []>} : vector<16x16xbf16>, vector<16x8xbf16>, vector<16x8xf32> -> vector<16x8xf32>
    %201 = vector.extract_strided_slice %187 {offsets = [64, 0], sizes = [16, 8], strides = [1, 1]} : vector<96x8xf32> to vector<16x8xf32>
    %202 = arith.truncf %201 : vector<16x8xf32> to vector<16x8xbf16>
    %cst_87 = arith.constant dense<0.000000e+00> : vector<16x8xf32>
    %203 = tpu.matmul %188, %202, %cst_87 {dimension_numbers = #tpu.dot_dimension_numbers<[1], [0], [0], [1], [0, 0, 1, 1], [], []>} : vector<16x16xbf16>, vector<16x8xbf16>, vector<16x8xf32> -> vector<16x8xf32>
    %204 = vector.extract_strided_slice %187 {offsets = [80, 0], sizes = [16, 8], strides = [1, 1]} : vector<96x8xf32> to vector<16x8xf32>
    %205 = arith.truncf %204 : vector<16x8xf32> to vector<16x8xbf16>
    %cst_88 = arith.constant dense<0.000000e+00> : vector<16x8xf32>
    %206 = tpu.matmul %188, %205, %cst_88 {dimension_numbers = #tpu.dot_dimension_numbers<[1], [0], [0], [1], [0, 0, 1, 1], [], []>} : vector<16x16xbf16>, vector<16x8xbf16>, vector<16x8xf32> -> vector<16x8xf32>
    %207 = tpu.concatenate %191, %194, %197, %200, %203, %206 in 0 : vector<16x8xf32>, vector<16x8xf32>, vector<16x8xf32>, vector<16x8xf32>, vector<16x8xf32>, vector<16x8xf32> -> vector<96x8xf32>
    %c0_89 = arith.constant 0 : index
    %c0_90 = arith.constant 0 : index
    %208 = vector.load %arg17[%c0_89, %c0_90] : memref<8x8xbf16, #tpu.memory_space<vmem>>, vector<8x8xbf16>
    %209 = arith.truncf %207 : vector<96x8xf32> to vector<96x8xbf16>
    %cst_91 = arith.constant dense<0.000000e+00> : vector<96x8xf32>
    %210 = tpu.matmul %209, %208, %cst_91 {dimension_numbers = #tpu.dot_dimension_numbers<[1], [0], [0], [1], [0, 0, 1, 1], [], []>} : vector<96x8xbf16>, vector<8x8xbf16>, vector<96x8xf32> -> vector<96x8xf32>
    %c0_92 = arith.constant 0 : index
    %c0_93 = arith.constant 0 : index
    %211 = vector.load %arg18[%c0_92, %c0_93] : memref<1x8xf32, #tpu.memory_space<vmem>>, vector<1x8xf32>
    %212 = vector.broadcast %211 : vector<1x8xf32> to vector<96x8xf32>
    %213 = arith.addf %210, %212 : vector<96x8xf32>
    %214 = arith.addf %213, %187 : vector<96x8xf32>
    %cst_94 = arith.constant 0.000000e+00 : f32
    %215 = vector.broadcast %cst_94 : f32 to vector<96x8xf32>
    %216 = arith.maximumf %214, %215 : vector<96x8xf32>
    %217 = vector.shape_cast %216 : vector<96x8xf32> to vector<6x16x8xf32>
    %218 = vector.extract_strided_slice %217 {offsets = [0, 0, 0], sizes = [4, 16, 8], strides = [1, 1, 1]} : vector<6x16x8xf32> to vector<4x16x8xf32>
    %219 = vector.shape_cast %218 : vector<4x16x8xf32> to vector<64x8xf32>
    %c0_95 = arith.constant 0 : index
    %c0_96 = arith.constant 0 : index
    %c0_97 = arith.constant 0 : index
    %220 = vector.load %arg19[%c0_95, %c0_96, %c0_97] : memref<3x8x32xbf16, #tpu.memory_space<vmem>>, vector<1x8x32xbf16>
    %221 = vector.shape_cast %220 : vector<1x8x32xbf16> to vector<8x32xbf16>
    %222 = arith.truncf %219 : vector<64x8xf32> to vector<64x8xbf16>
    %cst_98 = arith.constant dense<0.000000e+00> : vector<64x32xf32>
    %223 = tpu.matmul %222, %221, %cst_98 {dimension_numbers = #tpu.dot_dimension_numbers<[1], [0], [0], [1], [0, 0, 1, 1], [], []>} : vector<64x8xbf16>, vector<8x32xbf16>, vector<64x32xf32> -> vector<64x32xf32>
    %224 = vector.extract_strided_slice %217 {offsets = [1, 0, 0], sizes = [4, 16, 8], strides = [1, 1, 1]} : vector<6x16x8xf32> to vector<4x16x8xf32>
    %225 = vector.shape_cast %224 : vector<4x16x8xf32> to vector<64x8xf32>
    %c1_99 = arith.constant 1 : index
    %c0_100 = arith.constant 0 : index
    %c0_101 = arith.constant 0 : index
    %226 = vector.load %arg19[%c1_99, %c0_100, %c0_101] : memref<3x8x32xbf16, #tpu.memory_space<vmem>>, vector<1x8x32xbf16>
    %227 = vector.shape_cast %226 : vector<1x8x32xbf16> to vector<8x32xbf16>
    %228 = arith.truncf %225 : vector<64x8xf32> to vector<64x8xbf16>
    %cst_102 = arith.constant dense<0.000000e+00> : vector<64x32xf32>
    %229 = tpu.matmul %228, %227, %cst_102 {dimension_numbers = #tpu.dot_dimension_numbers<[1], [0], [0], [1], [0, 0, 1, 1], [], []>} : vector<64x8xbf16>, vector<8x32xbf16>, vector<64x32xf32> -> vector<64x32xf32>
    %230 = arith.addf %223, %229 : vector<64x32xf32>
    %231 = vector.extract_strided_slice %217 {offsets = [2, 0, 0], sizes = [4, 16, 8], strides = [1, 1, 1]} : vector<6x16x8xf32> to vector<4x16x8xf32>
    %232 = vector.shape_cast %231 : vector<4x16x8xf32> to vector<64x8xf32>
    %c2_103 = arith.constant 2 : index
    %c0_104 = arith.constant 0 : index
    %c0_105 = arith.constant 0 : index
    %233 = vector.load %arg19[%c2_103, %c0_104, %c0_105] : memref<3x8x32xbf16, #tpu.memory_space<vmem>>, vector<1x8x32xbf16>
    %234 = vector.shape_cast %233 : vector<1x8x32xbf16> to vector<8x32xbf16>
    %235 = arith.truncf %232 : vector<64x8xf32> to vector<64x8xbf16>
    %cst_106 = arith.constant dense<0.000000e+00> : vector<64x32xf32>
    %236 = tpu.matmul %235, %234, %cst_106 {dimension_numbers = #tpu.dot_dimension_numbers<[1], [0], [0], [1], [0, 0, 1, 1], [], []>} : vector<64x8xbf16>, vector<8x32xbf16>, vector<64x32xf32> -> vector<64x32xf32>
    %237 = arith.addf %230, %236 : vector<64x32xf32>
    %c0_107 = arith.constant 0 : index
    %c0_108 = arith.constant 0 : index
    %238 = vector.load %arg20[%c0_107, %c0_108] : memref<1x32xf32, #tpu.memory_space<vmem>>, vector<1x32xf32>
    %239 = vector.broadcast %238 : vector<1x32xf32> to vector<64x32xf32>
    %240 = arith.addf %237, %239 : vector<64x32xf32>
    %241 = vector.extract_strided_slice %240 {offsets = [0, 0], sizes = [64, 16], strides = [1, 1]} : vector<64x32xf32> to vector<64x16xf32>
    %242 = vector.extract_strided_slice %240 {offsets = [0, 16], sizes = [64, 16], strides = [1, 1]} : vector<64x32xf32> to vector<64x16xf32>
    %243 = arith.negf %242 : vector<64x16xf32>
    %244 = math.exp %243 : vector<64x16xf32>
    %cst_109 = arith.constant 1.000000e+00 : f32
    %245 = vector.broadcast %cst_109 : f32 to vector<64x16xf32>
    %246 = arith.addf %245, %244 : vector<64x16xf32>
    %247 = arith.divf %245, %246 : vector<64x16xf32>
    %248 = arith.mulf %241, %247 : vector<64x16xf32>
    %249 = vector.shape_cast %248 : vector<64x16xf32> to vector<4x16x16xf32>
    %cst_110 = arith.constant dense<0.000000e+00> : vector<4x16xf32>
    %250 = vector.multi_reduction <add>, %249, %cst_110 [2] : vector<4x16x16xf32> to vector<4x16xf32>
    %251 = vector.shape_cast %250 : vector<4x16xf32> to vector<4x16x1xf32>
    %cst_111 = arith.constant dense<0.000000e+00> : vector<4x1xf32>
    %252 = vector.multi_reduction <add>, %251, %cst_111 [1] : vector<4x16x1xf32> to vector<4x1xf32>
    %253 = vector.shape_cast %252 : vector<4x1xf32> to vector<4x1x1xf32>
    %cst_112 = arith.constant 2.560000e+02 : f32
    %254 = vector.broadcast %cst_112 : f32 to vector<4x1x1xf32>
    %255 = arith.divf %253, %254 : vector<4x1x1xf32>
    %256 = vector.broadcast %255 : vector<4x1x1xf32> to vector<4x16x16xf32>
    %257 = arith.subf %249, %256 : vector<4x16x16xf32>
    %258 = arith.mulf %257, %257 : vector<4x16x16xf32>
    %cst_113 = arith.constant dense<0.000000e+00> : vector<4x16xf32>
    %259 = vector.multi_reduction <add>, %258, %cst_113 [2] : vector<4x16x16xf32> to vector<4x16xf32>
    %260 = vector.shape_cast %259 : vector<4x16xf32> to vector<4x16x1xf32>
    %cst_114 = arith.constant dense<0.000000e+00> : vector<4x1xf32>
    %261 = vector.multi_reduction <add>, %260, %cst_114 [1] : vector<4x16x1xf32> to vector<4x1xf32>
    %262 = vector.shape_cast %261 : vector<4x1xf32> to vector<4x1x1xf32>
    %cst_115 = arith.constant 2.560000e+02 : f32
    %263 = vector.broadcast %cst_115 : f32 to vector<4x1x1xf32>
    %264 = arith.divf %262, %263 : vector<4x1x1xf32>
    %cst_116 = arith.constant 9.99999996E-13 : f32
    %265 = vector.broadcast %cst_116 : f32 to vector<4x1x1xf32>
    %266 = arith.addf %264, %265 : vector<4x1x1xf32>
    %267 = math.rsqrt %266 : vector<4x1x1xf32>
    %268 = vector.broadcast %267 : vector<4x1x1xf32> to vector<4x16x16xf32>
    %269 = arith.mulf %257, %268 : vector<4x16x16xf32>
    %c0_117 = arith.constant 0 : index
    %c0_118 = arith.constant 0 : index
    %270 = vector.load %arg21[%c0_117, %c0_118] : memref<16x16xf32, #tpu.memory_space<vmem>>, vector<16x16xf32>
    %271 = vector.shape_cast %270 : vector<16x16xf32> to vector<1x16x16xf32>
    %272 = vector.broadcast %271 : vector<1x16x16xf32> to vector<4x16x16xf32>
    %273 = arith.mulf %269, %272 : vector<4x16x16xf32>
    %c0_119 = arith.constant 0 : index
    %c0_120 = arith.constant 0 : index
    %274 = vector.load %arg22[%c0_119, %c0_120] : memref<16x16xf32, #tpu.memory_space<vmem>>, vector<16x16xf32>
    %275 = vector.shape_cast %274 : vector<16x16xf32> to vector<1x16x16xf32>
    %276 = vector.broadcast %275 : vector<1x16x16xf32> to vector<4x16x16xf32>
    %277 = arith.addf %273, %276 : vector<4x16x16xf32>
    %278 = vector.extract_strided_slice %277 {offsets = [0, 0, 0], sizes = [1, 16, 16], strides = [1, 1, 1]} : vector<4x16x16xf32> to vector<1x16x16xf32>
    %279 = vector.shape_cast %278 : vector<1x16x16xf32> to vector<16x16xf32>
    %c0_121 = arith.constant 0 : index
    %c0_122 = arith.constant 0 : index
    %c0_123 = arith.constant 0 : index
    %280 = vector.load %arg23[%c0_121, %c0_122, %c0_123] : memref<4x16x64xbf16, #tpu.memory_space<vmem>>, vector<1x16x64xbf16>
    %281 = vector.shape_cast %280 : vector<1x16x64xbf16> to vector<16x64xbf16>
    %282 = arith.truncf %279 : vector<16x16xf32> to vector<16x16xbf16>
    %cst_124 = arith.constant dense<0.000000e+00> : vector<16x64xf32>
    %283 = tpu.matmul %282, %281, %cst_124 {dimension_numbers = #tpu.dot_dimension_numbers<[1], [0], [0], [1], [0, 0, 1, 1], [], []>} : vector<16x16xbf16>, vector<16x64xbf16>, vector<16x64xf32> -> vector<16x64xf32>
    %284 = vector.extract_strided_slice %277 {offsets = [1, 0, 0], sizes = [1, 16, 16], strides = [1, 1, 1]} : vector<4x16x16xf32> to vector<1x16x16xf32>
    %285 = vector.shape_cast %284 : vector<1x16x16xf32> to vector<16x16xf32>
    %c1_125 = arith.constant 1 : index
    %c0_126 = arith.constant 0 : index
    %c0_127 = arith.constant 0 : index
    %286 = vector.load %arg23[%c1_125, %c0_126, %c0_127] : memref<4x16x64xbf16, #tpu.memory_space<vmem>>, vector<1x16x64xbf16>
    %287 = vector.shape_cast %286 : vector<1x16x64xbf16> to vector<16x64xbf16>
    %288 = arith.truncf %285 : vector<16x16xf32> to vector<16x16xbf16>
    %cst_128 = arith.constant dense<0.000000e+00> : vector<16x64xf32>
    %289 = tpu.matmul %288, %287, %cst_128 {dimension_numbers = #tpu.dot_dimension_numbers<[1], [0], [0], [1], [0, 0, 1, 1], [], []>} : vector<16x16xbf16>, vector<16x64xbf16>, vector<16x64xf32> -> vector<16x64xf32>
    %290 = arith.addf %283, %289 : vector<16x64xf32>
    %291 = vector.extract_strided_slice %277 {offsets = [2, 0, 0], sizes = [1, 16, 16], strides = [1, 1, 1]} : vector<4x16x16xf32> to vector<1x16x16xf32>
    %292 = vector.shape_cast %291 : vector<1x16x16xf32> to vector<16x16xf32>
    %c2_129 = arith.constant 2 : index
    %c0_130 = arith.constant 0 : index
    %c0_131 = arith.constant 0 : index
    %293 = vector.load %arg23[%c2_129, %c0_130, %c0_131] : memref<4x16x64xbf16, #tpu.memory_space<vmem>>, vector<1x16x64xbf16>
    %294 = vector.shape_cast %293 : vector<1x16x64xbf16> to vector<16x64xbf16>
    %295 = arith.truncf %292 : vector<16x16xf32> to vector<16x16xbf16>
    %cst_132 = arith.constant dense<0.000000e+00> : vector<16x64xf32>
    %296 = tpu.matmul %295, %294, %cst_132 {dimension_numbers = #tpu.dot_dimension_numbers<[1], [0], [0], [1], [0, 0, 1, 1], [], []>} : vector<16x16xbf16>, vector<16x64xbf16>, vector<16x64xf32> -> vector<16x64xf32>
    %297 = arith.addf %290, %296 : vector<16x64xf32>
    %298 = vector.extract_strided_slice %277 {offsets = [3, 0, 0], sizes = [1, 16, 16], strides = [1, 1, 1]} : vector<4x16x16xf32> to vector<1x16x16xf32>
    %299 = vector.shape_cast %298 : vector<1x16x16xf32> to vector<16x16xf32>
    %c3 = arith.constant 3 : index
    %c0_133 = arith.constant 0 : index
    %c0_134 = arith.constant 0 : index
    %300 = vector.load %arg23[%c3, %c0_133, %c0_134] : memref<4x16x64xbf16, #tpu.memory_space<vmem>>, vector<1x16x64xbf16>
    %301 = vector.shape_cast %300 : vector<1x16x64xbf16> to vector<16x64xbf16>
    %302 = arith.truncf %299 : vector<16x16xf32> to vector<16x16xbf16>
    %cst_135 = arith.constant dense<0.000000e+00> : vector<16x64xf32>
    %303 = tpu.matmul %302, %301, %cst_135 {dimension_numbers = #tpu.dot_dimension_numbers<[1], [0], [0], [1], [0, 0, 1, 1], [], []>} : vector<16x16xbf16>, vector<16x64xbf16>, vector<16x64xf32> -> vector<16x64xf32>
    %304 = arith.addf %297, %303 : vector<16x64xf32>
    %c0_136 = arith.constant 0 : index
    %c0_137 = arith.constant 0 : index
    %305 = vector.load %arg24[%c0_136, %c0_137] : memref<1x64xf32, #tpu.memory_space<vmem>>, vector<1x64xf32>
    %306 = vector.broadcast %305 : vector<1x64xf32> to vector<16x64xf32>
    %307 = arith.addf %304, %306 : vector<16x64xf32>
    %308 = vector.extract_strided_slice %307 {offsets = [0, 0], sizes = [16, 32], strides = [1, 1]} : vector<16x64xf32> to vector<16x32xf32>
    %309 = vector.extract_strided_slice %307 {offsets = [0, 32], sizes = [16, 32], strides = [1, 1]} : vector<16x64xf32> to vector<16x32xf32>
    %310 = arith.negf %309 : vector<16x32xf32>
    %311 = math.exp %310 : vector<16x32xf32>
    %cst_138 = arith.constant 1.000000e+00 : f32
    %312 = vector.broadcast %cst_138 : f32 to vector<16x32xf32>
    %313 = arith.addf %312, %311 : vector<16x32xf32>
    %314 = arith.divf %312, %313 : vector<16x32xf32>
    %315 = arith.mulf %308, %314 : vector<16x32xf32>
    %316 = vector.shape_cast %315 : vector<16x32xf32> to vector<1x16x32xf32>
    %cst_139 = arith.constant dense<0.000000e+00> : vector<1x16xf32>
    %317 = vector.multi_reduction <add>, %316, %cst_139 [2] : vector<1x16x32xf32> to vector<1x16xf32>
    %318 = vector.shape_cast %317 : vector<1x16xf32> to vector<1x16x1xf32>
    %cst_140 = arith.constant dense<0.000000e+00> : vector<1x1xf32>
    %319 = vector.multi_reduction <add>, %318, %cst_140 [1] : vector<1x16x1xf32> to vector<1x1xf32>
    %320 = vector.shape_cast %319 : vector<1x1xf32> to vector<1x1x1xf32>
    %cst_141 = arith.constant 5.120000e+02 : f32
    %321 = vector.broadcast %cst_141 : f32 to vector<1x1x1xf32>
    %322 = arith.divf %320, %321 : vector<1x1x1xf32>
    %323 = vector.broadcast %322 : vector<1x1x1xf32> to vector<1x16x32xf32>
    %324 = arith.subf %316, %323 : vector<1x16x32xf32>
    %325 = arith.mulf %324, %324 : vector<1x16x32xf32>
    %cst_142 = arith.constant dense<0.000000e+00> : vector<1x16xf32>
    %326 = vector.multi_reduction <add>, %325, %cst_142 [2] : vector<1x16x32xf32> to vector<1x16xf32>
    %327 = vector.shape_cast %326 : vector<1x16xf32> to vector<1x16x1xf32>
    %cst_143 = arith.constant dense<0.000000e+00> : vector<1x1xf32>
    %328 = vector.multi_reduction <add>, %327, %cst_143 [1] : vector<1x16x1xf32> to vector<1x1xf32>
    %329 = vector.shape_cast %328 : vector<1x1xf32> to vector<1x1x1xf32>
    %cst_144 = arith.constant 5.120000e+02 : f32
    %330 = vector.broadcast %cst_144 : f32 to vector<1x1x1xf32>
    %331 = arith.divf %329, %330 : vector<1x1x1xf32>
    %cst_145 = arith.constant 9.99999996E-13 : f32
    %332 = vector.broadcast %cst_145 : f32 to vector<1x1x1xf32>
    %333 = arith.addf %331, %332 : vector<1x1x1xf32>
    %334 = math.rsqrt %333 : vector<1x1x1xf32>
    %335 = vector.broadcast %334 : vector<1x1x1xf32> to vector<1x16x32xf32>
    %336 = arith.mulf %324, %335 : vector<1x16x32xf32>
    %c0_146 = arith.constant 0 : index
    %c0_147 = arith.constant 0 : index
    %337 = vector.load %arg25[%c0_146, %c0_147] : memref<16x32xf32, #tpu.memory_space<vmem>>, vector<16x32xf32>
    %338 = vector.shape_cast %337 : vector<16x32xf32> to vector<1x16x32xf32>
    %339 = arith.mulf %336, %338 : vector<1x16x32xf32>
    %c0_148 = arith.constant 0 : index
    %c0_149 = arith.constant 0 : index
    %340 = vector.load %arg26[%c0_148, %c0_149] : memref<16x32xf32, #tpu.memory_space<vmem>>, vector<16x32xf32>
    %341 = vector.shape_cast %340 : vector<16x32xf32> to vector<1x16x32xf32>
    %342 = arith.addf %339, %341 : vector<1x16x32xf32>
    %343 = vector.shape_cast %342 : vector<1x16x32xf32> to vector<16x32xf32>
    %c0_150 = arith.constant 0 : index
    %c0_151 = arith.constant 0 : index
    %344 = vector.load %arg27[%c0_150, %c0_151] : memref<32x32xbf16, #tpu.memory_space<vmem>>, vector<32x32xbf16>
    %345 = arith.truncf %343 : vector<16x32xf32> to vector<16x32xbf16>
    %cst_152 = arith.constant dense<0.000000e+00> : vector<16x32xf32>
    %346 = tpu.matmul %345, %344, %cst_152 {dimension_numbers = #tpu.dot_dimension_numbers<[1], [0], [0], [1], [0, 0, 1, 1], [], []>} : vector<16x32xbf16>, vector<32x32xbf16>, vector<16x32xf32> -> vector<16x32xf32>
    %c0_153 = arith.constant 0 : index
    %c0_154 = arith.constant 0 : index
    %347 = vector.load %arg28[%c0_153, %c0_154] : memref<1x32xf32, #tpu.memory_space<vmem>>, vector<1x32xf32>
    %348 = vector.broadcast %347 : vector<1x32xf32> to vector<16x32xf32>
    %349 = arith.addf %346, %348 : vector<16x32xf32>
    %cst_155 = arith.constant 0.000000e+00 : f32
    %350 = vector.broadcast %cst_155 : f32 to vector<16x32xf32>
    %351 = arith.maximumf %349, %350 : vector<16x32xf32>
    %c0_156 = arith.constant 0 : index
    %c0_157 = arith.constant 0 : index
    %352 = vector.load %arg29[%c0_156, %c0_157] : memref<32x1xbf16, #tpu.memory_space<vmem>>, vector<32x1xbf16>
    %353 = arith.truncf %351 : vector<16x32xf32> to vector<16x32xbf16>
    %cst_158 = arith.constant dense<0.000000e+00> : vector<16x1xf32>
    %354 = tpu.matmul %353, %352, %cst_158 {dimension_numbers = #tpu.dot_dimension_numbers<[1], [0], [0], [1], [0, 0, 1, 1], [], []>} : vector<16x32xbf16>, vector<32x1xbf16>, vector<16x1xf32> -> vector<16x1xf32>
    %c0_159 = arith.constant 0 : index
    %c0_160 = arith.constant 0 : index
    %355 = vector.load %arg30[%c0_159, %c0_160] : memref<1x1xf32, #tpu.memory_space<vmem>>, vector<1x1xf32>
    %356 = vector.broadcast %355 : vector<1x1xf32> to vector<16x1xf32>
    %357 = arith.addf %354, %356 : vector<16x1xf32>
    %358 = vector.shape_cast %357 : vector<16x1xf32> to vector<1x16x1xf32>
    %c0_161 = arith.constant 0 : index
    %c0_162 = arith.constant 0 : index
    %c0_163 = arith.constant 0 : index
    %c0_164 = arith.constant 0 : index
    %359 = vector.load %arg31[%c0_161, %c0_162, %c0_163, %c0_164] : memref<1x1x16x1xf32, #tpu.memory_space<vmem>>, vector<1x1x16x1xf32>
    %360 = vector.shape_cast %359 : vector<1x1x16x1xf32> to vector<1x16x1xf32>
    %361 = vector.shape_cast %358 : vector<1x16x1xf32> to vector<1x1x16x1xf32>
    tpu.vector_store %arg31[%c0_161, %c0_162, %c0_163, %c0_164], %361 {strides = array<i32>} : memref<1x1x16x1xf32, #tpu.memory_space<vmem>>, vector<1x1x16x1xf32>,
    return
  }
  func.func @transform_0(%arg0: i32) -> (i32, i32, i32, i32) {
    %c0_i32 = arith.constant 0 : i32
    %c0_i32_0 = arith.constant 0 : i32
    %c0_i32_1 = arith.constant 0 : i32
    %c0_i32_2 = arith.constant 0 : i32
    return %arg0, %c0_i32, %c0_i32_0, %c0_i32_1 : i32, i32, i32, i32
  }
  func.func @transform_1(%arg0: i32) -> (i32, i32) {
    %c0_i32 = arith.constant 0 : i32
    %c0_i32_0 = arith.constant 0 : i32
    %c0_i32_1 = arith.constant 0 : i32
    return %c0_i32, %c0_i32_0 : i32, i32
  }
  func.func @transform_2(%arg0: i32) -> (i32, i32, i32) {
    %c0_i32 = arith.constant 0 : i32
    %c0_i32_0 = arith.constant 0 : i32
    %c0_i32_1 = arith.constant 0 : i32
    %c0_i32_2 = arith.constant 0 : i32
    return %c0_i32, %c0_i32_0, %c0_i32_1 : i32, i32, i32
  }
  func.func @transform_3(%arg0: i32) -> (i32, i32) {
    %c0_i32 = arith.constant 0 : i32
    %c0_i32_0 = arith.constant 0 : i32
    %c0_i32_1 = arith.constant 0 : i32
    return %c0_i32, %c0_i32_0 : i32, i32
  }
  func.func @transform_4(%arg0: i32) -> (i32, i32) {
    %c0_i32 = arith.constant 0 : i32
    %c0_i32_0 = arith.constant 0 : i32
    %c0_i32_1 = arith.constant 0 : i32
    return %c0_i32, %c0_i32_0 : i32, i32
  }
  func.func @transform_5(%arg0: i32) -> (i32, i32) {
    %c0_i32 = arith.constant 0 : i32
    %c0_i32_0 = arith.constant 0 : i32
    %c0_i32_1 = arith.constant 0 : i32
    return %c0_i32, %c0_i32_0 : i32, i32
  }
  func.func @transform_6(%arg0: i32) -> (i32, i32) {
    %c0_i32 = arith.constant 0 : i32
    %c0_i32_0 = arith.constant 0 : i32
    %c0_i32_1 = arith.constant 0 : i32
    return %c0_i32, %c0_i32_0 : i32, i32
  }
  func.func @transform_7(%arg0: i32) -> (i32, i32) {
    %c0_i32 = arith.constant 0 : i32
    %c0_i32_0 = arith.constant 0 : i32
    %c0_i32_1 = arith.constant 0 : i32
    return %c0_i32, %c0_i32_0 : i32, i32
  }
  func.func @transform_8(%arg0: i32) -> (i32, i32, i32) {
    %c0_i32 = arith.constant 0 : i32
    %c0_i32_0 = arith.constant 0 : i32
    %c0_i32_1 = arith.constant 0 : i32
    %c0_i32_2 = arith.constant 0 : i32
    return %c0_i32, %c0_i32_0, %c0_i32_1 : i32, i32, i32
  }
  func.func @transform_9(%arg0: i32) -> (i32, i32) {
    %c0_i32 = arith.constant 0 : i32
    %c0_i32_0 = arith.constant 0 : i32
    %c0_i32_1 = arith.constant 0 : i32
    return %c0_i32, %c0_i32_0 : i32, i32
  }
  func.func @transform_10(%arg0: i32) -> (i32, i32) {
    %c0_i32 = arith.constant 0 : i32
    %c0_i32_0 = arith.constant 0 : i32
    %c0_i32_1 = arith.constant 0 : i32
    return %c0_i32, %c0_i32_0 : i32, i32
  }
  func.func @transform_11(%arg0: i32) -> (i32, i32) {
    %c0_i32 = arith.constant 0 : i32
    %c0_i32_0 = arith.constant 0 : i32
    %c0_i32_1 = arith.constant 0 : i32
    return %c0_i32, %c0_i32_0 : i32, i32
  }
  func.func @transform_12(%arg0: i32) -> (i32, i32, i32) {
    %c0_i32 = arith.constant 0 : i32
    %c0_i32_0 = arith.constant 0 : i32
    %c0_i32_1 = arith.constant 0 : i32
    %c0_i32_2 = arith.constant 0 : i32
    return %c0_i32, %c0_i32_0, %c0_i32_1 : i32, i32, i32
  }
  func.func @transform_13(%arg0: i32) -> (i32, i32) {
    %c0_i32 = arith.constant 0 : i32
    %c0_i32_0 = arith.constant 0 : i32
    %c0_i32_1 = arith.constant 0 : i32
    return %c0_i32, %c0_i32_0 : i32, i32
  }
  func.func @transform_14(%arg0: i32) -> (i32, i32) {
    %c0_i32 = arith.constant 0 : i32
    %c0_i32_0 = arith.constant 0 : i32
    %c0_i32_1 = arith.constant 0 : i32
    return %c0_i32, %c0_i32_0 : i32, i32
  }
  func.func @transform_15(%arg0: i32) -> (i32, i32) {
    %c0_i32 = arith.constant 0 : i32
    %c0_i32_0 = arith.constant 0 : i32
    %c0_i32_1 = arith.constant 0 : i32
    return %c0_i32, %c0_i32_0 : i32, i32
  }
  func.func @transform_16(%arg0: i32) -> (i32, i32) {
    %c0_i32 = arith.constant 0 : i32
    %c0_i32_0 = arith.constant 0 : i32
    %c0_i32_1 = arith.constant 0 : i32
    return %c0_i32, %c0_i32_0 : i32, i32
  }
  func.func @transform_17(%arg0: i32) -> (i32, i32) {
    %c0_i32 = arith.constant 0 : i32
    %c0_i32_0 = arith.constant 0 : i32
    %c0_i32_1 = arith.constant 0 : i32
    return %c0_i32, %c0_i32_0 : i32, i32
  }
  func.func @transform_18(%arg0: i32) -> (i32, i32, i32) {
    %c0_i32 = arith.constant 0 : i32
    %c0_i32_0 = arith.constant 0 : i32
    %c0_i32_1 = arith.constant 0 : i32
    %c0_i32_2 = arith.constant 0 : i32
    return %c0_i32, %c0_i32_0, %c0_i32_1 : i32, i32, i32
  }
  func.func @transform_19(%arg0: i32) -> (i32, i32) {
    %c0_i32 = arith.constant 0 : i32
    %c0_i32_0 = arith.constant 0 : i32
    %c0_i32_1 = arith.constant 0 : i32
    return %c0_i32, %c0_i32_0 : i32, i32
  }
  func.func @transform_20(%arg0: i32) -> (i32, i32) {
    %c0_i32 = arith.constant 0 : i32
    %c0_i32_0 = arith.constant 0 : i32
    %c0_i32_1 = arith.constant 0 : i32
    return %c0_i32, %c0_i32_0 : i32, i32
  }
  func.func @transform_21(%arg0: i32) -> (i32, i32) {
    %c0_i32 = arith.constant 0 : i32
    %c0_i32_0 = arith.constant 0 : i32
    %c0_i32_1 = arith.constant 0 : i32
    return %c0_i32, %c0_i32_0 : i32, i32
  }
  func.func @transform_22(%arg0: i32) -> (i32, i32, i32) {
    %c0_i32 = arith.constant 0 : i32
    %c0_i32_0 = arith.constant 0 : i32
    %c0_i32_1 = arith.constant 0 : i32
    %c0_i32_2 = arith.constant 0 : i32
    return %c0_i32, %c0_i32_0, %c0_i32_1 : i32, i32, i32
  }
  func.func @transform_23(%arg0: i32) -> (i32, i32) {
    %c0_i32 = arith.constant 0 : i32
    %c0_i32_0 = arith.constant 0 : i32
    %c0_i32_1 = arith.constant 0 : i32
    return %c0_i32, %c0_i32_0 : i32, i32
  }
  func.func @transform_24(%arg0: i32) -> (i32, i32) {
    %c0_i32 = arith.constant 0 : i32
    %c0_i32_0 = arith.constant 0 : i32
    %c0_i32_1 = arith.constant 0 : i32
    return %c0_i32, %c0_i32_0 : i32, i32
  }
  func.func @transform_25(%arg0: i32) -> (i32, i32) {
    %c0_i32 = arith.constant 0 : i32
    %c0_i32_0 = arith.constant 0 : i32
    %c0_i32_1 = arith.constant 0 : i32
    return %c0_i32, %c0_i32_0 : i32, i32
  }
  func.func @transform_26(%arg0: i32) -> (i32, i32) {
    %c0_i32 = arith.constant 0 : i32
    %c0_i32_0 = arith.constant 0 : i32
    %c0_i32_1 = arith.constant 0 : i32
    return %c0_i32, %c0_i32_0 : i32, i32
  }
  func.func @transform_27(%arg0: i32) -> (i32, i32) {
    %c0_i32 = arith.constant 0 : i32
    %c0_i32_0 = arith.constant 0 : i32
    %c0_i32_1 = arith.constant 0 : i32
    return %c0_i32, %c0_i32_0 : i32, i32
  }
  func.func @transform_28(%arg0: i32) -> (i32, i32) {
    %c0_i32 = arith.constant 0 : i32
    %c0_i32_0 = arith.constant 0 : i32
    %c0_i32_1 = arith.constant 0 : i32
    return %c0_i32, %c0_i32_0 : i32, i32
  }
  func.func @transform_29(%arg0: i32) -> (i32, i32) {
    %c0_i32 = arith.constant 0 : i32
    %c0_i32_0 = arith.constant 0 : i32
    %c0_i32_1 = arith.constant 0 : i32
    return %c0_i32, %c0_i32_0 : i32, i32
  }
  func.func @transform_30(%arg0: i32) -> (i32, i32, i32, i32) {
    %c0_i32 = arith.constant 0 : i32
    %c0_i32_0 = arith.constant 0 : i32
    %c0_i32_1 = arith.constant 0 : i32
    %c0_i32_2 = arith.constant 0 : i32
    return %arg0, %c0_i32, %c0_i32_0, %c0_i32_1 : i32, i32, i32, i32
  }
}

</mosaic_0001>

<bundles_post_ra>
// kernel: stgcn_graph_conv_forward.1
= control target key start
LH: loop header
LB: loop body
LE: loop exit
PB: predicated region body
PF: predicated region fallthrough
CT: control target
= control target key end

     0   :  { %s6173_s6 = smov 1   ;;  %s6174_s10 = smov 2   ;;  %s7581_s0 = inlined_call_operand.smem [shape: u32[31], index: -1, kind: input, shape index: {}] }
   0x1   :  { %s6216_s5 = sld [smem:[%s7581_s0]]   ;;  %s6175_s14 = smov 3  }
   0x2   :  { %s6221_s9 = sld [smem:[%s7581_s0 + %s6173_s6]]   ;;  %s6176_s18 = smov 4  }
   0x3   :  { %s6226_s13 = sld [smem:[%s7581_s0 + %s6174_s10]]   ;;  %s6177_s22 = smov 5  }
   0x4   :  { %s6231_s17 = sld [smem:[%s7581_s0 + %s6175_s14]]   ;;  %s6178_s26 = smov 6  }
   0x5   :  { %s6236_s21 = sld [smem:[%s7581_s0 + %s6176_s18]]   ;;  %s6179_s30 = smov 7  }
   0x6   :  { %s6241_s25 = sld [smem:[%s7581_s0 + %s6177_s22]]   ;;  %s6180_s4 = smov 8  }
   0x7   :  { %s6246_s29 = sld [smem:[%s7581_s0 + %s6178_s26]]   ;;  %s6181_s10 = smov 9  }
   0x8   :  { %s6251_s3 = sld [smem:[%s7581_s0 + %s6179_s30]]   ;;  %s6182_s15 = smov 10  }
   0x9   :  { %s6256_s8 = sld [smem:[%s7581_s0 + %s6180_s4]]   ;;  %s6183_s20 = smov 11  }
   0xa   :  { %s6261_s14 = sld [smem:[%s7581_s0 + %s6181_s10]]   ;;  %s6184_s26 = smov 12  }
   0xb   :  { %s6266_s19 = sld [smem:[%s7581_s0 + %s6182_s15]]   ;;  %s6185_s1 = smov 13  }
   0xc   :  { %s6271_s24 = sld [smem:[%s7581_s0 + %s6183_s20]]   ;;  %s6186_s7 = smov 14  }
   0xd   :  { %s6276_s30 = sld [smem:[%s7581_s0 + %s6184_s26]]   ;;  %s6187_s15 = smov 15  }
   0xe   :  { %s6281_s6 = sld [smem:[%s7581_s0 + %s6185_s1]]   ;;  %s6188_s22 = smov 16  }
   0xf   :  { %s6286_s12 = sld [smem:[%s7581_s0 + %s6186_s7]]   ;;  %s6189_s28 = smov 17  }
  0x10   :  { %s6291_s20 = sld [smem:[%s7581_s0 + %s6187_s15]]   ;;  %s6190_s7 = smov 18  }
  0x11   :  { %s6296_s27 = sld [smem:[%s7581_s0 + %s6188_s22]]   ;;  %s6191_s15 = smov 19  }
  0x12   :  { %s6301_s4 = sld [smem:[%s7581_s0 + %s6189_s28]]   ;;  %s6192_s22 = smov 20  }
  0x13   :  { %s6193_s28 = smov 21   ;;  %s6202_s10 = smov 30  }
  0x15   :  { %7589 = sst [smem:[#allocation3_spill]] %s6286_s12 }
  0x16   :  { %7590 = sst [smem:[#allocation4_spill]] %s6291_s20 }
  0x17   :  { %7591 = sst [smem:[#allocation5_spill]] %s6296_s27 }
  0x18   :  { %7592 = sst [smem:[#allocation6_spill]] %s6301_s4 }
  0x19   :  { %s6306_s12 = sld [smem:[%s7581_s0 + %s6190_s7]]   ;;  %s6194_s7 = smov 22  }
  0x1a   :  { %s6311_s20 = sld [smem:[%s7581_s0 + %s6191_s15]]   ;;  %s6195_s15 = smov 23  }
  0x1b   :  { %s6316_s27 = sld [smem:[%s7581_s0 + %s6192_s22]]   ;;  %s6196_s22 = smov 24  }
  0x1c   :  { %s6321_s4 = sld [smem:[%s7581_s0 + %s6193_s28]]   ;;  %s6197_s28 = smov 25  }
  0x1f   :  { %7593 = sst [smem:[#allocation7_spill]] %s6306_s12 }
  0x20   :  { %7594 = sst [smem:[#allocation8_spill]] %s6311_s20 }
  0x21   :  { %7595 = sst [smem:[#allocation9_spill]] %s6316_s27 }
  0x22   :  { %7596 = sst [smem:[#allocation10_spill]] %s6321_s4 }
  0x23   :  { %s6326_s12 = sld [smem:[%s7581_s0 + %s6194_s7]]   ;;  %s6198_s7 = smov 26  }
  0x24   :  { %s6331_s20 = sld [smem:[%s7581_s0 + %s6195_s15]]   ;;  %s6199_s15 = smov 27  }
  0x25   :  { %s6336_s27 = sld [smem:[%s7581_s0 + %s6196_s22]]   ;;  %s6200_s22 = smov 28  }
  0x26   :  { %s6341_s4 = sld [smem:[%s7581_s0 + %s6197_s28]]   ;;  %s6201_s28 = smov 29  }
  0x29   :  { %7597 = sst [smem:[#allocation11_spill]] %s6326_s12 }
  0x2a   :  { %7598 = sst [smem:[#allocation12_spill]] %s6331_s20 }
  0x2b   :  { %7599 = sst [smem:[#allocation13_spill]] %s6336_s27 }
  0x2c   :  { %7600 = sst [smem:[#allocation14_spill]] %s6341_s4 }
  0x2d   :  { %s6346_s12 = sld [smem:[%s7581_s0 + %s6198_s7]]  }
  0x2e   :  { %s6351_s20 = sld [smem:[%s7581_s0 + %s6199_s15]]   ;;  %s6366_s15 = smov 0  }
  0x2f   :  { %s6356_s27 = sld [smem:[%s7581_s0 + %s6200_s22]]  }
  0x30   :  { %s5139_s4 = sld [smem:[%s7581_s0 + %s6201_s28]]  }
  0x33   :  { %7601 = sst [smem:[#allocation15_spill]] %s6346_s12 }
  0x34   :  { %s6364_s12 = sld [smem:[%s7581_s0 + %s6202_s10]]  }
  0x36   :  { %v66_v0 = vstv %s5139_s4 }
  0x37   :  { %67 = vst [vmem:[#allocation2] sm:$0x1] %v66_v0 }
  0x38 LB: > { %s5141_s16 = sadd.s32 4294967295, %s6171_s15   ;;  %p5145_p0 = scmp.ge.s32.totalorder %s6171_s15, 1  ;;  %s6171_s15 = sphi %s6366_s15, %s73_s15  }
  0x39   : > { %p845_p1 = scmp.lt.s32.totalorder %s6171_s15, 3 }
  0x3b   : > { %p846_p2 = pnand %p5145_p0, %p845_p1 }
  0x3c   : > { %p923_p3 = scmp.lt.s32.totalorder (!%p846_p2), %s5141_s16, 1  ;;  %s6204_s18 = smov (!%p846_p2), 112  }
  0x3d   : > { %849 = sbr.rel (%p846_p2) target bundleno = 4552 (0x11c8), region = 140  ;;  %s7602_s22 = sld [smem:[#allocation3_spill]] (!%p846_p2) }
  0x3e   : > { %s7603_s23 = sld [smem:[#allocation4_spill]] (!%p846_p2) }
  0x3f   : > { %s7604_s26 = sld [smem:[#allocation5_spill]] (!%p846_p2) }
  0x40   : > { %s7605_s28 = sld [smem:[#allocation7_spill]] (!%p846_p2) }
  0x41   : > { %s7606_s1 = sld [smem:[#allocation6_spill]] (!%p846_p2) }
  0x42   : > { %v6203_v1 = vmov 0   ;;  %s7616_s16 = smov (!%p923_p3, %s5141_s16), 1  ;;  %v1060_v26 = vlaneseq  ;;  %v958_v28 = vld [vmem:[%s6226_s13] sm:$0x1]  ;;  %v5149_v29 = vld [vmem:[%s6226_s13 + $0x1] sm:$0x1] }
  0x43   : > { %5891 = vset.pattern.permute.xlu1 %v6203_v1  ;;  %5890 = vset.pattern.permute.xlu0 %v6203_v1  ;;  %s5846_s0 = smul.u32 192, %s7616_s16  ;;  %v959_v30 = vunpack.c.l.bf16 %v958_v28  ;;  %v1086_v32 = vunpack.c.l.bf16 %v5149_v29  ;;  %v5150_v33 = vld [vmem:[%s6226_s13 + $0x2] sm:$0x1]  ;;  %v6420_v52 = vld [vmem:[%s6231_s17] ss:$0 sm:$0xff]  ;;  %vm1470_vm0 = vcmask 130048  }
  0x44   : > { %v1061_v27 = vshrl.u32 %v1060_v26, 7  ;;  %v1143_v36 = vunpack.c.l.bf16 %v5150_v33  ;;  %vm6206_vm1 = vmmov 0   ;;  %vm2093_vm2 = vcmask 1043456   ;;  %s7607_s2 = sld [smem:[#allocation8_spill]] }
  0x45   : > { %s6378_s4 = scalar_lea.vmem %s6216_s5, %s5846_s0  ;;  %vm2062_vm3 = vcmask 64512   ;;  %s7608_s10 = sld [smem:[#allocation11_spill]]  ;;  %vm4869_vm4 = vcmask 261120   ;;  %vm5053_vm5 = vcmask 7168  }
  0x46   : > { %v936_v2 = vld [vmem:[%s6378_s4 + $0x10] sm:$0xff]  ;;  %v934_v3 = vld [vmem:[%s6378_s4] sm:$0xff]  ;;  %v937_v4 = vld [vmem:[%s6378_s4 + $0x18] sm:$0xff]  ;;  %v1062_v31 = vsub.s32 0, %v1061_v27  ;;  %s7609_s7 = sld [smem:[#allocation9_spill]] }
  0x47   : > { %972 = vperm.xlu1 %5891, %v936_v2   ;;  %962 = vperm.xlu0 %5890, %v934_v3   ;;  %v935_v5 = vld [vmem:[%s6378_s4 + $0x8] sm:$0xff]  ;;  %v938_v7 = vld [vmem:[%s6378_s4 + $0x20] sm:$0xff]  ;;  %v941_v8 = vld [vmem:[%s6378_s4 + $0x38] sm:$0xff]  ;;  %s7610_s11 = sld [smem:[#allocation10_spill]] }
  0x48   : > { %v939_v6 = vld [vmem:[%s6378_s4 + $0x28] sm:$0xff]  ;;  %v940_v9 = vld [vmem:[%s6378_s4 + $0x30] sm:$0xff]  ;;  %v942_v11 = vld [vmem:[%s6378_s4 + $0x40] sm:$0xff]  ;;  %v6407_v37 = vrot.slane %v959_v30, %v1062_v31  ;;  %v6409_v38 = vrot.slane %v1086_v32, %v1062_v31  ;;  %v6413_v43 = vrot.slane %v1143_v36, %v1062_v31  ;;  %s7611_s0 = sld [smem:[#allocation12_spill]] }
  0x49   : > { %v943_v10 = vld [vmem:[%s6378_s4 + $0x48] sm:$0xff]  ;;  %v945_v12 = vld [vmem:[%s6378_s4 + $0x58] sm:$0xff]  ;;  %v944_v13 = vld [vmem:[%s6378_s4 + $0x50] sm:$0xff] }
  0x4a   : > { %v947_v14 = vld [vmem:[%s6378_s4 + $0x68] sm:$0xff]  ;;  %v946_v15 = vld [vmem:[%s6378_s4 + $0x60] sm:$0xff]  ;;  %v949_v16 = vld [vmem:[%s6378_s4 + $0x78] sm:$0xff] }
  0x4b   : > { %977 = vperm.xlu1 %5891, %v937_v4   ;;  %967 = vperm.xlu0 %5890, %v935_v5   ;;  %v948_v17 = vld [vmem:[%s6378_s4 + $0x70] sm:$0xff]  ;;  %v951_v18 = vld [vmem:[%s6378_s4 + $0x88] sm:$0xff]  ;;  %v950_v19 = vld [vmem:[%s6378_s4 + $0x80] sm:$0xff] }
  0x4c   : > { %v953_v20 = vld [vmem:[%s6378_s4 + $0x98] sm:$0xff]  ;;  %v952_v21 = vld [vmem:[%s6378_s4 + $0x90] sm:$0xff]  ;;  %v955_v22 = vld [vmem:[%s6378_s4 + $0xa8] sm:$0xff] }
  0x4d   : > { %v954_v23 = vld [vmem:[%s6378_s4 + $0xa0] sm:$0xff]  ;;  %v957_v24 = vld [vmem:[%s6378_s4 + $0xb8] sm:$0xff]  ;;  %v956_v25 = vld [vmem:[%s6378_s4 + $0xb0] sm:$0xff]  ;;  %s6207_s4 = smov 96  }
  0x4f   : > { %987 = vperm.xlu1 %5891, %v939_v6   ;;  %982 = vperm.xlu0 %5890, %v938_v7  }
  0x53   : > { %997 = vperm.xlu1 %5891, %v941_v8   ;;  %992 = vperm.xlu0 %5890, %v940_v9  }
  0x57   : > { %1007 = vperm.xlu1 %5891, %v943_v10   ;;  %1002 = vperm.xlu0 %5890, %v942_v11  }
  0x5b   : > { %1017 = vperm.xlu1 %5891, %v945_v12   ;;  %1012 = vperm.xlu0 %5890, %v944_v13  }
  0x5f   : > { %1027 = vperm.xlu1 %5891, %v947_v14   ;;  %1022 = vperm.xlu0 %5890, %v946_v15  }
  0x63   : > { %1037 = vperm.xlu1 %5891, %v949_v16   ;;  %1032 = vperm.xlu0 %5890, %v948_v17  }
  0x67   : > { %1047 = vperm.xlu1 %5891, %v951_v18   ;;  %1042 = vperm.xlu0 %5890, %v950_v19  }
  0x6b   : > { %1057 = vperm.xlu1 %5891, %v953_v20   ;;  %1052 = vperm.xlu0 %5890, %v952_v21  }
  0x6f   : > { %1094 = vperm.xlu1 %5891, %v955_v22   ;;  %1089 = vperm.xlu0 %5890, %v954_v23  }
  0x73   : > { %1151 = vperm.xlu1 %5891, %v957_v24   ;;  %1146 = vperm.xlu0 %5890, %v956_v25  }
  0xc2   : > { %v973_v34 = vpop.permute.xlu1 %972  ;;  %v963_v35 = vpop.permute.xlu0 %962 }
  0xc3   : > { %v1101_v44 = vmul.f32 %v6409_v38, %v973_v34  ;;  %v1064_v45 = vmul.f32 %v6407_v37, %v963_v35  ;;  %v1066_v57 = vmul.f32 %v6407_v37, %v973_v34 }
  0xc5   : > { %v1121_v51 = vadd.f32 %v1101_v44, %v1064_v45 }
  0xc6   : > { %v978_v39 = vpop.permute.xlu1 %977  ;;  %v968_v40 = vpop.permute.xlu0 %967 }
  0xc7   : > { %v1102_v41 = vmul.f32 %v6409_v38, %v978_v39  ;;  %v1065_v42 = vmul.f32 %v6407_v37, %v968_v40  ;;  %v1067_v55 = vmul.f32 %v6407_v37, %v978_v39 }
  0xc9   : > { %v1122_v48 = vadd.f32 %v1102_v41, %v1065_v42 }
  0xca   : > { %v988_v46 = vpop.permute.xlu1 %987  ;;  %v983_v47 = vpop.permute.xlu0 %982 }
  0xcb   : > { %v1104_v49 = vmul.f32 %v6409_v38, %v988_v46  ;;  %v1159_v50 = vmul.f32 %v6413_v43, %v988_v46  ;;  %v1103_v53 = vmul.f32 %v6409_v38, %v983_v47  ;;  %v1158_v54 = vmul.f32 %v6413_v43, %v983_v47 }
  0xcc   : > { %v1069_v4 = vmul.f32 %v6407_v37, %v988_v46  ;;  %v1068_v8 = vmul.f32 %v6407_v37, %v983_v47 }
  0xcd   : > { %v1179_v56 = vadd.f32 %v1159_v50, %v1122_v48  ;;  %v1178_v58 = vadd.f32 %v1158_v54, %v1121_v51  ;;  %v1124_v61 = vadd.f32 %v1104_v49, %v1067_v55  ;;  %v1123_v0 = vadd.f32 %v1103_v53, %v1066_v57 }
  0xce   : > { %v998_v59 = vpop.permute.xlu1 %997  ;;  %v993_v60 = vpop.permute.xlu0 %992 }
  0xcf   : > { %v6427_v62 = vadd.f32 %v6420_v52, %v1179_v56  ;;  %v1161_v63 = vmul.f32 %v6413_v43, %v998_v59  ;;  %v6431_v1 = vadd.f32 %v6420_v52, %v1178_v58  ;;  %v1106_v2 = vmul.f32 %v6409_v38, %v998_v59 }
  0xd0   : > { %v1160_v3 = vmul.f32 %v6413_v43, %v993_v60  ;;  %v1105_v7 = vmul.f32 %v6409_v38, %v993_v60  ;;  %v1071_v10 = vmul.f32 %v6407_v37, %v998_v59  ;;  %v1070_v15 = vmul.f32 %v6407_v37, %v993_v60 }
  0xd1   : > { %v5153_v5 = vmul.f32 -1.442695, %v6427_v62  ;;  %v1181_v6 = vadd.f32 %v1161_v63, %v1124_v61  ;;  %v5152_v9 = vmul.f32 -1.442695, %v6431_v1  ;;  %v1126_v17 = vadd.f32 %v1106_v2, %v1069_v4 }
  0xd2   : > { %v1180_v11 = vadd.f32 %v1160_v3, %v1123_v0  ;;  %v1008_v12 = vpop.permute.xlu1 %1007  ;;  %v1003_v13 = vpop.permute.xlu0 %1002  ;;  %v1125_v21 = vadd.f32 %v1105_v7, %v1068_v8 }
  0xd3   : > { %5906 = vpow2.f32 %v5153_v5  ;;  %v6442_v14 = vadd.f32 %v6420_v52, %v1181_v6  ;;  %v1108_v16 = vmul.f32 %v6409_v38, %v1008_v12  ;;  %v1163_v19 = vmul.f32 %v6413_v43, %v1008_v12 }
  0xd4   : > { %5908 = vpow2.f32 %v5152_v9  ;;  %v6447_v18 = vadd.f32 %v6420_v52, %v1180_v11  ;;  %v1107_v22 = vmul.f32 %v6409_v38, %v1003_v13  ;;  %v1162_v23 = vmul.f32 %v6413_v43, %v1003_v13 }
  0xd5   : > { %v5155_v20 = vmul.f32 -1.442695, %v6442_v14  ;;  %v1073_v25 = vmul.f32 %v6407_v37, %v1008_v12  ;;  %v1183_v26 = vadd.f32 %v1163_v19, %v1126_v17  ;;  %v1072_v27 = vmul.f32 %v6407_v37, %v1003_v13 }
  0xd6   : > { %v5154_v24 = vmul.f32 -1.442695, %v6447_v18  ;;  %v1018_v28 = vpop.permute.xlu1 %1017  ;;  %v1013_v29 = vpop.permute.xlu0 %1012  ;;  %v1128_v30 = vadd.f32 %v1108_v16, %v1071_v10  ;;  %v1127_v31 = vadd.f32 %v1107_v22, %v1070_v15  ;;  %v1182_v32 = vadd.f32 %v1162_v23, %v1125_v21 }
  0xd7   : > { %5910 = vpow2.f32 %v5155_v20  ;;  %v6457_v33 = vadd.f32 %v6420_v52, %v1183_v26  ;;  %v1110_v34 = vmul.f32 %v6409_v38, %v1018_v28  ;;  %v1165_v35 = vmul.f32 %v6413_v43, %v1018_v28 }
  0xd8   : > { %5912 = vpow2.f32 %v5154_v24  ;;  %v6462_v36 = vadd.f32 %v6420_v52, %v1182_v32  ;;  %v1075_v39 = vmul.f32 %v6407_v37, %v1018_v28  ;;  %v1109_v40 = vmul.f32 %v6409_v38, %v1013_v29 }
  0xd9   : > { %v1164_v41 = vmul.f32 %v6413_v43, %v1013_v29  ;;  %v5157_v42 = vmul.f32 -1.442695, %v6457_v33  ;;  %v1130_v44 = vadd.f32 %v1110_v34, %v1073_v25  ;;  %v1185_v45 = vadd.f32 %v1165_v35, %v1128_v30 }
  0xda   : > { %v1074_v46 = vmul.f32 %v6407_v37, %v1013_v29  ;;  %v1028_v47 = vpop.permute.xlu1 %1027  ;;  %v1023_v48 = vpop.permute.xlu0 %1022  ;;  %v5156_v49 = vmul.f32 -1.442695, %v6462_v36  ;;  %v1129_v50 = vadd.f32 %v1109_v40, %v1072_v27 }
  0xdb   : > { %v1184_v51 = vadd.f32 %v1164_v41, %v1127_v31  ;;  %v1077_v53 = vmul.f32 %v6407_v37, %v1028_v47  ;;  %5914 = vpow2.f32 %v5157_v42  ;;  %v6472_v54 = vadd.f32 %v6420_v52, %v1185_v45 }
  0xdc   : > { %v1112_v55 = vmul.f32 %v6409_v38, %v1028_v47  ;;  %v1167_v56 = vmul.f32 %v6413_v43, %v1028_v47  ;;  %5916 = vpow2.f32 %v5156_v49  ;;  %v1076_v58 = vmul.f32 %v6407_v37, %v1023_v48 }
  0xdd   : > { %v6477_v57 = vadd.f32 %v6420_v52, %v1184_v51  ;;  %v1111_v59 = vmul.f32 %v6409_v38, %v1023_v48  ;;  %v5159_v60 = vmul.f32 -1.442695, %v6472_v54  ;;  %v1166_v0 = vmul.f32 %v6413_v43, %v1023_v48 }
  0xde   : > { %v1132_v61 = vadd.f32 %v1112_v55, %v1075_v39  ;;  %v1187_v63 = vadd.f32 %v1167_v56, %v1130_v44  ;;  %v1038_v2 = vpop.permute.xlu1 %1037  ;;  %v1033_v3 = vpop.permute.xlu0 %1032 }
  0xdf   : > { %v5158_v4 = vmul.f32 -1.442695, %v6477_v57  ;;  %v1131_v5 = vadd.f32 %v1111_v59, %v1074_v46  ;;  %v1079_v6 = vmul.f32 %v6407_v37, %v1038_v2  ;;  %v1114_v7 = vmul.f32 %v6409_v38, %v1038_v2 }
  0xe0   : > { %v5907_v8 = vpop.eup %5906  ;;  %5918 = vpow2.f32 %v5159_v60  ;;  %v6487_v9 = vadd.f32 %v6420_v52, %v1187_v63  ;;  %v1186_v10 = vadd.f32 %v1166_v0, %v1129_v50  ;;  %v1169_v11 = vmul.f32 %v6413_v43, %v1038_v2 }
  0xe1   : > { %v5909_v12 = vpop.eup %5908  ;;  %v1286_v13 = vadd.f32 1.0, %v5907_v8  ;;  %5920 = vpow2.f32 %v5158_v4  ;;  %v1134_v15 = vadd.f32 %v1114_v7, %v1077_v53  ;;  %v1078_v16 = vmul.f32 %v6407_v37, %v1033_v3 }
  0xe2   : > { %v1285_v17 = vadd.f32 1.0, %v5909_v12  ;;  %v5161_v19 = vmul.f32 -1.442695, %v6487_v9  ;;  %v6493_v20 = vadd.f32 %v6420_v52, %v1186_v10  ;;  %v1189_v21 = vadd.f32 %v1169_v11, %v1132_v61  ;;  %v1048_v22 = vpop.permute.xlu1 %1047  ;;  %v1043_v23 = vpop.permute.xlu0 %1042 }
  0xe3   : > { %5922 = vrcp.f32 %v1286_v13  ;;  %v1113_v24 = vmul.f32 %v6409_v38, %v1033_v3  ;;  %v1168_v25 = vmul.f32 %v6413_v43, %v1033_v3  ;;  %v1081_v26 = vmul.f32 %v6407_v37, %v1048_v22 }
  0xe4   : > { %v5911_v27 = vpop.eup %5910  ;;  %5924 = vrcp.f32 %v1285_v17  ;;  %v5160_v28 = vmul.f32 -1.442695, %v6493_v20  ;;  %v6500_v29 = vadd.f32 %v6420_v52, %v1189_v21  ;;  %v1116_v30 = vmul.f32 %v6409_v38, %v1048_v22 }
  0xe5   : > { %v5913_v31 = vpop.eup %5912  ;;  %v1288_v32 = vadd.f32 1.0, %v5911_v27  ;;  %5926 = vpow2.f32 %v5161_v19  ;;  %v1133_v34 = vadd.f32 %v1113_v24, %v1076_v58  ;;  %v1188_v35 = vadd.f32 %v1168_v25, %v1131_v5 }
  0xe6   : > { %v1287_v39 = vadd.f32 1.0, %v5913_v31  ;;  %5928 = vpow2.f32 %v5160_v28  ;;  %v5163_v40 = vmul.f32 -1.442695, %v6500_v29  ;;  %v1136_v41 = vadd.f32 %v1116_v30, %v1079_v6  ;;  %v1058_v42 = vpop.permute.xlu1 %1057  ;;  %v1053_v44 = vpop.permute.xlu0 %1052  ;;  %v5892_v6 = vld [vmem:[%s6236_s21] sm:$0xff]  }
  0xe7   : > { %5930 = vrcp.f32 %v1288_v32  ;;  %v6505_v45 = vadd.f32 %v6420_v52, %v1188_v35  ;;  %v1171_v46 = vmul.f32 %v6413_v43, %v1048_v22  ;;  %v1080_v47 = vmul.f32 %v6407_v37, %v1043_v23  ;;  %5504 = vmatprep.subr.bf16.mxu0 %v5892_v6 }
  0xe8   : > { %5932 = vrcp.f32 %v1287_v39  ;;  %v1115_v48 = vmul.f32 %v6409_v38, %v1043_v23  ;;  %v1170_v49 = vmul.f32 %v6413_v43, %v1043_v23  ;;  %v1083_v50 = vmul.f32 %v6407_v37, %v1058_v42  ;;  %v5915_v51 = vpop.eup %5914  ;;  %5505 = vmatpush3.bf16.msra.mxu0 %v5892_v6 }
  0xe9   : > { %5934 = vpow2.f32 %v5163_v40  ;;  %v5162_v53 = vmul.f32 -1.442695, %v6505_v45  ;;  %v1191_v55 = vadd.f32 %v1171_v46, %v1134_v15  ;;  %v1118_v56 = vmul.f32 %v6409_v38, %v1058_v42  ;;  %v5917_v58 = vpop.eup %5916 }
  0xea   : > { %v1290_v59 = vadd.f32 1.0, %v5915_v51  ;;  %v1135_v60 = vadd.f32 %v1115_v48, %v1078_v16  ;;  %v1190_v61 = vadd.f32 %v1170_v49, %v1133_v34  ;;  %v1173_v63 = vmul.f32 %v6413_v43, %v1058_v42  ;;  %v1095_v0 = vpop.permute.xlu1 %1094  ;;  %v1090_v2 = vpop.permute.xlu0 %1089 }
  0xeb   : > { %v1289_v3 = vadd.f32 1.0, %v5917_v58  ;;  %5936 = vpow2.f32 %v5162_v53  ;;  %v6516_v4 = vadd.f32 %v6420_v52, %v1191_v55  ;;  %v1082_v5 = vmul.f32 %v6407_v37, %v1053_v44 }
  0xec   : > { %5938 = vrcp.f32 %v1290_v59  ;;  %v6521_v7 = vadd.f32 %v6420_v52, %v1190_v61  ;;  %v1193_v8 = vadd.f32 %v1173_v63, %v1136_v41  ;;  %v1117_v10 = vmul.f32 %v6409_v38, %v1053_v44 }
  0xed   : > { %v5919_v11 = vpop.eup %5918  ;;  %5940 = vrcp.f32 %v1289_v3  ;;  %v5165_v12 = vmul.f32 -1.442695, %v6516_v4  ;;  %v1172_v13 = vmul.f32 %v6413_v43, %v1053_v44  ;;  %v1138_v15 = vadd.f32 %v1118_v56, %v1081_v26 }
  0xee   : > { %v5921_v16 = vpop.eup %5920  ;;  %v1292_v17 = vadd.f32 1.0, %v5919_v11  ;;  %v5164_v37 = vmul.f32 -1.442695, %v6521_v7  ;;  %v6528_v19 = vadd.f32 %v6420_v52, %v1193_v8  ;;  %v1120_v21 = vmul.f32 %v6409_v38, %v1095_v0  ;;  %v1152_v25 = vpop.permute.xlu1 %1151 }
  0xef   : > { %v1291_v22 = vadd.f32 1.0, %v5921_v16  ;;  %5942 = vpow2.f32 %v5165_v12  ;;  %v1192_v23 = vadd.f32 %v1172_v13, %v1135_v60  ;;  %v1175_v24 = vmul.f32 %v6413_v43, %v1095_v0  ;;  %v1147_v27 = vpop.permute.xlu0 %1146 }
  0xf0   : > { %v5923_v28 = vpop.eup %5922  ;;  %5944 = vrcp.f32 %v1292_v17  ;;  %v5167_v26 = vmul.f32 -1.442695, %v6528_v19  ;;  %v1140_v30 = vadd.f32 %v1120_v21, %v1083_v50  ;;  %v1137_v31 = vadd.f32 %v1117_v10, %v1080_v47 }
  0xf1   : > { %v5925_v32 = vpop.eup %5924  ;;  %5946 = vrcp.f32 %v1291_v22  ;;  %v6534_v34 = vadd.f32 %v6420_v52, %v1192_v23  ;;  %v1195_v35 = vadd.f32 %v1175_v24, %v1138_v15  ;;  %v1119_v39 = vmul.f32 %v6409_v38, %v1090_v2  ;;  %1367 = vrot.lane.b32.xlu1 %v5923_v28, %s6204_s18 }
  0xf2   : > { %v5927_v40 = vpop.eup %5926  ;;  %5948 = vpow2.f32 %v5164_v37  ;;  %v1174_v41 = vmul.f32 %v6413_v43, %v1090_v2  ;;  %v1177_v42 = vmul.f32 %v6413_v43, %v1152_v25  ;;  %v1176_v44 = vmul.f32 %v6413_v43, %v1147_v27  ;;  %1365 = vrot.lane.b32.xlu0 %v5925_v32, %s6204_s18 }
  0xf3   : > { %v5929_v46 = vpop.eup %5928  ;;  %v1294_v47 = vadd.f32 1.0, %v5927_v40  ;;  %5950 = vpow2.f32 %v5167_v26  ;;  %v5166_v48 = vmul.f32 -1.442695, %v6534_v34  ;;  %v6544_v38 = vadd.f32 %v6420_v52, %v1195_v35 }
  0xf4   : > { %v5931_v49 = vpop.eup %5930  ;;  %v1293_v50 = vadd.f32 1.0, %v5929_v46  ;;  %v1139_v51 = vadd.f32 %v1119_v39, %v1082_v5  ;;  %v1194_v53 = vadd.f32 %v1174_v41, %v1137_v31  ;;  %v1197_v55 = vadd.f32 %v1177_v42, %v1140_v30 }
  0xf5   : > { %v5933_v56 = vpop.eup %5932  ;;  %5952 = vrcp.f32 %v1294_v47  ;;  %v5169_v58 = vmul.f32 -1.442695, %v6544_v38  ;;  %1371 = vrot.lane.b32.xlu1 %v5931_v49, %s6204_s18 }
  0xf6   : > { %v5935_v43 = vpop.eup %5934  ;;  %5954 = vrcp.f32 %v1293_v50  ;;  %v6549_v59 = vadd.f32 %v6420_v52, %v1194_v53  ;;  %v6552_v60 = vadd.f32 %v6420_v52, %v1197_v55  ;;  %v1196_v61 = vadd.f32 %v1176_v44, %v1139_v51  ;;  %1369 = vrot.lane.b32.xlu0 %v5933_v56, %s6204_s18 }
  0xf7   : > { %v1296_v63 = vadd.f32 1.0, %v5935_v43  ;;  %5956 = vpow2.f32 %v5166_v48 }
  0xf8   : > { %v5937_v0 = vpop.eup %5936  ;;  %5958 = vpow2.f32 %v5169_v58  ;;  %v5168_v2 = vmul.f32 -1.442695, %v6549_v59  ;;  %v5171_v3 = vmul.f32 -1.442695, %v6552_v60  ;;  %v6558_v5 = vadd.f32 %v6420_v52, %v1196_v61 }
  0xf9   : > { %v5939_v6 = vpop.eup %5938  ;;  %5960 = vrcp.f32 %v1296_v63  ;;  %v1295_v8 = vadd.f32 1.0, %v5937_v0 }
  0xfa   : > { %v5941_v10 = vpop.eup %5940  ;;  %5962 = vpow2.f32 %v5168_v2  ;;  %v5170_v11 = vmul.f32 -1.442695, %v6558_v5  ;;  %1375 = vrot.lane.b32.xlu1 %v5939_v6, %s6204_s18 }
  0xfb   : > { %5964 = vrcp.f32 %v1295_v8  ;;  %1373 = vrot.lane.b32.xlu0 %v5941_v10, %s6204_s18 }
  0xfc   : > { %v5943_v12 = vpop.eup %5942  ;;  %5966 = vpow2.f32 %v5171_v3 }
  0xfd   : > { %v5945_v13 = vpop.eup %5944  ;;  %v1298_v15 = vadd.f32 1.0, %v5943_v12  ;;  %5968 = vpow2.f32 %v5170_v11 }
  0xfe   : > { %v5947_v16 = vpop.eup %5946  ;;  %1379 = vrot.lane.b32.xlu1 %v5945_v13, %s6204_s18 }
  0xff   : > { %v5949_v52 = vpop.eup %5948  ;;  %5970 = vrcp.f32 %v1298_v15  ;;  %1377 = vrot.lane.b32.xlu0 %v5947_v16, %s6204_s18 }
 0x100   : > { %v5951_v17 = vpop.eup %5950  ;;  %v1297_v37 = vadd.f32 1.0, %v5949_v52 }
 0x101   : > { %v1300_v21 = vadd.f32 1.0, %v5951_v17 }
 0x102   : > { %v5953_v22 = vpop.eup %5952  ;;  %5972 = vrcp.f32 %v1297_v37 }
 0x103   : > { %v5955_v23 = vpop.eup %5954  ;;  %5974 = vrcp.f32 %v1300_v21  ;;  %1383 = vrot.lane.b32.xlu1 %v5953_v22, %s6204_s18 }
 0x104   : > { %v5957_v24 = vpop.eup %5956  ;;  %1381 = vrot.lane.b32.xlu0 %v5955_v23, %s6204_s18 }
 0x105   : > { %v5959_v25 = vpop.eup %5958  ;;  %v1299_v27 = vadd.f32 1.0, %v5957_v24 }
 0x106   : > { %v5961_v28 = vpop.eup %5960  ;;  %v1302_v26 = vadd.f32 1.0, %v5959_v25 }
 0x107   : > { %v5963_v30 = vpop.eup %5962  ;;  %5976 = vrcp.f32 %v1299_v27  ;;  %1387 = vrot.lane.b32.xlu1 %v5961_v28, %s6204_s18 }
 0x108   : > { %v5965_v31 = vpop.eup %5964  ;;  %5978 = vrcp.f32 %v1302_v26  ;;  %v1301_v32 = vadd.f32 1.0, %v5963_v30 }
 0x109   : > { %v5967_v35 = vpop.eup %5966  ;;  %1385 = vrot.lane.b32.xlu0 %v5965_v31, %s6204_s18 }
 0x10a   : > { %v5969_v39 = vpop.eup %5968  ;;  %5980 = vrcp.f32 %v1301_v32  ;;  %v1304_v40 = vadd.f32 1.0, %v5967_v35 }
 0x10b   : > { %v1303_v41 = vadd.f32 1.0, %v5969_v39 }
 0x10c   : > { %v5971_v42 = vpop.eup %5970  ;;  %5982 = vrcp.f32 %v1304_v40  ;;  %v6205_v40 = vmov 0.0  }
 0x10d   : > { %5984 = vrcp.f32 %v1303_v41  ;;  %1391 = vrot.lane.b32.xlu1 %v5971_v42, %s6204_s18  ;;  %5526 = vmatprep.subr.bf16.mxu1 %v6205_v40 }
 0x10e   : > { %5556 = vmatprep.subr.bf16.mxu0 %v6205_v40  ;;  %5528 = vmatprep.mubr.msk.bf16.mxu1 %vm6206_vm1, %v6205_v40 }
 0x10f   : > { %v5973_v44 = vpop.eup %5972 }
 0x110   : > { %v5975_v46 = vpop.eup %5974  ;;  %1389 = vrot.lane.b32.xlu0 %v5973_v44, %s6204_s18 }
 0x111   : > { %1395 = vrot.lane.b32.xlu1 %v5975_v46, %s6204_s18 }
 0x114   : > { %v5977_v47 = vpop.eup %5976 }
 0x115   : > { %v5979_v48 = vpop.eup %5978  ;;  %1393 = vrot.lane.b32.xlu0 %v5977_v47, %s6204_s18 }
 0x116   : > { %1399 = vrot.lane.b32.xlu1 %v5979_v48, %s6204_s18 }
 0x117   : > { %v5981_v49 = vpop.eup %5980 }
 0x119   : > { %v5983_v50 = vpop.eup %5982  ;;  %1397 = vrot.lane.b32.xlu0 %v5981_v49, %s6204_s18  ;;  %v6628_v49 = vld [vmem:[%s6221_s9] sm:$0xff]  }
 0x11a   : > { %v5985_v51 = vpop.eup %5984  ;;  %1403 = vrot.lane.b32.xlu1 %v5983_v50, %s6204_s18 }
 0x11d   : > { %1401 = vrot.lane.b32.xlu0 %v5985_v51, %s6204_s18 }
 0x163   : > { %v1368_v53 = vpop.permute.xlu1 %1367 }
 0x164   : > { %v1426_v55 = vmul.f32 %v1368_v53, %v6427_v62  ;;  %v1366_v56 = vpop.permute.xlu0 %1365 }
 0x165   : > { %v1425_v58 = vmul.f32 %v1366_v56, %v6431_v1 }
 0x167   : > { %v1372_v43 = vpop.permute.xlu1 %1371  ;;  %v1447_v61 = vpack.c.bf16 %v1426_v55, %v1425_v58 }
 0x168   : > { %v1428_v63 = vmul.f32 %v1372_v43, %v6442_v14  ;;  %v1370_v0 = vpop.permute.xlu0 %1369 }
 0x169   : > { %v1427_v2 = vmul.f32 %v1370_v0, %v6447_v18  ;;  %5506 = vmatprep.mubr.msk.bf16.mxu0 %vm1470_vm0, %v1447_v61 }
 0x16b   : > { %v1448_v3 = vpack.c.bf16 %v1428_v63, %v1427_v2 }
 0x16c   : > { %v1376_v6 = vpop.permute.xlu1 %1375 }
 0x16d   : > { %v1430_v8 = vmul.f32 %v1376_v6, %v6457_v33  ;;  %v1374_v10 = vpop.permute.xlu0 %1373  ;;  %5507 = vmatmul.mubr.msk.bf16.vlgmr.msra.gmra.mxu0 %vm1470_vm0, %v1448_v3 }
 0x16e   : > { %v1429_v62 = vmul.f32 %v1374_v10, %v6462_v36 }
 0x170   : > { %v1449_v1 = vpack.c.bf16 %v1430_v8, %v1429_v62  ;;  %v1380_v11 = vpop.permute.xlu1 %1379 }
 0x171   : > { %v1432_v12 = vmul.f32 %v1380_v11, %v6472_v54  ;;  %v1378_v13 = vpop.permute.xlu0 %1377 }
 0x172   : > { %v1431_v14 = vmul.f32 %v1378_v13, %v6477_v57  ;;  %5510 = vmatprep.mubr.msk.bf16.mxu0 %vm1470_vm0, %v1449_v1 }
 0x174   : > { %v1450_v18 = vpack.c.bf16 %v1432_v12, %v1431_v14 }
 0x175   : > { %v1384_v15 = vpop.permute.xlu1 %1383 }
 0x176   : > { %v1434_v16 = vmul.f32 %v1384_v15, %v6487_v9  ;;  %v1382_v52 = vpop.permute.xlu0 %1381  ;;  %5511 = vmatmul.mubr.msk.bf16.gmra.mxu0 %vm1470_vm0, %v1450_v18 }
 0x177   : > { %v1433_v33 = vmul.f32 %v1382_v52, %v6493_v20 }
 0x179   : > { %v1451_v17 = vpack.c.bf16 %v1434_v16, %v1433_v33  ;;  %v1388_v36 = vpop.permute.xlu1 %1387 }
 0x17a   : > { %v1436_v37 = vmul.f32 %v1388_v36, %v6500_v29 }
 0x17b   : > { %v1386_v21 = vpop.permute.xlu0 %1385  ;;  %5514 = vmatprep.mubr.msk.bf16.mxu0 %vm1470_vm0, %v1451_v17 }
 0x17c   : > { %v1435_v54 = vmul.f32 %v1386_v21, %v6505_v45 }
 0x17e   : > { %v1452_v57 = vpack.c.bf16 %v1436_v37, %v1435_v54 }
 0x17f   : > { %v1392_v22 = vpop.permute.xlu1 %1391 }
 0x180   : > { %5515 = vmatmul.mubr.msk.bf16.gmra.mxu0 %vm1470_vm0, %v1452_v57  ;;  %v1438_v9 = vmul.f32 %v1392_v22, %v6516_v4 }
 0x182   : > { %v1390_v23 = vpop.permute.xlu0 %1389 }
 0x183   : > { %v1437_v24 = vmul.f32 %v1390_v23, %v6521_v7  ;;  %v1396_v25 = vpop.permute.xlu1 %1395 }
 0x184   : > { %v1440_v27 = vmul.f32 %v1396_v25, %v6528_v19 }
 0x185   : > { %v1453_v20 = vpack.c.bf16 %v1438_v9, %v1437_v24 }
 0x187   : > { %v1394_v28 = vpop.permute.xlu0 %1393  ;;  %5518 = vmatprep.mubr.msk.bf16.mxu0 %vm1470_vm0, %v1453_v20 }
 0x188   : > { %v1439_v29 = vmul.f32 %v1394_v28, %v6534_v34  ;;  %v1400_v26 = vpop.permute.xlu1 %1399 }
 0x189   : > { %v1442_v30 = vmul.f32 %v1400_v26, %v6544_v38  ;;  %v2044_v26 = vld [vmem:[%s6246_s29] sm:$0xf] }
 0x18a   : > { %v1454_v45 = vpack.c.bf16 %v1440_v27, %v1439_v29 }
 0x18b   : > { %v1398_v31 = vpop.permute.xlu0 %1397 }
 0x18c   : > { %v1441_v32 = vmul.f32 %v1398_v31, %v6549_v59  ;;  %5519 = vmatmul.mubr.msk.bf16.gmra.mxu0 %vm1470_vm0, %v1454_v45  ;;  %v1404_v4 = vpop.permute.xlu1 %1403  ;;  %v2095_v45 = vsel %vm2093_vm2, %v2044_v26, 0 }
 0x18d   : > { %v1444_v35 = vmul.f32 %v1404_v4, %v6552_v60 }
 0x18e   : > { %v1455_v7 = vpack.c.bf16 %v1442_v30, %v1441_v32 }
 0x18f   : > { %v1402_v19 = vpop.permute.xlu0 %1401 }
 0x190   : > { %v1443_v39 = vmul.f32 %v1402_v19, %v6558_v5  ;;  %5522 = vmatprep.mubr.msk.bf16.mxu0 %vm1470_vm0, %v1455_v7  ;;  %v6614_v5 = vld [vmem:[%s6241_s25] ss:$0 sm:$0xff] }
 0x192   : > { %v1456_v34 = vpack.c.bf16 %v1444_v35, %v1443_v39 }
 0x194   : > { %5523 = vmatmul.mubr.msk.bf16.gmra.mxu0 %vm1470_vm0, %v1456_v34 }
 0x195   : > { %5558 = vmatprep.mubr.msk.bf16.mxu0 %vm6206_vm1, %v6205_v40 }
 0x22d   : > { %v5508_v38 = vpop.f32.mrf.mxu0 }
 0x22e   : > { %v6631_v50 = vadd.f32 %v5508_v38, %v6614_v5 }
 0x22f   : > { %v1535_v59 = vpop.f32.mrf.mxu0 }
 0x230   : > { %v6617_v42 = vadd.f32 %v6614_v5, %v1535_v59 }
 0x231   : > { %v5509_v60 = vpop.f32.mrf.mxu0 }
 0x232   : > { %v6623_v46 = vadd.f32 %v5509_v60, %v6614_v5 }
 0x233   : > { %v1538_v41 = vpop.f32.mrf.mxu0 }
 0x234   : > { %v6620_v44 = vadd.f32 %v6614_v5, %v1538_v41  ;;  %v1666_v53 = vpack.c.bf16 %v6623_v46, %v6631_v50 }
 0x236   : > { %v5512_v47 = vpop.f32.mrf.mxu0  ;;  %v1616_v48 = vpack.c.bf16 %v6620_v44, %v6617_v42 }
 0x237   : > { %v6666_v62 = vadd.f32 %v5512_v47, %v6614_v5 }
 0x238   : > { %v1551_v51 = vpop.f32.mrf.mxu0  ;;  %5527 = vmatpush3.bf16.msra.mxu1 %v1616_v48 }
 0x239   : > { %5532 = vmatprep.subr.bf16.mxu1 %v6205_v40  ;;  %v6645_v43 = vadd.f32 %v6614_v5, %v1551_v51 }
 0x23a   : > { %v5513_v55 = vpop.f32.mrf.mxu0 }
 0x23b   : > { %5529 = vmatmul.mubr.msk.bf16.vlgmr.msra.gmra.mxu1 %vm1470_vm0, %v6628_v49  ;;  %v6661_v8 = vadd.f32 %v5513_v55, %v6614_v5 }
 0x23c   : > { %v1554_v56 = vpop.f32.mrf.mxu0  ;;  %5533 = vmatpush3.bf16.msra.mxu1 %v1666_v53  ;;  %5534 = vmatprep.mubr.msk.bf16.mxu1 %vm6206_vm1, %v6205_v40 }
 0x23d   : > { %5538 = vmatprep.subr.bf16.mxu1 %v6205_v40  ;;  %v6642_v58 = vadd.f32 %v6614_v5, %v1554_v56  ;;  %v1750_v11 = vpack.c.bf16 %v6661_v8, %v6666_v62 }
 0x23f   : > { %v1708_v63 = vpack.c.bf16 %v6642_v58, %v6645_v43 }
 0x240   : > { %v5516_v61 = vpop.f32.mrf.mxu0 }
 0x241   : > { %v6654_v3 = vadd.f32 %v5516_v61, %v6614_v5 }
 0x242   : > { %v1567_v0 = vpop.f32.mrf.mxu0 }
 0x243   : > { %5535 = vmatmul.mubr.msk.bf16.vlgmr.msra.gmra.mxu1 %vm1470_vm0, %v6628_v49  ;;  %v6684_v18 = vadd.f32 %v6614_v5, %v1567_v0 }
 0x244   : > { %v5517_v2 = vpop.f32.mrf.mxu0  ;;  %5539 = vmatpush3.bf16.msra.mxu1 %v1708_v63  ;;  %5540 = vmatprep.mubr.msk.bf16.mxu1 %vm6206_vm1, %v6205_v40 }
 0x245   : > { %v6657_v6 = vadd.f32 %v5517_v2, %v6614_v5  ;;  %5544 = vmatprep.subr.bf16.mxu1 %v6205_v40 }
 0x246   : > { %v1570_v1 = vpop.f32.mrf.mxu0 }
 0x247   : > { %v1834_v10 = vpack.c.bf16 %v6657_v6, %v6654_v3  ;;  %v6679_v13 = vadd.f32 %v6614_v5, %v1570_v1 }
 0x249   : > { %5557 = vmatpush3.bf16.msra.mxu0 %v1834_v10  ;;  %v1792_v33 = vpack.c.bf16 %v6679_v13, %v6684_v18 }
 0x24a   : > { %5568 = vmatprep.subr.bf16.mxu0 %v6205_v40 }
 0x24b   : > { %5541 = vmatmul.mubr.msk.bf16.vlgmr.msra.gmra.mxu1 %vm1470_vm0, %v6628_v49 }
 0x24c   : > { %v5520_v12 = vpop.f32.mrf.mxu0  ;;  %5545 = vmatpush3.bf16.msra.mxu1 %v1750_v11  ;;  %5559 = vmatmul.mubr.msk.bf16.vlgmr.msra.gmra.mxu0 %vm1470_vm0, %v6628_v49 }
 0x24d   : > { %5546 = vmatprep.mubr.msk.bf16.mxu1 %vm6206_vm1, %v6205_v40  ;;  %5550 = vmatprep.subr.bf16.mxu1 %v6205_v40  ;;  %v6687_v16 = vadd.f32 %v5520_v12, %v6614_v5 }
 0x24e   : > { %v1583_v14 = vpop.f32.mrf.mxu0  ;;  %5570 = vmatprep.mubr.msk.bf16.mxu0 %vm6206_vm1, %v6205_v40 }
 0x24f   : > { %v6706_v57 = vadd.f32 %v6614_v5, %v1583_v14 }
 0x250   : > { %v5521_v15 = vpop.f32.mrf.mxu0 }
 0x251   : > { %v6690_v52 = vadd.f32 %v5521_v15, %v6614_v5 }
 0x252   : > { %v1586_v17 = vpop.f32.mrf.mxu0 }
 0x253   : > { %v1918_v36 = vpack.c.bf16 %v6690_v52, %v6687_v16  ;;  %5547 = vmatmul.mubr.msk.bf16.vlgmr.msra.gmra.mxu1 %vm1470_vm0, %v6628_v49  ;;  %v6702_v21 = vadd.f32 %v6614_v5, %v1586_v17 }
 0x254   : > { %v5524_v37 = vpop.f32.mrf.mxu0  ;;  %5551 = vmatpush3.bf16.msra.mxu1 %v1792_v33  ;;  %5552 = vmatprep.mubr.msk.bf16.mxu1 %vm6206_vm1, %v6205_v40 }
 0x255   : > { %5569 = vmatpush3.bf16.msra.mxu0 %v1918_v36  ;;  %5562 = vmatprep.subr.bf16.mxu1 %v6205_v40  ;;  %v6711_v9 = vadd.f32 %v5524_v37, %v6614_v5  ;;  %v1876_v24 = vpack.c.bf16 %v6702_v21, %v6706_v57 }
 0x256   : > { %v1599_v54 = vpop.f32.mrf.mxu0  ;;  %5580 = vmatprep.subr.bf16.mxu0 %v6205_v40 }
 0x257   : > { %v6731_v28 = vadd.f32 %v6614_v5, %v1599_v54 }
 0x258   : > { %v5525_v22 = vpop.f32.mrf.mxu0  ;;  %5571 = vmatmul.mubr.msk.bf16.vlgmr.msra.gmra.mxu0 %vm1470_vm0, %v6628_v49 }
 0x259   : > { %v6714_v23 = vadd.f32 %v5525_v22, %v6614_v5  ;;  %5582 = vmatprep.mubr.msk.bf16.mxu0 %vm6206_vm1, %v6205_v40 }
 0x25a   : > { %v1602_v20 = vpop.f32.mrf.mxu0 }
 0x25b   : > { %v2002_v25 = vpack.c.bf16 %v6714_v23, %v6711_v9  ;;  %5553 = vmatmul.mubr.msk.bf16.vlgmr.msra.gmra.mxu1 %vm1470_vm0, %v6628_v49  ;;  %v6728_v27 = vadd.f32 %v6614_v5, %v1602_v20 }
 0x25c   : > { %5563 = vmatpush3.bf16.msra.mxu1 %v1876_v24  ;;  %5564 = vmatprep.mubr.msk.bf16.mxu1 %vm6206_vm1, %v6205_v40 }
 0x25d   : > { %5581 = vmatpush3.bf16.msra.mxu0 %v2002_v25  ;;  %5574 = vmatprep.subr.bf16.mxu1 %v6205_v40  ;;  %v1960_v29 = vpack.c.bf16 %v6728_v27, %v6731_v28 }
 0x260   : > { %5583 = vmatmul.mubr.msk.bf16.vlgmr.msra.gmra.mxu0 %vm1470_vm0, %v6628_v49 }
 0x263   : > { %5565 = vmatmul.mubr.msk.bf16.vlgmr.msra.gmra.mxu1 %vm1470_vm0, %v6628_v49 }
 0x264   : > { %5575 = vmatpush3.bf16.msra.mxu1 %v1960_v29  ;;  %5576 = vmatprep.mubr.msk.bf16.mxu1 %vm6206_vm1, %v6205_v40 }
 0x265   : > { %5838 = vmatprep.subr.msk.bf16.mxu1 %vm2093_vm2, %v2044_v26 }
 0x26b   : > { %5577 = vmatmul.mubr.msk.bf16.vlgmr.msra.gmra.mxu1 %vm1470_vm0, %v6628_v49 }
 0x26c   : > { %5587 = vmatpush3.bf16.msra.mxu1 %v2095_v45 }
 0x2fb   : > { %v1659_v30 = vpop.f32.mrf.mxu1 }
 0x2fd   : > { %v5530_v31 = vpop.f32.mrf.mxu1 }
 0x2ff   : > { %v1662_v32 = vpop.f32.mrf.mxu1 }
 0x300   : > { %v2045_v4 = vpack.c.bf16 %v1662_v32, %v1659_v30 }
 0x301   : > { %v5531_v7 = vpop.f32.mrf.mxu1 }
 0x302   : > { %5588 = vmatprep.mubr.msk.bf16.mxu1 %vm2062_vm3, %v2045_v4 }
 0x303   : > { %v1701_v35 = vpop.f32.mrf.mxu1 }
 0x305   : > { %v5536_v19 = vpop.f32.mrf.mxu1 }
 0x307   : > { %v1704_v39 = vpop.f32.mrf.mxu1 }
 0x308   : > { %v2046_v34 = vpack.c.bf16 %v1704_v39, %v1701_v35  ;;  %v5206_v39 = vld [vmem:[%s6256_s8 + $0x4] sm:$0xf] }
 0x309   : > { %v5537_v38 = vpop.f32.mrf.mxu1  ;;  %5839 = vmatprep.subr.msk.bf16.mxu0 %vm2093_vm2, %v5206_v39 }
 0x30a   : > { %5589 = vmatmul.mubr.msk.bf16.vlgmr.msra.gmra.mxu1 %vm2062_vm3, %v2046_v34  ;;  %v5223_v34 = vld [vmem:[%s6256_s8 + $0x8] sm:$0xf]  ;;  %v2287_v38 = vsel %vm2093_vm2, %v5206_v39, 0 }
 0x30b   : > { %v1743_v59 = vpop.f32.mrf.mxu1  ;;  %5841 = vmatprep.subr.msk.bf16.mxu1 %vm2093_vm2, %v5223_v34  ;;  %5609 = vmatpush3.bf16.msra.mxu0 %v2287_v38 }
 0x30c   : > { %v1869_v60 = vpop.f32.mrf.mxu0 }
 0x30d   : > { %v5542_v5 = vpop.f32.mrf.mxu1 }
 0x30e   : > { %v5560_v41 = vpop.f32.mrf.mxu0  ;;  %v6765_v5 = vld [vmem:[%s6251_s3] ss:$0 sm:$0xff] }
 0x30f   : > { %v1746_v47 = vpop.f32.mrf.mxu1 }
 0x310   : > { %v2047_v48 = vpack.c.bf16 %v1746_v47, %v1743_v59  ;;  %v1872_v49 = vpop.f32.mrf.mxu0  ;;  %v2496_v59 = vsel %vm2093_vm2, %v5223_v34, 0 }
 0x311   : > { %v5543_v51 = vpop.f32.mrf.mxu1  ;;  %v2050_v36 = vpack.c.bf16 %v1872_v49, %v1869_v60  ;;  %5645 = vmatpush3.bf16.msra.mxu1 %v2496_v59  ;;  %v2250_v60 = vld [vmem:[%s6256_s8] sm:$0xf] }
 0x312   : > { %5592 = vmatprep.mubr.msk.bf16.mxu1 %vm2062_vm3, %v2047_v48  ;;  %v5561_v53 = vpop.f32.mrf.mxu0  ;;  %5840 = vmatprep.subr.msk.bf16.mxu0 %vm2093_vm2, %v2250_v60 }
 0x313   : > { %v1785_v55 = vpop.f32.mrf.mxu1 }
 0x315   : > { %v5548_v56 = vpop.f32.mrf.mxu1 }
 0x317   : > { %v1788_v61 = vpop.f32.mrf.mxu1 }
 0x318   : > { %v2048_v63 = vpack.c.bf16 %v1788_v61, %v1785_v55  ;;  %v1953_v0 = vpop.f32.mrf.mxu0 }
 0x319   : > { %v5549_v2 = vpop.f32.mrf.mxu1 }
 0x31a   : > { %5593 = vmatmul.mubr.msk.bf16.gmra.mxu1 %vm2062_vm3, %v2048_v63  ;;  %v5572_v10 = vpop.f32.mrf.mxu0 }
 0x31b   : > { %v1827_v1 = vpop.f32.mrf.mxu1 }
 0x31c   : > { %v1956_v11 = vpop.f32.mrf.mxu0 }
 0x31d   : > { %v5554_v12 = vpop.f32.mrf.mxu1  ;;  %v2052_v45 = vpack.c.bf16 %v1956_v11, %v1953_v0 }
 0x31e   : > { %v5573_v14 = vpop.f32.mrf.mxu0 }
 0x31f   : > { %v1830_v15 = vpop.f32.mrf.mxu1 }
 0x320   : > { %v2049_v33 = vpack.c.bf16 %v1830_v15, %v1827_v1  ;;  %v2037_v17 = vpop.f32.mrf.mxu0 }
 0x321   : > { %v5555_v37 = vpop.f32.mrf.mxu1 }
 0x322   : > { %5596 = vmatprep.mubr.msk.bf16.mxu1 %vm2062_vm3, %v2049_v33  ;;  %v5584_v54 = vpop.f32.mrf.mxu0 }
 0x323   : > { %v1911_v22 = vpop.f32.mrf.mxu1  ;;  %5597 = vmatmul.mubr.msk.bf16.gmra.mxu1 %vm2062_vm3, %v2050_v36 }
 0x324   : > { %v2040_v24 = vpop.f32.mrf.mxu0 }
 0x325   : > { %v5566_v25 = vpop.f32.mrf.mxu1  ;;  %v2054_v35 = vpack.c.bf16 %v2040_v24, %v2037_v17 }
 0x326   : > { %v5585_v20 = vpop.f32.mrf.mxu0 }
 0x327   : > { %v1914_v29 = vpop.f32.mrf.mxu1 }
 0x328   : > { %v2051_v26 = vpack.c.bf16 %v1914_v29, %v1911_v22 }
 0x329   : > { %v5567_v30 = vpop.f32.mrf.mxu1 }
 0x32a   : > { %5600 = vmatprep.mubr.msk.bf16.mxu1 %vm2062_vm3, %v2051_v26 }
 0x32b   : > { %v1995_v31 = vpop.f32.mrf.mxu1  ;;  %5601 = vmatmul.mubr.msk.bf16.gmra.mxu1 %vm2062_vm3, %v2052_v45 }
 0x32d   : > { %v5578_v32 = vpop.f32.mrf.mxu1 }
 0x32f   : > { %v1998_v4 = vpop.f32.mrf.mxu1 }
 0x330   : > { %v2053_v7 = vpack.c.bf16 %v1998_v4, %v1995_v31 }
 0x331   : > { %v5579_v19 = vpop.f32.mrf.mxu1 }
 0x332   : > { %5604 = vmatprep.mubr.msk.bf16.mxu1 %vm2062_vm3, %v2053_v7 }
 0x333   : > { %5605 = vmatmul.mubr.msk.bf16.gmra.mxu1 %vm2062_vm3, %v2054_v35 }
 0x3ca   : > { %v5590_v41 = vpop.f32.mrf.mxu1 }
 0x3cb   : > { %v2140_v47 = vadd.f32 %v5590_v41, %v6765_v5 }
 0x3cc   : > { %v6768_v48 = vpop.f32.mrf.mxu1 }
 0x3cd   : > { %v2212_v51 = vadd.f32 %v2140_v47, %v6631_v50 }
 0x3ce   : > { %v5591_v49 = vpop.f32.mrf.mxu1 }
 0x3cf   : > { %v2143_v53 = vadd.f32 %v5591_v49, %v6765_v5  ;;  %v2232_v56 = vmax.f32 %v2212_v51, 0.0 }
 0x3d0   : > { %v2134_v0 = vpop.f32.mrf.mxu1 }
 0x3d1   : > { %v2213_v55 = vadd.f32 %v2143_v53, %v6623_v46 }
 0x3d3   : > { %v2233_v61 = vmax.f32 %v2213_v55, 0.0 }
 0x3d5   : > { %v6773_v63 = vpack.c.bf16 %v2233_v61, %v2232_v56 }
 0x3d7   : > { %5610 = vmatprep.mubr.msk.bf16.mxu0 %vm2062_vm3, %v6773_v63 }
 0x3da   : > { %v5594_v2 = vpop.f32.mrf.mxu1 }
 0x3db   : > { %v2156_v11 = vadd.f32 %v5594_v2, %v6765_v5 }
 0x3dc   : > { %v2147_v10 = vpop.f32.mrf.mxu1 }
 0x3dd   : > { %v2148_v1 = vadd.f32 %v6765_v5, %v2147_v10  ;;  %v2216_v17 = vadd.f32 %v2156_v11, %v6666_v62  ;;  %v2390_v62 = vsel %vm2093_vm2, %v2250_v60, 0  ;;  %v2135_v10 = vadd.f32 %v6765_v5, %v2134_v0 }
 0x3de   : > { %v5595_v12 = vpop.f32.mrf.mxu1 }
 0x3df   : > { %v2159_v50 = vadd.f32 %v5595_v12, %v6765_v5  ;;  %v2214_v46 = vadd.f32 %v2148_v1, %v6645_v43  ;;  %v2236_v20 = vmax.f32 %v2216_v17, 0.0 }
 0x3e0   : > { %v2150_v14 = vpop.f32.mrf.mxu1 }
 0x3e1   : > { %v2217_v15 = vadd.f32 %v2159_v50, %v6661_v8  ;;  %v2151_v33 = vadd.f32 %v6765_v5, %v2150_v14  ;;  %v2234_v22 = vmax.f32 %v2214_v46, 0.0  ;;  %v2132_v50 = vadd.f32 %v6765_v5, %v6768_v48 }
 0x3e3   : > { %v2215_v36 = vadd.f32 %v2151_v33, %v6642_v58  ;;  %v5598_v37 = vpop.f32.mrf.mxu1  ;;  %v2237_v54 = vmax.f32 %v2217_v15, 0.0  ;;  %v2210_v48 = vadd.f32 %v2132_v50, %v6617_v42 }
 0x3e4   : > { %v2172_v43 = vadd.f32 %v5598_v37, %v6765_v5 }
 0x3e5   : > { %v2235_v24 = vmax.f32 %v2215_v36, 0.0  ;;  %v2163_v25 = vpop.f32.mrf.mxu1  ;;  %v6789_v8 = vpack.c.bf16 %v2237_v54, %v2236_v20  ;;  %v2230_v20 = vmax.f32 %v2210_v48, 0.0 }
 0x3e6   : > { %v2164_v29 = vadd.f32 %v6765_v5, %v2163_v25  ;;  %v2220_v7 = vadd.f32 %v2172_v43, %v6654_v3 }
 0x3e7   : > { %v6786_v26 = vpack.c.bf16 %v2235_v24, %v2234_v22  ;;  %v5599_v45 = vpop.f32.mrf.mxu1 }
 0x3e8   : > { %v2175_v30 = vadd.f32 %v5599_v45, %v6765_v5  ;;  %v2218_v31 = vadd.f32 %v2164_v29, %v6684_v18  ;;  %v2240_v59 = vmax.f32 %v2220_v7, 0.0 }
 0x3e9   : > { %v2166_v58 = vpop.f32.mrf.mxu1  ;;  %5611 = vmatmul.mubr.msk.bf16.vlgmr.msra.gmra.mxu0 %vm2062_vm3, %v6786_v26  ;;  %5646 = vmatprep.mubr.msk.bf16.mxu1 %vm2062_vm3, %v6786_v26 }
 0x3ea   : > { %v2221_v32 = vadd.f32 %v2175_v30, %v6657_v6  ;;  %v2167_v4 = vadd.f32 %v6765_v5, %v2166_v58  ;;  %5614 = vmatprep.mubr.msk.bf16.mxu0 %vm2062_vm3, %v6789_v8  ;;  %5647 = vmatmul.mubr.msk.bf16.vlgmr.msra.gmra.mxu1 %vm2062_vm3, %v6789_v8  ;;  %v2238_v38 = vmax.f32 %v2218_v31, 0.0 }
 0x3eb   : > { %v5602_v35 = vpop.f32.mrf.mxu1  ;;  %5627 = vmatpush3.bf16.msra.mxu0 %v2390_v62 }
 0x3ec   : > { %v2219_v19 = vadd.f32 %v2167_v4, %v6679_v13  ;;  %v2241_v39 = vmax.f32 %v2221_v32, 0.0  ;;  %v2188_v60 = vadd.f32 %v5602_v35, %v6765_v5 }
 0x3ed   : > { %v2179_v34 = vpop.f32.mrf.mxu1 }
 0x3ee   : > { %v2239_v18 = vmax.f32 %v2219_v19, 0.0  ;;  %v2180_v6 = vadd.f32 %v6765_v5, %v2179_v34  ;;  %v2256_v51 = vpack.c.bf16 %v2241_v39, %v2240_v59  ;;  %v2224_v56 = vadd.f32 %v2188_v60, %v6687_v16 }
 0x3ef   : > { %v5603_v41 = vpop.f32.mrf.mxu1 }
 0x3f0   : > { %v2255_v47 = vpack.c.bf16 %v2239_v18, %v2238_v38  ;;  %v2191_v49 = vadd.f32 %v5603_v41, %v6765_v5  ;;  %v2222_v3 = vadd.f32 %v2180_v6, %v6706_v57  ;;  %v2244_v14 = vmax.f32 %v2224_v56, 0.0 }
 0x3f1   : > { %v2182_v53 = vpop.f32.mrf.mxu1 }
 0x3f2   : > { %v2225_v55 = vadd.f32 %v2191_v49, %v6690_v52  ;;  %v2183_v13 = vadd.f32 %v6765_v5, %v2182_v53  ;;  %5615 = vmatmul.mubr.msk.bf16.gmra.mxu0 %vm2062_vm3, %v2255_v47  ;;  %5650 = vmatprep.mubr.msk.bf16.mxu1 %vm2062_vm3, %v2255_v47  ;;  %v2242_v52 = vmax.f32 %v2222_v3, 0.0  ;;  %v6864_v53 = vld [vmem:[%s6261_s14] ss:$0 sm:$0xff] }
 0x3f3   : > { %v5606_v61 = vpop.f32.mrf.mxu1  ;;  %5618 = vmatprep.mubr.msk.bf16.mxu0 %vm2062_vm3, %v2256_v51  ;;  %5651 = vmatmul.mubr.msk.bf16.gmra.mxu1 %vm2062_vm3, %v2256_v51 }
 0x3f4   : > { %v2223_v2 = vadd.f32 %v2183_v13, %v6702_v21  ;;  %v2245_v57 = vmax.f32 %v2225_v55, 0.0  ;;  %v2204_v16 = vadd.f32 %v5606_v61, %v6765_v5  ;;  %v2211_v21 = vadd.f32 %v2135_v10, %v6620_v44 }
 0x3f5   : > { %v2195_v1 = vpop.f32.mrf.mxu1 }
 0x3f6   : > { %v2243_v11 = vmax.f32 %v2223_v2, 0.0  ;;  %v2196_v12 = vadd.f32 %v6765_v5, %v2195_v1  ;;  %v2258_v17 = vpack.c.bf16 %v2245_v57, %v2244_v14  ;;  %v2228_v22 = vadd.f32 %v2204_v16, %v6711_v9 }
 0x3f7   : > { %v5607_v46 = vpop.f32.mrf.mxu1  ;;  %v2231_v24 = vmax.f32 %v2211_v21, 0.0 }
 0x3f8   : > { %v2257_v15 = vpack.c.bf16 %v2243_v11, %v2242_v52  ;;  %v2207_v33 = vadd.f32 %v5607_v46, %v6765_v5  ;;  %v2226_v36 = vadd.f32 %v2196_v12, %v6731_v28 }
 0x3f9   : > { %v2198_v0 = vpop.f32.mrf.mxu1  ;;  %v2251_v43 = vpack.c.bf16 %v2231_v24, %v2230_v20 }
 0x3fa   : > { %v2229_v37 = vadd.f32 %v2207_v33, %v6714_v23  ;;  %v2199_v54 = vadd.f32 %v6765_v5, %v2198_v0  ;;  %5619 = vmatmul.mubr.msk.bf16.gmra.mxu0 %vm2062_vm3, %v2257_v15  ;;  %5654 = vmatprep.mubr.msk.bf16.mxu1 %vm2062_vm3, %v2257_v15  ;;  %v2246_v25 = vmax.f32 %v2226_v36, 0.0  ;;  %v2248_v5 = vmax.f32 %v2228_v22, 0.0 }
 0x3fb   : > { %5622 = vmatprep.mubr.msk.bf16.mxu0 %vm2062_vm3, %v2258_v17  ;;  %5655 = vmatmul.mubr.msk.bf16.gmra.mxu1 %vm2062_vm3, %v2258_v17 }
 0x3fc   : > { %v2227_v44 = vadd.f32 %v2199_v54, %v6728_v27  ;;  %v2249_v28 = vmax.f32 %v2229_v37, 0.0 }
 0x3fe   : > { %v2247_v23 = vmax.f32 %v2227_v44, 0.0  ;;  %v2491_v45 = vpack.c.bf16 %v2249_v28, %v2248_v5 }
 0x400   : > { %v2261_v29 = vpack.c.bf16 %v2247_v23, %v2246_v25 }
 0x402   : > { %5623 = vmatmul.mubr.msk.bf16.gmra.mxu0 %vm2062_vm3, %v2261_v29  ;;  %5658 = vmatprep.mubr.msk.bf16.mxu1 %vm2062_vm3, %v2261_v29 }
 0x403   : > { %5628 = vmatprep.mubr.msk.bf16.mxu0 %vm2062_vm3, %v2251_v43  ;;  %5659 = vmatmul.mubr.msk.bf16.gmra.mxu1 %vm2062_vm3, %v2491_v45 }
 0x40a   : > { %5629 = vmatmul.mubr.msk.bf16.vlgmr.msra.gmra.mxu0 %vm2062_vm3, %v6773_v63 }
 0x40b   : > { %5632 = vmatprep.mubr.msk.bf16.mxu0 %vm2062_vm3, %v6786_v26 }
 0x412   : > { %5633 = vmatmul.mubr.msk.bf16.gmra.mxu0 %vm2062_vm3, %v6789_v8 }
 0x413   : > { %5636 = vmatprep.mubr.msk.bf16.mxu0 %vm2062_vm3, %v2255_v47 }
 0x41a   : > { %5637 = vmatmul.mubr.msk.bf16.gmra.mxu0 %vm2062_vm3, %v2256_v51 }
 0x41b   : > { %5640 = vmatprep.mubr.msk.bf16.mxu0 %vm2062_vm3, %v2257_v15 }
 0x422   : > { %5641 = vmatmul.mubr.msk.bf16.gmra.mxu0 %vm2062_vm3, %v2258_v17 }
 0x4a9   : > { %v5612_v42 = vpop.f32.mrf.mxu0 }
 0x4aa   : > { %v5648_v30 = vpop.f32.mrf.mxu1 }
 0x4ab   : > { %v2323_v9 = vpop.f32.mrf.mxu0 }
 0x4ac   : > { %v6849_v63 = vpop.f32.mrf.mxu1 }
 0x4ad   : > { %v5613_v27 = vpop.f32.mrf.mxu0 }
 0x4ae   : > { %v5649_v31 = vpop.f32.mrf.mxu1 }
 0x4af   : > { %v2326_v62 = vpop.f32.mrf.mxu0 }
 0x4b0   : > { %v6851_v4 = vpop.f32.mrf.mxu1 }
 0x4b2   : > { %v5616_v58 = vpop.f32.mrf.mxu0 }
 0x4b3   : > { %v5652_v19 = vpop.f32.mrf.mxu1 }
 0x4b4   : > { %v2339_v26 = vpop.f32.mrf.mxu0 }
 0x4b5   : > { %v2548_v38 = vpop.f32.mrf.mxu1 }
 0x4b6   : > { %v5617_v32 = vpop.f32.mrf.mxu0 }
 0x4b7   : > { %v5653_v59 = vpop.f32.mrf.mxu1 }
 0x4b8   : > { %v2342_v8 = vpop.f32.mrf.mxu0 }
 0x4b9   : > { %v2551_v47 = vpop.f32.mrf.mxu1 }
 0x4ba   : > { %v5620_v7 = vpop.f32.mrf.mxu0 }
 0x4bb   : > { %v5656_v13 = vpop.f32.mrf.mxu1 }
 0x4bc   : > { %v2355_v35 = vpop.f32.mrf.mxu0 }
 0x4bd   : > { %v2564_v52 = vpop.f32.mrf.mxu1 }
 0x4be   : > { %v5621_v39 = vpop.f32.mrf.mxu0 }
 0x4bf   : > { %v5657_v15 = vpop.f32.mrf.mxu1 }
 0x4c0   : > { %v6853_v34 = vpop.f32.mrf.mxu0 }
 0x4c1   : > { %v2567_v44 = vpop.f32.mrf.mxu1 }
 0x4c2   : > { %v6855_v18 = vpop.f32.mrf.mxu0 }
 0x4c4   : > { %v6857_v6 = vpop.f32.mrf.mxu0 }
 0x4c6   : > { %v6859_v60 = vpop.f32.mrf.mxu0 }
 0x4c8   : > { %v6861_v41 = vpop.f32.mrf.mxu0 }
 0x4ca   : > { %v5630_v49 = vpop.f32.mrf.mxu0 }
 0x4cb   : > { %v2435_v51 = vadd.f32 %v5630_v49, %v5612_v42 }
 0x4cc   : > { %v2426_v3 = vpop.f32.mrf.mxu0 }
 0x4cd   : > { %v2597_v55 = vadd.f32 %v5648_v30, %v2435_v51  ;;  %v2427_v24 = vadd.f32 %v2426_v3, %v2323_v9  ;;  %v5660_v30 = vpop.f32.mrf.mxu1 }
 0x4ce   : > { %v5631_v56 = vpop.f32.mrf.mxu0 }
 0x4cf   : > { %v6867_v61 = vadd.f32 %v6864_v53, %v2597_v55  ;;  %v2438_v2 = vadd.f32 %v5631_v56, %v5613_v27  ;;  %v2580_v51 = vpop.f32.mrf.mxu1 }
 0x4d0   : > { %v2429_v10 = vpop.f32.mrf.mxu0 }
 0x4d1   : > { %v5235_v57 = vmul.f32 -1.442695, %v6867_v61  ;;  %v2598_v1 = vadd.f32 %v5649_v31, %v2438_v2  ;;  %v2430_v43 = vadd.f32 %v2429_v10, %v2326_v62  ;;  %v2595_v31 = vadd.f32 %v6849_v63, %v2427_v24 }
 0x4d2   : > { %v5634_v11 = vpop.f32.mrf.mxu0 }
 0x4d3   : > { %5986 = vpow2.f32 %v5235_v57  ;;  %v6871_v12 = vadd.f32 %v6864_v53, %v2598_v1  ;;  %v2451_v50 = vadd.f32 %v5634_v11, %v5616_v58 }
 0x4d4   : > { %v2442_v14 = vpop.f32.mrf.mxu0 }
 0x4d5   : > { %v5236_v16 = vmul.f32 -1.442695, %v6871_v12  ;;  %v2443_v46 = vadd.f32 %v2442_v14, %v2339_v26  ;;  %v2601_v33 = vadd.f32 %v5652_v19, %v2451_v50  ;;  %v2596_v19 = vadd.f32 %v6851_v4, %v2430_v43  ;;  %v5661_v50 = vpop.f32.mrf.mxu1 }
 0x4d6   : > { %v5635_v21 = vpop.f32.mrf.mxu0 }
 0x4d7   : > { %5988 = vpow2.f32 %v5236_v16  ;;  %v2599_v17 = vadd.f32 %v2548_v38, %v2443_v46  ;;  %v2454_v0 = vadd.f32 %v5635_v21, %v5617_v32  ;;  %v6875_v36 = vadd.f32 %v6864_v53, %v2601_v33  ;;  %v2583_v24 = vpop.f32.mrf.mxu1 }
 0x4d8   : > { %v2445_v37 = vpop.f32.mrf.mxu0  ;;  %v6908_v2 = vadd.f32 %v6864_v53, %v2596_v19 }
 0x4d9   : > { %v6878_v54 = vadd.f32 %v6864_v53, %v2599_v17  ;;  %v2602_v48 = vadd.f32 %v5653_v59, %v2454_v0  ;;  %v2446_v22 = vadd.f32 %v2445_v37, %v2342_v8  ;;  %v5239_v28 = vmul.f32 -1.442695, %v6875_v36 }
 0x4da   : > { %v5638_v25 = vpop.f32.mrf.mxu0  ;;  %v5234_v21 = vmul.f32 -1.442695, %v6908_v2 }
 0x4db   : > { %v5237_v23 = vmul.f32 -1.442695, %v6878_v54  ;;  %v6883_v20 = vadd.f32 %v6864_v53, %v2602_v48  ;;  %v2600_v5 = vadd.f32 %v2551_v47, %v2446_v22  ;;  %v2467_v29 = vadd.f32 %v5638_v25, %v5620_v7 }
 0x4dc   : > { %5990 = vpow2.f32 %v5239_v28  ;;  %v2458_v45 = vpop.f32.mrf.mxu0 }
 0x4dd   : > { %5992 = vpow2.f32 %v5237_v23  ;;  %v5240_v42 = vmul.f32 -1.442695, %v6883_v20  ;;  %v6887_v27 = vadd.f32 %v6864_v53, %v2600_v5  ;;  %v2605_v9 = vadd.f32 %v5656_v13, %v2467_v29 }
 0x4de   : > { %v2459_v58 = vadd.f32 %v2458_v45, %v2355_v35  ;;  %v5639_v26 = vpop.f32.mrf.mxu0 }
 0x4df   : > { %v5238_v32 = vmul.f32 -1.442695, %v6887_v27  ;;  %v6892_v8 = vadd.f32 %v6864_v53, %v2605_v9  ;;  %v2470_v62 = vadd.f32 %v5639_v26, %v5621_v39  ;;  %5994 = vpow2.f32 %v5240_v42 }
 0x4e0   : > { %v5987_v7 = vpop.eup %5986  ;;  %v2603_v38 = vadd.f32 %v2564_v52, %v2459_v58  ;;  %v2461_v59 = vpop.f32.mrf.mxu0  ;;  %v6901_v39 = vadd.f32 %v6864_v53, %v2595_v31 }
 0x4e1   : > { %v2684_v47 = vadd.f32 1.0, %v5987_v7  ;;  %5996 = vpow2.f32 %v5238_v32  ;;  %v5243_v49 = vmul.f32 -1.442695, %v6892_v8  ;;  %v2606_v35 = vadd.f32 %v5657_v15, %v2470_v62 }
 0x4e2   : > { %v6897_v63 = vadd.f32 %v6864_v53, %v2603_v38  ;;  %v2462_v3 = vadd.f32 %v2461_v59, %v6853_v34  ;;  %v5642_v55 = vpop.f32.mrf.mxu0  ;;  %v5233_v46 = vmul.f32 -1.442695, %v6901_v39 }
 0x4e3   : > { %5998 = vrcp.f32 %v2684_v47  ;;  %v6904_v4 = vadd.f32 %v6864_v53, %v2606_v35  ;;  %v2483_v13 = vadd.f32 %v5642_v55, %v6855_v18 }
 0x4e4   : > { %v5989_v56 = vpop.eup %5988  ;;  %v5241_v10 = vmul.f32 -1.442695, %v6897_v63  ;;  %v2604_v57 = vadd.f32 %v2567_v44, %v2462_v3  ;;  %v2474_v1 = vpop.f32.mrf.mxu0  ;;  %6000 = vpow2.f32 %v5243_v49 }
 0x4e5   : > { %v2685_v52 = vadd.f32 1.0, %v5989_v56  ;;  %v5244_v34 = vmul.f32 -1.442695, %v6904_v4  ;;  %v2609_v11 = vadd.f32 %v5660_v30, %v2483_v13  ;;  %v2475_v18 = vadd.f32 %v2474_v1, %v6857_v6 }
 0x4e6   : > { %6002 = vpow2.f32 %v5241_v10  ;;  %v6913_v14 = vadd.f32 %v6864_v53, %v2604_v57  ;;  %v5643_v16 = vpop.f32.mrf.mxu0 }
 0x4e7   : > { %6004 = vrcp.f32 %v2685_v52  ;;  %v6918_v15 = vadd.f32 %v6864_v53, %v2609_v11  ;;  %v2486_v33 = vadd.f32 %v5643_v16, %v6859_v60  ;;  %v2607_v0 = vadd.f32 %v2580_v51, %v2475_v18 }
 0x4e8   : > { %v5242_v17 = vmul.f32 -1.442695, %v6913_v14  ;;  %v2477_v37 = vpop.f32.mrf.mxu0  ;;  %6006 = vpow2.f32 %v5244_v34 }
 0x4e9   : > { %v5991_v48 = vpop.eup %5990  ;;  %v2610_v22 = vadd.f32 %v5661_v50, %v2486_v33  ;;  %v2478_v6 = vadd.f32 %v2477_v37, %v6861_v41  ;;  %v6925_v28 = vadd.f32 %v6864_v53, %v2607_v0  ;;  %v5247_v60 = vmul.f32 -1.442695, %v6918_v15 }
 0x4ea   : > { %v5993_v44 = vpop.eup %5992  ;;  %6008 = vpow2.f32 %v5242_v17  ;;  %v2688_v5 = vadd.f32 1.0, %v5991_v48 }
 0x4eb   : > { %6010 = vpow2.f32 %v5233_v46  ;;  %v2686_v25 = vadd.f32 1.0, %v5993_v44  ;;  %v2608_v23 = vadd.f32 %v2583_v24, %v2478_v6  ;;  %v5245_v29 = vmul.f32 -1.442695, %v6925_v28 }
 0x4ec   : > { %6012 = vpow2.f32 %v5234_v21  ;;  %v5995_v43 = vpop.eup %5994  ;;  %v6930_v45 = vadd.f32 %v6864_v53, %v2610_v22 }
 0x4ed   : > { %6014 = vrcp.f32 %v2686_v25  ;;  %v6933_v41 = vadd.f32 %v6864_v53, %v2608_v23  ;;  %v2689_v26 = vadd.f32 1.0, %v5995_v43 }
 0x4ee   : > { %v5997_v42 = vpop.eup %5996  ;;  %6016 = vpow2.f32 %v5245_v29  ;;  %v5248_v31 = vmul.f32 -1.442695, %v6930_v45 }
 0x4ef   : > { %v2687_v9 = vadd.f32 1.0, %v5997_v42  ;;  %6018 = vpow2.f32 %v5247_v60  ;;  %v5246_v30 = vmul.f32 -1.442695, %v6933_v41 }
 0x4f0   : > { %v5999_v58 = vpop.eup %5998  ;;  %6020 = vrcp.f32 %v2688_v5 }
 0x4f1   : > { %6022 = vrcp.f32 %v2687_v9  ;;  %2750 = vrot.lane.b32.xlu0 %v5999_v58, %s6204_s18  ;;  %v6001_v32 = vpop.eup %6000 }
 0x4f2   : > { %6024 = vpow2.f32 %v5246_v30  ;;  %v2692_v19 = vadd.f32 1.0, %v6001_v32 }
 0x4f3   : > { %v6003_v62 = vpop.eup %6002  ;;  %6026 = vrcp.f32 %v2689_v26 }
 0x4f4   : > { %v6005_v7 = vpop.eup %6004  ;;  %v2690_v53 = vadd.f32 1.0, %v6003_v62  ;;  %6028 = vpow2.f32 %v5248_v31 }
 0x4f5   : > { %2752 = vrot.lane.b32.xlu1 %v6005_v7, %s6204_s18  ;;  %v6007_v38 = vpop.eup %6006 }
 0x4f6   : > { %6030 = vrcp.f32 %v2690_v53  ;;  %v2693_v51 = vadd.f32 1.0, %v6007_v38 }
 0x4f7   : > { %v6009_v59 = vpop.eup %6008  ;;  %6032 = vrcp.f32 %v2692_v19 }
 0x4f8   : > { %v6011_v47 = vpop.eup %6010  ;;  %v2691_v49 = vadd.f32 1.0, %v6009_v59 }
 0x4f9   : > { %v6013_v35 = vpop.eup %6012  ;;  %v2682_v57 = vadd.f32 1.0, %v6011_v47 }
 0x4fa   : > { %v6015_v3 = vpop.eup %6014  ;;  %6034 = vrcp.f32 %v2691_v49  ;;  %v2683_v50 = vadd.f32 1.0, %v6013_v35 }
 0x4fb   : > { %v6017_v55 = vpop.eup %6016  ;;  %2754 = vrot.lane.b32.xlu0 %v6015_v3, %s6204_s18  ;;  %6036 = vrcp.f32 %v2693_v51 }
 0x4fc   : > { %v6019_v13 = vpop.eup %6018  ;;  %v2694_v56 = vadd.f32 1.0, %v6017_v55 }
 0x4fd   : > { %v6021_v10 = vpop.eup %6020  ;;  %v2696_v16 = vadd.f32 1.0, %v6019_v13 }
 0x4fe   : > { %v6023_v1 = vpop.eup %6022  ;;  %6038 = vrcp.f32 %v2694_v56 }
 0x4ff   : > { %v6025_v52 = vpop.eup %6024  ;;  %2756 = vrot.lane.b32.xlu1 %v6023_v1, %s6204_s18  ;;  %2758 = vrot.lane.b32.xlu0 %v6021_v10, %s6204_s18  ;;  %6040 = vrcp.f32 %v2682_v57 }
 0x500   : > { %v2695_v34 = vadd.f32 1.0, %v6025_v52  ;;  %v6027_v11 = vpop.eup %6026 }
 0x501   : > { %v6029_v18 = vpop.eup %6028 }
 0x502   : > { %6042 = vrcp.f32 %v2695_v34  ;;  %v2697_v21 = vadd.f32 1.0, %v6029_v18 }
 0x503   : > { %v6031_v46 = vpop.eup %6030  ;;  %2760 = vrot.lane.b32.xlu1 %v6027_v11, %s6204_s18  ;;  %6044 = vrcp.f32 %v2683_v50 }
 0x504   : > { %2762 = vrot.lane.b32.xlu0 %v6031_v46, %s6204_s18  ;;  %v6033_v33 = vpop.eup %6032  ;;  %6046 = vrcp.f32 %v2696_v16 }
 0x505   : > { %6048 = vrcp.f32 %v2697_v21 }
 0x507   : > { %v6035_v17 = vpop.eup %6034 }
 0x508   : > { %2764 = vrot.lane.b32.xlu1 %v6035_v17, %s6204_s18  ;;  %2766 = vrot.lane.b32.xlu0 %v6033_v33, %s6204_s18  ;;  %v6037_v0 = vpop.eup %6036 }
 0x50b   : > { %v6039_v37 = vpop.eup %6038 }
 0x50c   : > { %2768 = vrot.lane.b32.xlu1 %v6037_v0, %s6204_s18  ;;  %2770 = vrot.lane.b32.xlu0 %v6039_v37, %s6204_s18  ;;  %v6041_v48 = vpop.eup %6040 }
 0x50f   : > { %v6043_v22 = vpop.eup %6042 }
 0x510   : > { %2772 = vrot.lane.b32.xlu1 %v6043_v22, %s6204_s18  ;;  %2746 = vrot.lane.b32.xlu0 %v6041_v48, %s6204_s18  ;;  %v6045_v6 = vpop.eup %6044 }
 0x511   : > { %v6047_v44 = vpop.eup %6046 }
 0x512   : > { %v6049_v24 = vpop.eup %6048 }
 0x514   : > { %2748 = vrot.lane.b32.xlu1 %v6045_v6, %s6204_s18  ;;  %2774 = vrot.lane.b32.xlu0 %v6047_v44, %s6204_s18 }
 0x518   : > { %2776 = vrot.lane.b32.xlu1 %v6049_v24, %s6204_s18 }
 0x563   : > { %v2751_v25 = vpop.permute.xlu0 %2750 }
 0x564   : > { %v6954_v60 = vmul.f32 %v2751_v25, %v6867_v61 }
 0x566   : > { %v2816_v23 = vsel %vm1470_vm0, %v6954_v60, 0.0 }
 0x567   : > { %v2753_v5 = vpop.permute.xlu1 %2752  ;;  %2817 = vadd.xlane.f32.xlu0 %v2816_v23 }
 0x568   : > { %v6959_v29 = vmul.f32 %v2753_v5, %v6871_v12 }
 0x56a   : > { %v2819_v43 = vsel %vm1470_vm0, %v6959_v29, 0.0 }
 0x56b   : > { %2820 = vadd.xlane.f32.xlu1 %v2819_v43 }
 0x56d   : > { %v2755_v42 = vpop.permute.xlu0 %2754 }
 0x56e   : > { %v6964_v9 = vmul.f32 %v2755_v42, %v6878_v54 }
 0x570   : > { %v2822_v61 = vsel %vm1470_vm0, %v6964_v9, 0.0 }
 0x571   : > { %v2757_v30 = vpop.permute.xlu1 %2756  ;;  %v2759_v58 = vpop.permute.xlu0 %2758  ;;  %2823 = vadd.xlane.f32.xlu0 %v2822_v61 }
 0x572   : > { %v6969_v26 = vmul.f32 %v2757_v30, %v6887_v27  ;;  %v6972_v12 = vmul.f32 %v2759_v58, %v6875_v36 }
 0x574   : > { %v2828_v31 = vsel %vm1470_vm0, %v6972_v12, 0.0  ;;  %v2825_v32 = vsel %vm1470_vm0, %v6969_v26, 0.0 }
 0x575   : > { %v2761_v54 = vpop.permute.xlu1 %2760  ;;  %2829 = vadd.xlane.f32.xlu1 %v2828_v31  ;;  %2826 = vadd.xlane.f32.xlu0 %v2825_v32 }
 0x576   : > { %v6979_v62 = vmul.f32 %v2761_v54, %v6883_v20  ;;  %v2763_v7 = vpop.permute.xlu0 %2762 }
 0x577   : > { %v6982_v53 = vmul.f32 %v2763_v7, %v6897_v63 }
 0x578   : > { %v2831_v36 = vsel %vm1470_vm0, %v6979_v62, 0.0 }
 0x579   : > { %v2834_v27 = vsel %vm1470_vm0, %v6982_v53, 0.0  ;;  %2832 = vadd.xlane.f32.xlu0 %v2831_v36 }
 0x57a   : > { %v2765_v19 = vpop.permute.xlu1 %2764  ;;  %v2767_v38 = vpop.permute.xlu0 %2766  ;;  %2835 = vadd.xlane.f32.xlu1 %v2834_v27 }
 0x57b   : > { %v6989_v59 = vmul.f32 %v2765_v19, %v6913_v14  ;;  %v6992_v20 = vmul.f32 %v2767_v38, %v6892_v8 }
 0x57d   : > { %v2840_v63 = vsel %vm1470_vm0, %v6992_v20, 0.0  ;;  %v2837_v47 = vsel %vm1470_vm0, %v6989_v59, 0.0 }
 0x57e   : > { %v2769_v49 = vpop.permute.xlu1 %2768  ;;  %v2771_v35 = vpop.permute.xlu0 %2770  ;;  %2841 = vadd.xlane.f32.xlu1 %v2840_v63  ;;  %2838 = vadd.xlane.f32.xlu0 %v2837_v47 }
 0x57f   : > { %v6999_v51 = vmul.f32 %v2769_v49, %v6904_v4  ;;  %v7002_v3 = vmul.f32 %v2771_v35, %v6925_v28 }
 0x581   : > { %v2846_v8 = vsel %vm1470_vm0, %v7002_v3, 0.0  ;;  %v2843_v14 = vsel %vm1470_vm0, %v6999_v51, 0.0 }
 0x582   : > { %v2773_v55 = vpop.permute.xlu1 %2772  ;;  %2847 = vadd.xlane.f32.xlu1 %v2846_v8  ;;  %2844 = vadd.xlane.f32.xlu0 %v2843_v14  ;;  %v2747_v13 = vpop.permute.xlu0 %2746 }
 0x583   : > { %v7009_v56 = vmul.f32 %v2773_v55, %v6933_v41  ;;  %v7012_v10 = vmul.f32 %v2747_v13, %v6901_v39 }
 0x585   : > { %v2849_v4 = vsel %vm1470_vm0, %v7009_v56, 0.0  ;;  %v2810_v28 = vsel %vm1470_vm0, %v7012_v10, 0.0 }
 0x586   : > { %v2749_v57 = vpop.permute.xlu1 %2748  ;;  %2850 = vadd.xlane.f32.xlu0 %v2849_v4  ;;  %2811 = vadd.xlane.f32.xlu1 %v2810_v28  ;;  %v2775_v1 = vpop.permute.xlu0 %2774 }
 0x587   : > { %v7019_v52 = vmul.f32 %v2749_v57, %v6908_v2  ;;  %v7022_v34 = vmul.f32 %v2775_v1, %v6918_v15 }
 0x589   : > { %v2813_v39 = vsel %vm1470_vm0, %v7019_v52, 0.0  ;;  %v2852_v41 = vsel %vm1470_vm0, %v7022_v34, 0.0 }
 0x58a   : > { %v2777_v11 = vpop.permute.xlu1 %2776  ;;  %2814 = vadd.xlane.f32.xlu0 %v2813_v39  ;;  %2853 = vadd.xlane.f32.xlu1 %v2852_v41 }
 0x58b   : > { %v7029_v50 = vmul.f32 %v2777_v11, %v6930_v45 }
 0x58d   : > { %v2855_v18 = vsel %vm1470_vm0, %v7029_v50, 0.0 }
 0x58e   : > { %2856 = vadd.xlane.f32.xlu0 %v2855_v18 }
 0x5f0   : > { %v2818_v2 = vpop.xlane.xlu0 %2817 }
 0x5f4   : > { %v2821_v16 = vpop.xlane.xlu1 %2820 }
 0x5f5   : > { %v2865_v15 = vadd.f32 %v2821_v16, %v2818_v2 }
 0x5f7   : > { %v2866_v46 = vrot.slane %v2865_v15, 4 }
 0x5f9   : > { %v2867_v33 = vadd.f32 %v2866_v46, %v2865_v15 }
 0x5fa   : > { %v2824_v21 = vpop.xlane.xlu0 %2823 }
 0x5fb   : > { %v2868_v17 = vrot.slane %v2867_v33, 2 }
 0x5fd   : > { %v2869_v0 = vadd.f32 %v2868_v17, %v2867_v33 }
 0x5fe   : > { %v2830_v37 = vpop.xlane.xlu1 %2829  ;;  %v2827_v48 = vpop.xlane.xlu0 %2826 }
 0x5ff   : > { %v2870_v22 = vrot.slane %v2869_v0, 1  ;;  %v2872_v6 = vadd.f32 %v2827_v48, %v2824_v21 }
 0x601   : > { %v2871_v44 = vadd.f32 %v2870_v22, %v2869_v0  ;;  %v2873_v24 = vrot.slane %v2872_v6, 4 }
 0x602   : > { %v2833_v45 = vpop.xlane.xlu0 %2832 }
 0x603   : > { %v2874_v25 = vadd.f32 %v2873_v24, %v2872_v6  ;;  %v2836_v23 = vpop.xlane.xlu1 %2835  ;;  %v2879_v5 = vadd.f32 %v2833_v45, %v2830_v37  ;;  %v2916_v43 = vmul.f32 0.00390625, %v2871_v44 }
 0x605   : > { %v2875_v42 = vrot.slane %v2874_v25, 2  ;;  %v2880_v61 = vrot.slane %v2879_v5, 4  ;;  %v7034_v30 = vsub.f32 %v6959_v29, %v2916_v43  ;;  %v7037_v58 = vsub.f32 %v6954_v60, %v2916_v43 }
 0x607   : > { %v2876_v31 = vadd.f32 %v2875_v42, %v2874_v25  ;;  %v2881_v32 = vadd.f32 %v2880_v61, %v2879_v5  ;;  %v2842_v54 = vpop.xlane.xlu1 %2841  ;;  %v2839_v7 = vpop.xlane.xlu0 %2838  ;;  %v2942_v36 = vmul.f32 %v7034_v30, %v7034_v30  ;;  %v2941_v27 = vmul.f32 %v7037_v58, %v7037_v58 }
 0x608   : > { %v2886_v19 = vadd.f32 %v2839_v7, %v2836_v23 }
 0x609   : > { %v2877_v38 = vrot.slane %v2876_v31, 1  ;;  %v2882_v63 = vrot.slane %v2881_v32, 2  ;;  %v2964_v47 = vsel %vm1470_vm0, %v2942_v36, 0.0  ;;  %v2961_v29 = vsel %vm1470_vm0, %v2941_v27, 0.0 }
 0x60a   : > { %v2887_v49 = vrot.slane %v2886_v19, 4  ;;  %2965 = vadd.xlane.f32.xlu0 %v2964_v47  ;;  %2962 = vadd.xlane.f32.xlu1 %v2961_v29 }
 0x60b   : > { %v2878_v60 = vadd.f32 %v2877_v38, %v2876_v31  ;;  %v2883_v35 = vadd.f32 %v2882_v63, %v2881_v32  ;;  %v2848_v8 = vpop.xlane.xlu1 %2847  ;;  %v2845_v14 = vpop.xlane.xlu0 %2844 }
 0x60c   : > { %v2888_v55 = vadd.f32 %v2887_v49, %v2886_v19  ;;  %v2893_v13 = vadd.f32 %v2845_v14, %v2842_v54 }
 0x60d   : > { %v2884_v4 = vrot.slane %v2883_v35, 1  ;;  %v2917_v28 = vmul.f32 0.00390625, %v2878_v60 }
 0x60e   : > { %v2889_v57 = vrot.slane %v2888_v55, 2  ;;  %v2894_v1 = vrot.slane %v2893_v13, 4 }
 0x60f   : > { %v2885_v39 = vadd.f32 %v2884_v4, %v2883_v35  ;;  %v2851_v41 = vpop.xlane.xlu0 %2850  ;;  %v7046_v11 = vsub.f32 %v6969_v26, %v2917_v28  ;;  %v7049_v18 = vsub.f32 %v6964_v9, %v2917_v28  ;;  %v2812_v46 = vpop.xlane.xlu1 %2811 }
 0x610   : > { %v2890_v2 = vadd.f32 %v2889_v57, %v2888_v55  ;;  %v2895_v16 = vadd.f32 %v2894_v1, %v2893_v13  ;;  %v2900_v15 = vadd.f32 %v2851_v41, %v2848_v8 }
 0x611   : > { %v2944_v33 = vmul.f32 %v7046_v11, %v7046_v11  ;;  %v2943_v21 = vmul.f32 %v7049_v18, %v7049_v18  ;;  %v2918_v17 = vmul.f32 0.00390625, %v2885_v39 }
 0x612   : > { %v2891_v0 = vrot.slane %v2890_v2, 1  ;;  %v2896_v37 = vrot.slane %v2895_v16, 2  ;;  %v2901_v48 = vrot.slane %v2900_v15, 4 }
 0x613   : > { %v2815_v22 = vpop.xlane.xlu0 %2814  ;;  %v2970_v26 = vsel %vm1470_vm0, %v2944_v33, 0.0  ;;  %v2967_v9 = vsel %vm1470_vm0, %v2943_v21, 0.0  ;;  %v7058_v6 = vsub.f32 %v6979_v62, %v2918_v17  ;;  %v7061_v44 = vsub.f32 %v6972_v12, %v2918_v17  ;;  %v2854_v32 = vpop.xlane.xlu1 %2853 }
 0x614   : > { %v2892_v24 = vadd.f32 %v2891_v0, %v2890_v2  ;;  %v2897_v45 = vadd.f32 %v2896_v37, %v2895_v16  ;;  %v2902_v25 = vadd.f32 %v2901_v48, %v2900_v15  ;;  %v2858_v23 = vadd.f32 %v2815_v22, %v2812_v46  ;;  %2971 = vadd.xlane.f32.xlu0 %v2970_v26 }
 0x615   : > { %2968 = vadd.xlane.f32.xlu1 %v2967_v9  ;;  %v2946_v5 = vmul.f32 %v7058_v6, %v7058_v6  ;;  %v2945_v43 = vmul.f32 %v7061_v44, %v7061_v44 }
 0x616   : > { %v2898_v42 = vrot.slane %v2897_v45, 1  ;;  %v2903_v61 = vrot.slane %v2902_v25, 2  ;;  %v2859_v31 = vrot.slane %v2858_v23, 4  ;;  %v2919_v62 = vmul.f32 0.00390625, %v2892_v24 }
 0x617   : > { %v2857_v54 = vpop.xlane.xlu0 %2856  ;;  %v2976_v12 = vsel %vm1470_vm0, %v2946_v5, 0.0  ;;  %v2973_v7 = vsel %vm1470_vm0, %v2945_v43, 0.0 }
 0x618   : > { %v2899_v36 = vadd.f32 %v2898_v42, %v2897_v45  ;;  %v2904_v27 = vadd.f32 %v2903_v61, %v2902_v25  ;;  %v2860_v19 = vadd.f32 %v2859_v31, %v2858_v23  ;;  %v2907_v38 = vadd.f32 %v2857_v54, %v2854_v32  ;;  %2977 = vadd.xlane.f32.xlu0 %v2976_v12 }
 0x619   : > { %2974 = vadd.xlane.f32.xlu1 %v2973_v7  ;;  %v7070_v63 = vsub.f32 %v6989_v59, %v2919_v62  ;;  %v7073_v47 = vsub.f32 %v6982_v53, %v2919_v62  ;;  %v5895_v62 = vld [vmem:[%s6276_s30] sm:$0xff]  }
 0x61a   : > { %v2905_v29 = vrot.slane %v2904_v27, 1  ;;  %v2861_v49 = vrot.slane %v2860_v19, 2  ;;  %v2908_v60 = vrot.slane %v2907_v38, 4  ;;  %v2920_v35 = vmul.f32 0.00390625, %v2899_v36  ;;  %5676 = vmatprep.subr.bf16.mxu1 %v5895_v62 }
 0x61b   : > { %v2948_v8 = vmul.f32 %v7070_v63, %v7070_v63  ;;  %v2947_v14 = vmul.f32 %v7073_v47, %v7073_v47  ;;  %5677 = vmatpush3.bf16.msra.mxu1 %v5895_v62 }
 0x61c   : > { %v2906_v55 = vadd.f32 %v2905_v29, %v2904_v27  ;;  %v2862_v13 = vadd.f32 %v2861_v49, %v2860_v19  ;;  %v2909_v4 = vadd.f32 %v2908_v60, %v2907_v38  ;;  %v7080_v28 = vsub.f32 %v6999_v51, %v2920_v35 }
 0x61d   : > { %v2982_v59 = vsel %vm1470_vm0, %v2948_v8, 0.0  ;;  %v2979_v53 = vsel %vm1470_vm0, %v2947_v14, 0.0  ;;  %v7085_v57 = vsub.f32 %v6992_v20, %v2920_v35 }
 0x61e   : > { %v2863_v1 = vrot.slane %v2862_v13, 1  ;;  %v2910_v39 = vrot.slane %v2909_v4, 2  ;;  %2983 = vadd.xlane.f32.xlu0 %v2982_v59  ;;  %2980 = vadd.xlane.f32.xlu1 %v2979_v53  ;;  %v2950_v41 = vmul.f32 %v7080_v28, %v7080_v28  ;;  %v2921_v2 = vmul.f32 0.00390625, %v2906_v55 }
 0x61f   : > { %v2949_v16 = vmul.f32 %v7085_v57, %v7085_v57 }
 0x620   : > { %v2864_v51 = vadd.f32 %v2863_v1, %v2862_v13  ;;  %v2911_v15 = vadd.f32 %v2910_v39, %v2909_v4  ;;  %v2988_v46 = vsel %vm1470_vm0, %v2950_v41, 0.0  ;;  %v7093_v33 = vsub.f32 %v7009_v56, %v2921_v2 }
 0x621   : > { %v2985_v20 = vsel %vm1470_vm0, %v2949_v16, 0.0  ;;  %v7097_v21 = vsub.f32 %v7002_v3, %v2921_v2 }
 0x622   : > { %v2912_v17 = vrot.slane %v2911_v15, 1  ;;  %2989 = vadd.xlane.f32.xlu0 %v2988_v46  ;;  %2986 = vadd.xlane.f32.xlu1 %v2985_v20  ;;  %v2952_v0 = vmul.f32 %v7093_v33, %v7093_v33  ;;  %v2915_v37 = vmul.f32 0.00390625, %v2864_v51 }
 0x623   : > { %v2951_v48 = vmul.f32 %v7097_v21, %v7097_v21 }
 0x624   : > { %v2913_v22 = vadd.f32 %v2912_v17, %v2911_v15  ;;  %v2994_v26 = vsel %vm1470_vm0, %v2952_v0, 0.0  ;;  %v7105_v56 = vsub.f32 %v7019_v52, %v2915_v37  ;;  %v7108_v9 = vsub.f32 %v7012_v10, %v2915_v37 }
 0x625   : > { %v2991_v3 = vsel %vm1470_vm0, %v2951_v48, 0.0 }
 0x626   : > { %2995 = vadd.xlane.f32.xlu0 %v2994_v26  ;;  %2992 = vadd.xlane.f32.xlu1 %v2991_v3  ;;  %v2940_v24 = vmul.f32 %v7105_v56, %v7105_v56  ;;  %v2939_v45 = vmul.f32 %v7108_v9, %v7108_v9  ;;  %v2922_v25 = vmul.f32 0.00390625, %v2913_v22 }
 0x628   : > { %v2958_v23 = vsel %vm1470_vm0, %v2940_v24, 0.0  ;;  %v2955_v52 = vsel %vm1470_vm0, %v2939_v45, 0.0  ;;  %v7118_v10 = vsub.f32 %v7029_v50, %v2922_v25  ;;  %v7121_v5 = vsub.f32 %v7022_v34, %v2922_v25  ;;  %v5894_v50 = vld [vmem:[%s6276_s30 + $0x8] sm:$0xff]   ;;  %v7132_v34 = vld [vmem:[%s6276_s30 + $0x10] sm:$0xff]  }
 0x629   : > { %5662 = vmatprep.subr.bf16.mxu0 %v5894_v50 }
 0x62a   : > { %2959 = vadd.xlane.f32.xlu0 %v2958_v23  ;;  %2956 = vadd.xlane.f32.xlu1 %v2955_v52  ;;  %v2954_v43 = vmul.f32 %v7118_v10, %v7118_v10  ;;  %v2953_v42 = vmul.f32 %v7121_v5, %v7121_v5 }
 0x62b   : > { %5663 = vmatpush3.bf16.msra.mxu0 %v5894_v50 }
 0x62c   : > { %v3000_v61 = vsel %vm1470_vm0, %v2954_v43, 0.0  ;;  %v2997_v31 = vsel %vm1470_vm0, %v2953_v42, 0.0  ;;  %5690 = vmatprep.subr.bf16.mxu0 %v7132_v34 }
 0x62e   : > { %3001 = vadd.xlane.f32.xlu0 %v3000_v61  ;;  %2998 = vadd.xlane.f32.xlu1 %v2997_v31 }
 0x693   : > { %v2963_v32 = vpop.xlane.xlu1 %2962  ;;  %v2966_v54 = vpop.xlane.xlu0 %2965 }
 0x694   : > { %v3010_v12 = vadd.f32 %v2966_v54, %v2963_v32 }
 0x696   : > { %v3011_v7 = vrot.slane %v3010_v12, 4 }
 0x698   : > { %v3012_v36 = vadd.f32 %v3011_v7, %v3010_v12 }
 0x69a   : > { %v3013_v27 = vrot.slane %v3012_v36, 2 }
 0x69c   : > { %v3014_v19 = vadd.f32 %v3013_v27, %v3012_v36 }
 0x69d   : > { %v2972_v38 = vpop.xlane.xlu0 %2971 }
 0x69e   : > { %v3015_v29 = vrot.slane %v3014_v19, 1  ;;  %v2969_v49 = vpop.xlane.xlu1 %2968 }
 0x69f   : > { %v3017_v60 = vadd.f32 %v2972_v38, %v2969_v49 }
 0x6a0   : > { %v3016_v35 = vadd.f32 %v3015_v29, %v3014_v19 }
 0x6a1   : > { %v3018_v8 = vrot.slane %v3017_v60, 4  ;;  %v2978_v14 = vpop.xlane.xlu0 %2977 }
 0x6a2   : > { %v3060_v55 = vmul.f32 0.00390625, %v3016_v35  ;;  %v2975_v13 = vpop.xlane.xlu1 %2974 }
 0x6a3   : > { %v3019_v4 = vadd.f32 %v3018_v8, %v3017_v60  ;;  %v3024_v59 = vadd.f32 %v2978_v14, %v2975_v13  ;;  %v7136_v8 = vld [vmem:[%s6266_s19] sm:$0xff]  ;;  %v7139_v14 = vld [vmem:[%s6266_s19 + $0x8] sm:$0xff] }
 0x6a4   : > { %v3068_v53 = vadd.f32 1e-12, %v3060_v55 }
 0x6a5   : > { %v3020_v1 = vrot.slane %v3019_v4, 2  ;;  %v3025_v39 = vrot.slane %v3024_v59, 4 }
 0x6a6   : > { %6050 = vrsqrt.f32 %v3068_v53 }
 0x6a7   : > { %v3021_v41 = vadd.f32 %v3020_v1, %v3019_v4  ;;  %v3026_v2 = vadd.f32 %v3025_v39, %v3024_v59  ;;  %v2981_v16 = vpop.xlane.xlu1 %2980  ;;  %v2984_v51 = vpop.xlane.xlu0 %2983  ;;  %v7144_v39 = vld [vmem:[%s6271_s24] sm:$0xff] }
 0x6a8   : > { %v3031_v15 = vadd.f32 %v2984_v51, %v2981_v16 }
 0x6a9   : > { %v3022_v46 = vrot.slane %v3021_v41, 1  ;;  %v3027_v20 = vrot.slane %v3026_v2, 2 }
 0x6aa   : > { %v3032_v17 = vrot.slane %v3031_v15, 4 }
 0x6ab   : > { %v3023_v0 = vadd.f32 %v3022_v46, %v3021_v41  ;;  %v3028_v37 = vadd.f32 %v3027_v20, %v3026_v2  ;;  %v2987_v48 = vpop.xlane.xlu1 %2986  ;;  %v2990_v22 = vpop.xlane.xlu0 %2989  ;;  %v7147_v41 = vld [vmem:[%s6271_s24 + $0x8] sm:$0xff] }
 0x6ac   : > { %v3033_v26 = vadd.f32 %v3032_v17, %v3031_v15  ;;  %v3038_v3 = vadd.f32 %v2990_v22, %v2987_v48 }
 0x6ad   : > { %v3061_v24 = vmul.f32 0.00390625, %v3023_v0  ;;  %v3029_v45 = vrot.slane %v3028_v37, 1 }
 0x6ae   : > { %v3034_v25 = vrot.slane %v3033_v26, 2  ;;  %v3039_v23 = vrot.slane %v3038_v3, 4 }
 0x6af   : > { %v3069_v52 = vadd.f32 1e-12, %v3061_v24  ;;  %v3030_v43 = vadd.f32 %v3029_v45, %v3028_v37  ;;  %v2993_v42 = vpop.xlane.xlu1 %2992  ;;  %v2996_v61 = vpop.xlane.xlu0 %2995 }
 0x6b0   : > { %v3035_v31 = vadd.f32 %v3034_v25, %v3033_v26  ;;  %v3040_v50 = vadd.f32 %v3039_v23, %v3038_v3  ;;  %v3045_v62 = vadd.f32 %v2996_v61, %v2993_v42 }
 0x6b1   : > { %6052 = vrsqrt.f32 %v3069_v52  ;;  %v3062_v32 = vmul.f32 0.00390625, %v3030_v43 }
 0x6b2   : > { %v3036_v54 = vrot.slane %v3035_v31, 1  ;;  %v3041_v12 = vrot.slane %v3040_v50, 2  ;;  %v3046_v7 = vrot.slane %v3045_v62, 4 }
 0x6b3   : > { %v6051_v36 = vpop.eup %6050  ;;  %v3070_v27 = vadd.f32 1e-12, %v3062_v32  ;;  %v2957_v19 = vpop.xlane.xlu1 %2956 }
 0x6b4   : > { %v2960_v38 = vpop.xlane.xlu0 %2959  ;;  %v3037_v29 = vadd.f32 %v3036_v54, %v3035_v31  ;;  %v3042_v49 = vadd.f32 %v3041_v12, %v3040_v50  ;;  %v3047_v60 = vadd.f32 %v3046_v7, %v3045_v62  ;;  %v3085_v55 = vmul.f32 %v6051_v36, %v7037_v58 }
 0x6b5   : > { %v3003_v35 = vadd.f32 %v2960_v38, %v2957_v19  ;;  %6054 = vrsqrt.f32 %v3070_v27  ;;  %v3086_v13 = vmul.f32 %v6051_v36, %v7034_v30 }
 0x6b6   : > { %v3063_v4 = vmul.f32 0.00390625, %v3037_v29  ;;  %v3043_v59 = vrot.slane %v3042_v49, 1  ;;  %v3048_v53 = vrot.slane %v3047_v60, 2  ;;  %v3103_v51 = vmul.f32 %v7136_v8, %v3085_v55 }
 0x6b7   : > { %v3004_v1 = vrot.slane %v3003_v35, 4  ;;  %v2999_v2 = vpop.xlane.xlu1 %2998  ;;  %v3104_v15 = vmul.f32 %v7139_v14, %v3086_v13 }
 0x6b8   : > { %v3002_v16 = vpop.xlane.xlu0 %3001  ;;  %v3071_v46 = vadd.f32 1e-12, %v3063_v4  ;;  %v3044_v20 = vadd.f32 %v3043_v59, %v3042_v49  ;;  %v3049_v17 = vadd.f32 %v3048_v53, %v3047_v60  ;;  %v3121_v30 = vadd.f32 %v7144_v39, %v3103_v51 }
 0x6b9   : > { %v3005_v58 = vadd.f32 %v3004_v1, %v3003_v35  ;;  %v3052_v0 = vadd.f32 %v3002_v16, %v2999_v2  ;;  %v3122_v37 = vadd.f32 %v7147_v41, %v3104_v15 }
 0x6ba   : > { %6056 = vrsqrt.f32 %v3071_v46  ;;  %v3064_v48 = vmul.f32 0.00390625, %v3044_v20  ;;  %v3050_v22 = vrot.slane %v3049_v17, 1 }
 0x6bb   : > { %v3006_v26 = vrot.slane %v3005_v58, 2  ;;  %v3053_v3 = vrot.slane %v3052_v0, 4  ;;  %v7153_v24 = vpack.c.bf16 %v3122_v37, %v3121_v30 }
 0x6bc   : > { %v3072_v45 = vadd.f32 1e-12, %v3064_v48  ;;  %v3051_v25 = vadd.f32 %v3050_v22, %v3049_v17 }
 0x6bd   : > { %v3007_v23 = vadd.f32 %v3006_v26, %v3005_v58  ;;  %v3054_v52 = vadd.f32 %v3053_v3, %v3052_v0  ;;  %5664 = vmatprep.mubr.msk.bf16.mxu0 %vm1470_vm0, %v7153_v24 }
 0x6be   : > { %v6053_v43 = vpop.eup %6052  ;;  %6058 = vrsqrt.f32 %v3072_v45  ;;  %v3065_v42 = vmul.f32 0.00390625, %v3051_v25 }
 0x6bf   : > { %v3008_v61 = vrot.slane %v3007_v23, 1  ;;  %v3087_v31 = vmul.f32 %v6053_v43, %v7049_v18  ;;  %v3088_v50 = vmul.f32 %v6053_v43, %v7046_v11  ;;  %v3055_v62 = vrot.slane %v3054_v52, 2 }
 0x6c0   : > { %v3073_v32 = vadd.f32 1e-12, %v3065_v42 }
 0x6c1   : > { %v3009_v54 = vadd.f32 %v3008_v61, %v3007_v23  ;;  %v3056_v12 = vadd.f32 %v3055_v62, %v3054_v52  ;;  %v3105_v7 = vmul.f32 %v7136_v8, %v3087_v31  ;;  %v3106_v36 = vmul.f32 %v7139_v14, %v3088_v50 }
 0x6c2   : > { %v6055_v27 = vpop.eup %6054  ;;  %6060 = vrsqrt.f32 %v3073_v32 }
 0x6c3   : > { %v3059_v19 = vmul.f32 0.00390625, %v3009_v54  ;;  %v3057_v38 = vrot.slane %v3056_v12, 1  ;;  %v3123_v29 = vadd.f32 %v7144_v39, %v3105_v7  ;;  %v3124_v49 = vadd.f32 %v7147_v41, %v3106_v36 }
 0x6c4   : > { %v3089_v18 = vmul.f32 %v6055_v27, %v7061_v44  ;;  %v3090_v11 = vmul.f32 %v6055_v27, %v7058_v6 }
 0x6c5   : > { %v3067_v60 = vadd.f32 1e-12, %v3059_v19  ;;  %v3139_v35 = vpack.c.bf16 %v3124_v49, %v3123_v29  ;;  %v3058_v13 = vadd.f32 %v3057_v38, %v3056_v12 }
 0x6c6   : > { %v3107_v55 = vmul.f32 %v7136_v8, %v3089_v18  ;;  %v3108_v4 = vmul.f32 %v7139_v14, %v3090_v11 }
 0x6c7   : > { %6062 = vrsqrt.f32 %v3067_v60  ;;  %v6057_v59 = vpop.eup %6056  ;;  %5665 = vmatmul.mubr.msk.bf16.vlgmr.msra.gmra.mxu0 %vm1470_vm0, %v3139_v35  ;;  %v3066_v6 = vmul.f32 0.00390625, %v3058_v13 }
 0x6c8   : > { %v3125_v53 = vadd.f32 %v7144_v39, %v3107_v55  ;;  %v3126_v1 = vadd.f32 %v7147_v41, %v3108_v4  ;;  %v3091_v2 = vmul.f32 %v6057_v59, %v7073_v47  ;;  %v3092_v44 = vmul.f32 %v6057_v59, %v7070_v63  ;;  %5691 = vmatpush3.bf16.msra.mxu0 %v7132_v34  ;;  %v7226_v4 = vld [vmem:[%s6281_s6] ss:$0 sm:$0xff] }
 0x6c9   : > { %5718 = vmatprep.subr.bf16.mxu0 %v6205_v40  ;;  %v3074_v34 = vadd.f32 1e-12, %v3066_v6 }
 0x6ca   : > { %v3140_v16 = vpack.c.bf16 %v3126_v1, %v3125_v53  ;;  %v3109_v51 = vmul.f32 %v7136_v8, %v3091_v2  ;;  %v3110_v15 = vmul.f32 %v7139_v14, %v3092_v44 }
 0x6cb   : > { %v6059_v46 = vpop.eup %6058  ;;  %6064 = vrsqrt.f32 %v3074_v34 }
 0x6cc   : > { %5668 = vmatprep.mubr.msk.bf16.mxu0 %vm1470_vm0, %v3140_v16  ;;  %v3127_v20 = vadd.f32 %v7144_v39, %v3109_v51  ;;  %v3128_v17 = vadd.f32 %v7147_v41, %v3110_v15  ;;  %v3093_v47 = vmul.f32 %v6059_v46, %v7085_v57  ;;  %v3094_v63 = vmul.f32 %v6059_v46, %v7080_v28 }
 0x6ce   : > { %v3141_v58 = vpack.c.bf16 %v3128_v17, %v3127_v20  ;;  %v3111_v0 = vmul.f32 %v7136_v8, %v3093_v47  ;;  %v3112_v30 = vmul.f32 %v7139_v14, %v3094_v63 }
 0x6cf   : > { %v6061_v37 = vpop.eup %6060 }
 0x6d0   : > { %5669 = vmatmul.mubr.msk.bf16.gmra.mxu0 %vm1470_vm0, %v3141_v58  ;;  %v3129_v48 = vadd.f32 %v7144_v39, %v3111_v0  ;;  %v3130_v22 = vadd.f32 %v7147_v41, %v3112_v30  ;;  %v3095_v26 = vmul.f32 %v6061_v37, %v7097_v21  ;;  %v3096_v3 = vmul.f32 %v6061_v37, %v7093_v33 }
 0x6d2   : > { %v3142_v57 = vpack.c.bf16 %v3130_v22, %v3129_v48  ;;  %v3113_v28 = vmul.f32 %v7136_v8, %v3095_v26  ;;  %v3114_v45 = vmul.f32 %v7139_v14, %v3096_v3 }
 0x6d4   : > { %v6063_v25 = vpop.eup %6062  ;;  %5672 = vmatprep.mubr.msk.bf16.mxu0 %vm1470_vm0, %v3142_v57  ;;  %v3131_v23 = vadd.f32 %v7144_v39, %v3113_v28  ;;  %v3132_v52 = vadd.f32 %v7147_v41, %v3114_v45 }
 0x6d5   : > { %v3083_v43 = vmul.f32 %v6063_v25, %v7108_v9  ;;  %v3084_v42 = vmul.f32 %v6063_v25, %v7105_v56 }
 0x6d6   : > { %v3146_v21 = vpack.c.bf16 %v3132_v52, %v3131_v23 }
 0x6d7   : > { %v3101_v33 = vmul.f32 %v7136_v8, %v3083_v43  ;;  %v3102_v61 = vmul.f32 %v7139_v14, %v3084_v42 }
 0x6d8   : > { %5673 = vmatmul.mubr.msk.bf16.gmra.mxu0 %vm1470_vm0, %v3146_v21  ;;  %v6065_v56 = vpop.eup %6064 }
 0x6d9   : > { %v3119_v31 = vadd.f32 %v7144_v39, %v3101_v33  ;;  %v3120_v50 = vadd.f32 %v7147_v41, %v3102_v61  ;;  %5692 = vmatprep.mubr.msk.bf16.mxu0 %vm1470_vm0, %v3139_v35  ;;  %v3097_v9 = vmul.f32 %v6065_v56, %v7121_v5  ;;  %v3098_v32 = vmul.f32 %v6065_v56, %v7118_v10 }
 0x6db   : > { %v3137_v62 = vpack.c.bf16 %v3120_v50, %v3119_v31  ;;  %v3115_v54 = vmul.f32 %v7136_v8, %v3097_v9  ;;  %v3116_v12 = vmul.f32 %v7139_v14, %v3098_v32 }
 0x6dd   : > { %5678 = vmatprep.mubr.msk.bf16.mxu1 %vm1470_vm0, %v3137_v62  ;;  %v3134_v7 = vadd.f32 %v7147_v41, %v3116_v12 }
 0x6de   : > { %5679 = vmatmul.mubr.msk.bf16.vlgmr.msra.gmra.mxu1 %vm1470_vm0, %v7153_v24  ;;  %v3133_v24 = vadd.f32 %v7144_v39, %v3115_v54 }
 0x6df   : > { %5682 = vmatprep.mubr.msk.bf16.mxu1 %vm1470_vm0, %v3139_v35 }
 0x6e0   : > { %5693 = vmatmul.mubr.msk.bf16.vlgmr.msra.gmra.mxu0 %vm1470_vm0, %v3140_v16  ;;  %v3345_v5 = vpack.c.bf16 %v3134_v7, %v3133_v24 }
 0x6e1   : > { %5696 = vmatprep.mubr.msk.bf16.mxu0 %vm1470_vm0, %v3141_v58 }
 0x6e6   : > { %5683 = vmatmul.mubr.msk.bf16.gmra.mxu1 %vm1470_vm0, %v3140_v16 }
 0x6e7   : > { %5686 = vmatprep.mubr.msk.bf16.mxu1 %vm1470_vm0, %v3141_v58 }
 0x6e8   : > { %5697 = vmatmul.mubr.msk.bf16.gmra.mxu0 %vm1470_vm0, %v3142_v57 }
 0x6e9   : > { %5700 = vmatprep.mubr.msk.bf16.mxu0 %vm1470_vm0, %v3146_v21 }
 0x6ee   : > { %5687 = vmatmul.mubr.msk.bf16.gmra.mxu1 %vm1470_vm0, %v3142_v57 }
 0x6f0   : > { %5701 = vmatmul.mubr.msk.bf16.gmra.mxu0 %vm1470_vm0, %v3345_v5 }
 0x6f1   : > { %5720 = vmatprep.mubr.msk.bf16.mxu0 %vm6206_vm1, %v6205_v40 }
 0x787   : > { %v5666_v10 = vpop.f32.mrf.mxu0 }
 0x789   : > { %v3205_v8 = vpop.f32.mrf.mxu0 }
 0x78b   : > { %v5667_v14 = vpop.f32.mrf.mxu0 }
 0x78d   : > { %v3208_v36 = vpop.f32.mrf.mxu0 }
 0x790   : > { %v5670_v27 = vpop.f32.mrf.mxu0 }
 0x792   : > { %v3221_v19 = vpop.f32.mrf.mxu0 }
 0x794   : > { %v5671_v38 = vpop.f32.mrf.mxu0 }
 0x796   : > { %v3224_v29 = vpop.f32.mrf.mxu0 }
 0x798   : > { %v5674_v39 = vpop.f32.mrf.mxu0 }
 0x79a   : > { %v3237_v49 = vpop.f32.mrf.mxu0 }
 0x79c   : > { %v7221_v41 = vpop.f32.mrf.mxu0 }
 0x79e   : > { %v5680_v18 = vpop.f32.mrf.mxu1  ;;  %v7223_v11 = vpop.f32.mrf.mxu0 }
 0x79f   : > { %v3304_v60 = vadd.f32 %v5680_v18, %v5666_v10 }
 0x7a0   : > { %v3295_v35 = vpop.f32.mrf.mxu1  ;;  %v5694_v13 = vpop.f32.mrf.mxu0 }
 0x7a1   : > { %v3296_v55 = vadd.f32 %v3295_v35, %v3205_v8  ;;  %v3438_v59 = vadd.f32 %v5694_v13, %v3304_v60 }
 0x7a2   : > { %v5681_v53 = vpop.f32.mrf.mxu1  ;;  %v3389_v2 = vpop.f32.mrf.mxu0 }
 0x7a3   : > { %v3307_v1 = vadd.f32 %v5681_v53, %v5667_v14  ;;  %v7229_v44 = vadd.f32 %v7226_v4, %v3438_v59  ;;  %v3436_v6 = vadd.f32 %v3389_v2, %v3296_v55 }
 0x7a4   : > { %v3298_v16 = vpop.f32.mrf.mxu1  ;;  %v5695_v15 = vpop.f32.mrf.mxu0 }
 0x7a5   : > { %v3299_v51 = vadd.f32 %v3298_v16, %v3208_v36  ;;  %v5277_v46 = vmul.f32 -1.442695, %v7229_v44  ;;  %v7233_v20 = vadd.f32 %v7226_v4, %v3436_v6  ;;  %v3439_v17 = vadd.f32 %v5695_v15, %v3307_v1 }
 0x7a6   : > { %v5684_v47 = vpop.f32.mrf.mxu1  ;;  %v3392_v34 = vpop.f32.mrf.mxu0 }
 0x7a7   : > { %v3320_v63 = vadd.f32 %v5684_v47, %v5670_v27  ;;  %6066 = vpow2.f32 %v5277_v46  ;;  %v5275_v58 = vmul.f32 -1.442695, %v7233_v20  ;;  %v7237_v0 = vadd.f32 %v7226_v4, %v3439_v17 }
 0x7a8   : > { %v3437_v30 = vadd.f32 %v3392_v34, %v3299_v51  ;;  %v3311_v37 = vpop.f32.mrf.mxu1  ;;  %v5698_v22 = vpop.f32.mrf.mxu0 }
 0x7a9   : > { %v3312_v48 = vadd.f32 %v3311_v37, %v3221_v19  ;;  %6068 = vpow2.f32 %v5275_v58  ;;  %v5278_v26 = vmul.f32 -1.442695, %v7237_v0  ;;  %v3442_v57 = vadd.f32 %v5698_v22, %v3320_v63 }
 0x7aa   : > { %v7241_v3 = vadd.f32 %v7226_v4, %v3437_v30  ;;  %v5685_v28 = vpop.f32.mrf.mxu1  ;;  %v3405_v25 = vpop.f32.mrf.mxu0 }
 0x7ab   : > { %v3323_v45 = vadd.f32 %v5685_v28, %v5671_v38  ;;  %v7245_v52 = vadd.f32 %v7226_v4, %v3442_v57  ;;  %v3440_v43 = vadd.f32 %v3405_v25, %v3312_v48  ;;  %6070 = vpow2.f32 %v5278_v26  ;;  %v5897_v57 = vld [vmem:[%s7602_s22] sm:$0xff]   ;;  %s7613_s22 = sld [smem:[#allocation13_spill]] }
 0x7ac   : > { %v5276_v23 = vmul.f32 -1.442695, %v7241_v3  ;;  %v3314_v42 = vpop.f32.mrf.mxu1  ;;  %v5699_v33 = vpop.f32.mrf.mxu0  ;;  %5704 = vmatprep.subr.bf16.mxu1 %v5897_v57 }
 0x7ad   : > { %v3315_v21 = vadd.f32 %v3314_v42, %v3224_v29  ;;  %v5281_v61 = vmul.f32 -1.442695, %v7245_v52  ;;  %v7249_v31 = vadd.f32 %v7226_v4, %v3440_v43  ;;  %v3443_v50 = vadd.f32 %v5699_v33, %v3323_v45  ;;  %5705 = vmatpush3.bf16.msra.mxu1 %v5897_v57 }
 0x7ae   : > { %6072 = vpow2.f32 %v5276_v23  ;;  %v5688_v62 = vpop.f32.mrf.mxu1  ;;  %v3408_v9 = vpop.f32.mrf.mxu0  ;;  %5724 = vmatprep.subr.bf16.mxu1 %v6205_v40 }
 0x7af   : > { %v3336_v56 = vadd.f32 %v5688_v62, %v5674_v39  ;;  %v5279_v32 = vmul.f32 -1.442695, %v7249_v31  ;;  %v7253_v54 = vadd.f32 %v7226_v4, %v3443_v50  ;;  %v3441_v12 = vadd.f32 %v3408_v9, %v3315_v21 }
 0x7b0   : > { %v3327_v24 = vpop.f32.mrf.mxu1  ;;  %6074 = vpow2.f32 %v5281_v61  ;;  %v5702_v5 = vpop.f32.mrf.mxu0 }
 0x7b1   : > { %v3328_v7 = vadd.f32 %v3327_v24, %v3237_v49  ;;  %6076 = vpow2.f32 %v5279_v32  ;;  %v5282_v10 = vmul.f32 -1.442695, %v7253_v54  ;;  %v7257_v8 = vadd.f32 %v7226_v4, %v3441_v12 }
 0x7b2   : > { %v3446_v14 = vadd.f32 %v5702_v5, %v3336_v56  ;;  %v5689_v36 = vpop.f32.mrf.mxu1  ;;  %v3421_v19 = vpop.f32.mrf.mxu0 }
 0x7b3   : > { %v3339_v27 = vadd.f32 %v5689_v36, %v7221_v41  ;;  %v5280_v38 = vmul.f32 -1.442695, %v7257_v8  ;;  %v3444_v39 = vadd.f32 %v3421_v19, %v3328_v7  ;;  %6078 = vpow2.f32 %v5282_v10 }
 0x7b4   : > { %v7262_v29 = vadd.f32 %v7226_v4, %v3446_v14  ;;  %v3330_v18 = vpop.f32.mrf.mxu1  ;;  %v6067_v49 = vpop.eup %6066 }
 0x7b5   : > { %v3331_v60 = vadd.f32 %v3330_v18, %v7223_v11  ;;  %v5703_v35 = vpop.f32.mrf.mxu0  ;;  %6080 = vpow2.f32 %v5280_v38  ;;  %v7267_v13 = vadd.f32 %v7226_v4, %v3444_v39  ;;  %v3505_v1 = vadd.f32 1.0, %v6067_v49 }
 0x7b6   : > { %v5285_v55 = vmul.f32 -1.442695, %v7262_v29  ;;  %v6069_v41 = vpop.eup %6068  ;;  %v3447_v59 = vadd.f32 %v5703_v35, %v3339_v27 }
 0x7b7   : > { %v3424_v53 = vpop.f32.mrf.mxu0  ;;  %v3503_v2 = vadd.f32 1.0, %v6069_v41  ;;  %v5283_v6 = vmul.f32 -1.442695, %v7267_v13 }
 0x7b8   : > { %v3445_v16 = vadd.f32 %v3424_v53, %v3331_v60  ;;  %6082 = vpow2.f32 %v5285_v55  ;;  %v7271_v51 = vadd.f32 %v7226_v4, %v3447_v59  ;;  %v6071_v11 = vpop.eup %6070 }
 0x7b9   : > { %6084 = vrcp.f32 %v3503_v2  ;;  %v3506_v34 = vadd.f32 1.0, %v6071_v11 }
 0x7ba   : > { %v7274_v15 = vadd.f32 %v7226_v4, %v3445_v16  ;;  %6086 = vpow2.f32 %v5283_v6  ;;  %v5286_v17 = vmul.f32 -1.442695, %v7271_v51 }
 0x7bb   : > { %v6073_v46 = vpop.eup %6072  ;;  %6088 = vrcp.f32 %v3505_v1 }
 0x7bc   : > { %v3504_v47 = vadd.f32 1.0, %v6073_v46  ;;  %v5284_v63 = vmul.f32 -1.442695, %v7274_v15  ;;  %6090 = vpow2.f32 %v5286_v17 }
 0x7bd   : > { %v6075_v58 = vpop.eup %6074 }
 0x7be   : > { %6092 = vrcp.f32 %v3504_v47  ;;  %v6077_v30 = vpop.eup %6076  ;;  %v3509_v48 = vadd.f32 1.0, %v6075_v58 }
 0x7bf   : > { %6094 = vpow2.f32 %v5284_v63  ;;  %v3507_v37 = vadd.f32 1.0, %v6077_v30  ;;  %v5287_v30 = vld [vmem:[%s7603_s23] ss:$0 sm:$0xff]  ;;  %s7614_s23 = sld [smem:[#allocation14_spill]] }
 0x7c0   : > { %6096 = vrcp.f32 %v3506_v34  ;;  %v6079_v4 = vpop.eup %6078 }
 0x7c1   : > { %6098 = vrcp.f32 %v3507_v37  ;;  %v3510_v45 = vadd.f32 1.0, %v6079_v4 }
 0x7c2   : > { %v6081_v22 = vpop.eup %6080  ;;  %6100 = vrcp.f32 %v3509_v48 }
 0x7c3   : > { %v3508_v26 = vadd.f32 1.0, %v6081_v22 }
 0x7c5   : > { %v6083_v28 = vpop.eup %6082  ;;  %6102 = vrcp.f32 %v3508_v26 }
 0x7c6   : > { %v6085_v25 = vpop.eup %6084  ;;  %6104 = vrcp.f32 %v3510_v45  ;;  %v3513_v33 = vadd.f32 1.0, %v6083_v28 }
 0x7c7   : > { %v6087_v23 = vpop.eup %6086  ;;  %3551 = vrot.lane.b32.xlu1 %v6085_v25, %s6204_s18  ;;  %v6164_v25 = vld [vmem:[%s6221_s9] sm:$0xff]  }
 0x7c8   : > { %v6089_v43 = vpop.eup %6088  ;;  %v3511_v42 = vadd.f32 1.0, %v6087_v23 }
 0x7c9   : > { %v6091_v21 = vpop.eup %6090 }
 0x7ca   : > { %6106 = vrcp.f32 %v3511_v42  ;;  %v3514_v32 = vadd.f32 1.0, %v6091_v21 }
 0x7cb   : > { %v6093_v61 = vpop.eup %6092  ;;  %3555 = vrot.lane.b32.xlu1 %v6089_v43, %s6204_s18  ;;  %6108 = vrcp.f32 %v3513_v33 }
 0x7cc   : > { %v6095_v50 = vpop.eup %6094  ;;  %3553 = vrot.lane.b32.xlu0 %v6093_v61, %s6204_s18 }
 0x7cd   : > { %v3512_v62 = vadd.f32 1.0, %v6095_v50  ;;  %v6097_v56 = vpop.eup %6096 }
 0x7ce   : > { %v6099_v9 = vpop.eup %6098 }
 0x7cf   : > { %6110 = vrcp.f32 %v3512_v62  ;;  %3557 = vrot.lane.b32.xlu1 %v6097_v56, %s6204_s18  ;;  %v6101_v12 = vpop.eup %6100 }
 0x7d0   : > { %3559 = vrot.lane.b32.xlu0 %v6099_v9, %s6204_s18  ;;  %6112 = vrcp.f32 %v3514_v32 }
 0x7d2   : > { %v6103_v24 = vpop.eup %6102 }
 0x7d3   : > { %3561 = vrot.lane.b32.xlu1 %v6103_v24, %s6204_s18  ;;  %v6105_v7 = vpop.eup %6104 }
 0x7d4   : > { %3563 = vrot.lane.b32.xlu0 %v6101_v12, %s6204_s18 }
 0x7d7   : > { %v6107_v5 = vpop.eup %6106  ;;  %3565 = vrot.lane.b32.xlu1 %v6105_v7, %s6204_s18 }
 0x7d8   : > { %3567 = vrot.lane.b32.xlu0 %v6107_v5, %s6204_s18  ;;  %v6109_v10 = vpop.eup %6108 }
 0x7dc   : > { %v6111_v14 = vpop.eup %6110  ;;  %3571 = vrot.lane.b32.xlu0 %v6109_v10, %s6204_s18 }
 0x7dd   : > { %3569 = vrot.lane.b32.xlu1 %v6111_v14, %s6204_s18  ;;  %v6113_v36 = vpop.eup %6112 }
 0x7e1   : > { %3573 = vrot.lane.b32.xlu1 %v6113_v36, %s6204_s18  ;;  %v3971_v36 = vld [vmem:[%s7604_s26] sm:$0xf]  ;;  %s5358_s26 = sshll.u32 %s7616_s16, 4 }
 0x839   : > { %v3552_v27 = vpop.permute.xlu1 %3551 }
 0x83a   : > { %v3587_v39 = vmul.f32 %v3552_v27, %v7233_v20  ;;  %v4004_v27 = vsel %vm2093_vm2, %v3971_v36, 0 }
 0x83d   : > { %v3556_v19 = vpop.permute.xlu1 %3555 }
 0x83e   : > { %v3554_v38 = vpop.permute.xlu0 %3553  ;;  %v3589_v55 = vmul.f32 %v3556_v19, %v7229_v44 }
 0x83f   : > { %v3588_v18 = vmul.f32 %v3554_v38, %v7241_v3 }
 0x841   : > { %v3601_v49 = vpack.c.bf16 %v3588_v18, %v3587_v39  ;;  %v3558_v60 = vpop.permute.xlu1 %3557 }
 0x842   : > { %v3560_v35 = vpop.permute.xlu0 %3559  ;;  %v3590_v41 = vmul.f32 %v3558_v60, %v7237_v0 }
 0x843   : > { %5706 = vmatprep.mubr.msk.bf16.mxu1 %vm1470_vm0, %v3601_v49  ;;  %v3591_v2 = vmul.f32 %v3560_v35, %v7249_v31 }
 0x844   : > { %v3602_v59 = vpack.c.bf16 %v3590_v41, %v3589_v55 }
 0x845   : > { %v3562_v53 = vpop.permute.xlu1 %3561 }
 0x846   : > { %v3564_v1 = vpop.permute.xlu0 %3563  ;;  %v3592_v6 = vmul.f32 %v3562_v53, %v7257_v8  ;;  %5707 = vmatmul.mubr.msk.bf16.vlgmr.msra.gmra.mxu1 %vm1470_vm0, %v3602_v59 }
 0x847   : > { %v3593_v16 = vmul.f32 %v3564_v1, %v7245_v52 }
 0x848   : > { %v3603_v20 = vpack.c.bf16 %v3592_v6, %v3591_v2 }
 0x849   : > { %v3566_v3 = vpop.permute.xlu1 %3565 }
 0x84a   : > { %v3594_v11 = vmul.f32 %v3566_v3, %v7253_v54  ;;  %v3568_v44 = vpop.permute.xlu0 %3567  ;;  %5710 = vmatprep.mubr.msk.bf16.mxu1 %vm1470_vm0, %v3603_v20 }
 0x84b   : > { %v3595_v31 = vmul.f32 %v3568_v44, %v7267_v13 }
 0x84c   : > { %v3604_v0 = vpack.c.bf16 %v3594_v11, %v3593_v16 }
 0x84e   : > { %5711 = vmatmul.mubr.msk.bf16.gmra.mxu1 %vm1470_vm0, %v3604_v0  ;;  %v3572_v17 = vpop.permute.xlu0 %3571 }
 0x84f   : > { %v3570_v46 = vpop.permute.xlu1 %3569  ;;  %v3597_v34 = vmul.f32 %v3572_v17, %v7262_v29 }
 0x850   : > { %v3596_v8 = vmul.f32 %v3570_v46, %v7274_v15 }
 0x852   : > { %v3605_v47 = vpack.c.bf16 %v3596_v8, %v3595_v31 }
 0x853   : > { %v3574_v63 = vpop.permute.xlu1 %3573 }
 0x854   : > { %v3598_v52 = vmul.f32 %v3574_v63, %v7271_v51  ;;  %5714 = vmatprep.mubr.msk.bf16.mxu1 %vm1470_vm0, %v3605_v47 }
 0x856   : > { %v3606_v54 = vpack.c.bf16 %v3598_v52, %v3597_v34 }
 0x858   : > { %5715 = vmatmul.mubr.msk.bf16.gmra.mxu1 %vm1470_vm0, %v3606_v54 }
 0x859   : > { %5726 = vmatprep.mubr.msk.bf16.mxu1 %vm6206_vm1, %v6205_v40 }
 0x906   : > { %v5708_v58 = vpop.f32.mrf.mxu1 }
 0x907   : > { %v7313_v37 = vadd.f32 %v5708_v58, %v5287_v30 }
 0x908   : > { %v3672_v13 = vpop.f32.mrf.mxu1 }
 0x909   : > { %v7317_v4 = vadd.f32 %v5287_v30, %v3672_v13 }
 0x90a   : > { %v5709_v15 = vpop.f32.mrf.mxu1 }
 0x90b   : > { %v7315_v48 = vadd.f32 %v5709_v15, %v5287_v30  ;;  %v5317_v15 = vld [vmem:[%s7605_s28 + $0x8] sm:$0xf] }
 0x90c   : > { %v3675_v29 = vpop.f32.mrf.mxu1 }
 0x90d   : > { %v3761_v51 = vpack.c.bf16 %v7315_v48, %v7313_v37  ;;  %v7321_v22 = vadd.f32 %v5287_v30, %v3675_v29  ;;  %v4277_v29 = vsel %vm2093_vm2, %v5317_v15, 0 }
 0x90e   : > { %v5712_v26 = vpop.f32.mrf.mxu1 }
 0x90f   : > { %v3719_v57 = vpack.c.bf16 %v7321_v22, %v7317_v4  ;;  %5725 = vmatpush3.bf16.msra.mxu1 %v3761_v51  ;;  %v7329_v23 = vadd.f32 %v5712_v26, %v5287_v30  ;;  %v4111_v51 = vld [vmem:[%s7605_s28] sm:$0xf] }
 0x910   : > { %v3688_v28 = vpop.f32.mrf.mxu1  ;;  %5736 = vmatprep.subr.bf16.mxu1 %v6205_v40  ;;  %v5301_v26 = vld [vmem:[%s7606_s1] ss:$0 sm:$0xff]  ;;  %s932_s1 = scalar_lea.vmem %s6364_s12, %s5358_s26 }
 0x911   : > { %5719 = vmatpush3.bf16.msra.mxu0 %v3719_v57  ;;  %v7336_v21 = vadd.f32 %v5287_v30, %v3688_v28 }
 0x912   : > { %v5713_v45 = vpop.f32.mrf.mxu1  ;;  %5727 = vmatmul.mubr.msk.bf16.vlgmr.msra.gmra.mxu1 %vm1470_vm0, %v6164_v25  ;;  %5730 = vmatprep.subr.bf16.mxu0 %v6205_v40 }
 0x913   : > { %v7331_v43 = vadd.f32 %v5713_v45, %v5287_v30  ;;  %5738 = vmatprep.mubr.msk.bf16.mxu1 %vm6206_vm1, %v6205_v40 }
 0x914   : > { %v3691_v42 = vpop.f32.mrf.mxu1  ;;  %5721 = vmatmul.mubr.msk.bf16.vlgmr.msra.gmra.mxu0 %vm1470_vm0, %v6164_v25 }
 0x915   : > { %v3845_v33 = vpack.c.bf16 %v7331_v43, %v7329_v23  ;;  %v7340_v61 = vadd.f32 %v5287_v30, %v3691_v42  ;;  %5732 = vmatprep.mubr.msk.bf16.mxu0 %vm6206_vm1, %v6205_v40 }
 0x917   : > { %v3803_v50 = vpack.c.bf16 %v7340_v61, %v7336_v21  ;;  %5737 = vmatpush3.bf16.msra.mxu1 %v3845_v33 }
 0x918   : > { %v5716_v62 = vpop.f32.mrf.mxu1  ;;  %5748 = vmatprep.subr.bf16.mxu1 %v6205_v40 }
 0x919   : > { %5731 = vmatpush3.bf16.msra.mxu0 %v3803_v50  ;;  %v7351_v32 = vadd.f32 %v5716_v62, %v5287_v30 }
 0x91a   : > { %v3704_v56 = vpop.f32.mrf.mxu1  ;;  %5739 = vmatmul.mubr.msk.bf16.vlgmr.msra.gmra.mxu1 %vm1470_vm0, %v6164_v25  ;;  %5742 = vmatprep.subr.bf16.mxu0 %v6205_v40 }
 0x91b   : > { %5750 = vmatprep.mubr.msk.bf16.mxu1 %vm6206_vm1, %v6205_v40  ;;  %v7358_v7 = vadd.f32 %v5287_v30, %v3704_v56 }
 0x91c   : > { %v5717_v9 = vpop.f32.mrf.mxu1  ;;  %5733 = vmatmul.mubr.msk.bf16.vlgmr.msra.gmra.mxu0 %vm1470_vm0, %v6164_v25 }
 0x91d   : > { %v7353_v12 = vadd.f32 %v5717_v9, %v5287_v30  ;;  %5744 = vmatprep.mubr.msk.bf16.mxu0 %vm6206_vm1, %v6205_v40 }
 0x91e   : > { %v3707_v24 = vpop.f32.mrf.mxu1 }
 0x91f   : > { %v3929_v5 = vpack.c.bf16 %v7353_v12, %v7351_v32  ;;  %v7362_v10 = vadd.f32 %v5287_v30, %v3707_v24  ;;  %v5308_v30 = vld [vmem:[%s7605_s28 + $0x4] sm:$0xf] }
 0x920   : > { %v4132_v13 = vsel %vm2093_vm2, %v5308_v30, 0 }
 0x921   : > { %v3887_v14 = vpack.c.bf16 %v7362_v10, %v7358_v7  ;;  %5749 = vmatpush3.bf16.msra.mxu1 %v3929_v5 }
 0x922   : > { %5843 = vmatprep.subr.msk.bf16.mxu1 %vm2093_vm2, %v5308_v30 }
 0x923   : > { %5743 = vmatpush3.bf16.msra.mxu0 %v3887_v14 }
 0x924   : > { %5751 = vmatmul.mubr.msk.bf16.vlgmr.msra.gmra.mxu1 %vm1470_vm0, %v6164_v25  ;;  %5842 = vmatprep.subr.msk.bf16.mxu0 %vm2093_vm2, %v3971_v36 }
 0x925   : > { %5769 = vmatpush3.bf16.msra.mxu1 %v4132_v13 }
 0x926   : > { %5745 = vmatmul.mubr.msk.bf16.vlgmr.msra.gmra.mxu0 %vm1470_vm0, %v6164_v25  ;;  %5844 = vmatprep.subr.msk.bf16.mxu1 %vm2093_vm2, %v4111_v51 }
 0x927   : > { %5755 = vmatpush3.bf16.msra.mxu0 %v4004_v27 }
 0x928   : > { %5845 = vmatprep.subr.msk.bf16.mxu0 %vm2093_vm2, %v5317_v15 }
 0x9d2   : > { %v3796_v19 = vpop.f32.mrf.mxu1 }
 0x9d4   : > { %v3754_v38 = vpop.f32.mrf.mxu0  ;;  %v5728_v39 = vpop.f32.mrf.mxu1 }
 0x9d6   : > { %v5722_v18 = vpop.f32.mrf.mxu0  ;;  %v3799_v49 = vpop.f32.mrf.mxu1 }
 0x9d7   : > { %v3973_v41 = vpack.c.bf16 %v3799_v49, %v3796_v19 }
 0x9d8   : > { %v3757_v60 = vpop.f32.mrf.mxu0  ;;  %v5729_v35 = vpop.f32.mrf.mxu1 }
 0x9d9   : > { %v3972_v55 = vpack.c.bf16 %v3757_v60, %v3754_v38 }
 0x9da   : > { %v5723_v59 = vpop.f32.mrf.mxu0  ;;  %v3880_v53 = vpop.f32.mrf.mxu1 }
 0x9db   : > { %5756 = vmatprep.mubr.msk.bf16.mxu0 %vm2062_vm3, %v3972_v55 }
 0x9dc   : > { %v3838_v1 = vpop.f32.mrf.mxu0  ;;  %5757 = vmatmul.mubr.msk.bf16.vlgmr.msra.gmra.mxu0 %vm2062_vm3, %v3973_v41  ;;  %v5740_v2 = vpop.f32.mrf.mxu1 }
 0x9dd   : > { %5789 = vmatpush3.bf16.msra.mxu0 %v4277_v29 }
 0x9de   : > { %v5734_v6 = vpop.f32.mrf.mxu0  ;;  %v3883_v20 = vpop.f32.mrf.mxu1  ;;  %5804 = vmatprep.subr.bf16.mxu0 %v6205_v40 }
 0x9df   : > { %v3975_v44 = vpack.c.bf16 %v3883_v20, %v3880_v53 }
 0x9e0   : > { %v3841_v3 = vpop.f32.mrf.mxu0  ;;  %v5741_v16 = vpop.f32.mrf.mxu1 }
 0x9e1   : > { %v3974_v11 = vpack.c.bf16 %v3841_v3, %v3838_v1 }
 0x9e2   : > { %v5735_v0 = vpop.f32.mrf.mxu0 }
 0x9e3   : > { %5760 = vmatprep.mubr.msk.bf16.mxu0 %vm2062_vm3, %v3974_v11 }
 0x9e4   : > { %v3964_v46 = vpop.f32.mrf.mxu1  ;;  %5761 = vmatmul.mubr.msk.bf16.gmra.mxu0 %vm2062_vm3, %v3975_v44 }
 0x9e6   : > { %v3922_v31 = vpop.f32.mrf.mxu0  ;;  %v5752_v8 = vpop.f32.mrf.mxu1 }
 0x9e8   : > { %v5746_v17 = vpop.f32.mrf.mxu0  ;;  %v3967_v47 = vpop.f32.mrf.mxu1 }
 0x9e9   : > { %v3977_v54 = vpack.c.bf16 %v3967_v47, %v3964_v46 }
 0x9ea   : > { %v3925_v63 = vpop.f32.mrf.mxu0  ;;  %v5753_v34 = vpop.f32.mrf.mxu1 }
 0x9eb   : > { %v3976_v52 = vpack.c.bf16 %v3925_v63, %v3922_v31 }
 0x9ec   : > { %v5747_v58 = vpop.f32.mrf.mxu0 }
 0x9ed   : > { %5764 = vmatprep.mubr.msk.bf16.mxu0 %vm2062_vm3, %v3976_v52 }
 0x9ee   : > { %5765 = vmatmul.mubr.msk.bf16.gmra.mxu0 %vm2062_vm3, %v3977_v54 }
 0xa9c   : > { %v5758_v57 = vpop.f32.mrf.mxu0 }
 0xa9d   : > { %v4049_v28 = vadd.f32 %v5758_v57, %v5301_v26 }
 0xa9e   : > { %v4040_v45 = vpop.f32.mrf.mxu0 }
 0xa9f   : > { %v4089_v42 = vadd.f32 %v4049_v28, %v7313_v37  ;;  %v4041_v20 = vadd.f32 %v5301_v26, %v4040_v45 }
 0xaa0   : > { %v5759_v25 = vpop.f32.mrf.mxu0 }
 0xaa1   : > { %v4052_v33 = vadd.f32 %v5759_v25, %v5301_v26  ;;  %v4101_v9 = vmax.f32 %v4089_v42, 0.0  ;;  %v4087_v8 = vadd.f32 %v4041_v20, %v7317_v4 }
 0xaa2   : > { %v4043_v50 = vpop.f32.mrf.mxu0 }
 0xaa3   : > { %v4090_v62 = vadd.f32 %v4052_v33, %v7315_v48  ;;  %v4044_v41 = vadd.f32 %v5301_v26, %v4043_v50  ;;  %v4099_v52 = vmax.f32 %v4087_v8, 0.0  ;;  %v5322_v50 = vld [vmem:[%s7607_s2] ss:$0 sm:$0xff] }
 0xaa4   : > { %v5762_v56 = vpop.f32.mrf.mxu0 }
 0xaa5   : > { %v4102_v24 = vmax.f32 %v4090_v62, 0.0  ;;  %v4065_v27 = vadd.f32 %v5762_v56, %v5301_v26 }
 0xaa6   : > { %v4056_v5 = vpop.f32.mrf.mxu0 }
 0xaa7   : > { %v4113_v14 = vpack.c.bf16 %v4102_v24, %v4101_v9  ;;  %v4057_v36 = vadd.f32 %v5301_v26, %v4056_v5  ;;  %v4093_v60 = vadd.f32 %v4065_v27, %v7329_v23  ;;  %v4088_v23 = vadd.f32 %v4044_v41, %v7321_v22 }
 0xaa8   : > { %v5763_v19 = vpop.f32.mrf.mxu0 }
 0xaa9   : > { %v4068_v38 = vadd.f32 %v5763_v19, %v5301_v26  ;;  %5770 = vmatprep.mubr.msk.bf16.mxu1 %vm2062_vm3, %v4113_v14  ;;  %v4091_v18 = vadd.f32 %v4057_v36, %v7336_v21  ;;  %v4105_v2 = vmax.f32 %v4093_v60, 0.0  ;;  %v4100_v47 = vmax.f32 %v4088_v23, 0.0 }
 0xaaa   : > { %v4059_v39 = vpop.f32.mrf.mxu0 }
 0xaab   : > { %v4094_v37 = vadd.f32 %v4068_v38, %v7331_v43  ;;  %v4060_v49 = vadd.f32 %v5301_v26, %v4059_v39  ;;  %v4103_v59 = vmax.f32 %v4091_v18, 0.0  ;;  %v4203_v43 = vsel %vm2093_vm2, %v4111_v51, 0 }
 0xaac   : > { %v4112_v58 = vpack.c.bf16 %v4100_v47, %v4099_v52 }
 0xaad   : > { %v4092_v48 = vadd.f32 %v4060_v49, %v7340_v61  ;;  %v4106_v55 = vmax.f32 %v4094_v37, 0.0 }
 0xaae   : > { %v5766_v35 = vpop.f32.mrf.mxu0 }
 0xaaf   : > { %v4104_v53 = vmax.f32 %v4092_v48, 0.0  ;;  %v4081_v16 = vadd.f32 %v5766_v35, %v5301_v26  ;;  %v4115_v21 = vpack.c.bf16 %v4106_v55, %v4105_v2 }
 0xab0   : > { %v4072_v1 = vpop.f32.mrf.mxu0 }
 0xab1   : > { %v4073_v6 = vadd.f32 %v5301_v26, %v4072_v1  ;;  %v4114_v3 = vpack.c.bf16 %v4104_v53, %v4103_v59  ;;  %v4097_v17 = vadd.f32 %v4081_v16, %v7351_v32 }
 0xab2   : > { %v5767_v11 = vpop.f32.mrf.mxu0 }
 0xab3   : > { %v4084_v44 = vadd.f32 %v5767_v11, %v5301_v26  ;;  %5771 = vmatmul.mubr.msk.bf16.vlgmr.msra.gmra.mxu1 %vm2062_vm3, %v4114_v3  ;;  %5790 = vmatprep.mubr.msk.bf16.mxu0 %vm2062_vm3, %v4114_v3  ;;  %v4095_v61 = vadd.f32 %v4073_v6, %v7358_v7 }
 0xab4   : > { %v4075_v0 = vpop.f32.mrf.mxu0  ;;  %5774 = vmatprep.mubr.msk.bf16.mxu1 %vm2062_vm3, %v4115_v21  ;;  %5791 = vmatmul.mubr.msk.bf16.vlgmr.msra.gmra.mxu0 %vm2062_vm3, %v4115_v21 }
 0xab5   : > { %v4098_v46 = vadd.f32 %v4084_v44, %v7353_v12  ;;  %v4076_v31 = vadd.f32 %v5301_v26, %v4075_v0  ;;  %5779 = vmatpush3.bf16.msra.mxu1 %v4203_v43  ;;  %v4107_v34 = vmax.f32 %v4095_v61, 0.0  ;;  %v4109_v12 = vmax.f32 %v4097_v17, 0.0 }
 0xab6   : > { %5798 = vmatprep.subr.bf16.mxu1 %v6205_v40 }
 0xab7   : > { %v4096_v22 = vadd.f32 %v4076_v31, %v7362_v10  ;;  %v4110_v63 = vmax.f32 %v4098_v46, 0.0 }
 0xab9   : > { %v4108_v7 = vmax.f32 %v4096_v22, 0.0  ;;  %v4272_v30 = vpack.c.bf16 %v4110_v63, %v4109_v12 }
 0xabb   : > { %v4118_v54 = vpack.c.bf16 %v4108_v7, %v4107_v34 }
 0xabd   : > { %5775 = vmatmul.mubr.msk.bf16.gmra.mxu1 %vm2062_vm3, %v4118_v54  ;;  %5794 = vmatprep.mubr.msk.bf16.mxu0 %vm2062_vm3, %v4118_v54 }
 0xabe   : > { %5780 = vmatprep.mubr.msk.bf16.mxu1 %vm2062_vm3, %v4112_v58  ;;  %5795 = vmatmul.mubr.msk.bf16.gmra.mxu0 %vm2062_vm3, %v4272_v30 }
 0xabf   : > { %5806 = vmatprep.mubr.msk.bf16.mxu0 %vm6206_vm1, %v6205_v40 }
 0xac5   : > { %5781 = vmatmul.mubr.msk.bf16.vlgmr.msra.gmra.mxu1 %vm2062_vm3, %v4113_v14 }
 0xac6   : > { %5784 = vmatprep.mubr.msk.bf16.mxu1 %vm2062_vm3, %v4114_v3 }
 0xacd   : > { %5785 = vmatmul.mubr.msk.bf16.gmra.mxu1 %vm2062_vm3, %v4115_v21 }
 0xace   : > { %5800 = vmatprep.mubr.msk.bf16.mxu1 %vm6206_vm1, %v6205_v40 }
 0xb73   : > { %v5772_v4 = vpop.f32.mrf.mxu1 }
 0xb74   : > { %v5792_v13 = vpop.f32.mrf.mxu0 }
 0xb75   : > { %v4168_v32 = vpop.f32.mrf.mxu1 }
 0xb76   : > { %v4313_v29 = vpop.f32.mrf.mxu0 }
 0xb77   : > { %v5773_v10 = vpop.f32.mrf.mxu1 }
 0xb78   : > { %v5793_v57 = vpop.f32.mrf.mxu0 }
 0xb79   : > { %v4171_v15 = vpop.f32.mrf.mxu1 }
 0xb7a   : > { %v4316_v25 = vpop.f32.mrf.mxu0 }
 0xb7d   : > { %v5776_v51 = vpop.f32.mrf.mxu1 }
 0xb7e   : > { %v5796_v24 = vpop.f32.mrf.mxu0 }
 0xb7f   : > { %v4184_v26 = vpop.f32.mrf.mxu1 }
 0xb80   : > { %v4329_v49 = vpop.f32.mrf.mxu0 }
 0xb81   : > { %v5777_v28 = vpop.f32.mrf.mxu1 }
 0xb82   : > { %v5797_v6 = vpop.f32.mrf.mxu0 }
 0xb83   : > { %v4187_v45 = vpop.f32.mrf.mxu1 }
 0xb84   : > { %v4332_v46 = vpop.f32.mrf.mxu0 }
 0xb85   : > { %v5782_v42 = vpop.f32.mrf.mxu1 }
 0xb86   : > { %v4248_v33 = vadd.f32 %v5782_v42, %v5772_v4 }
 0xb87   : > { %v4239_v62 = vpop.f32.mrf.mxu1 }
 0xb88   : > { %v4346_v56 = vadd.f32 %v5792_v13, %v4248_v33  ;;  %v4240_v9 = vadd.f32 %v4239_v62, %v4168_v32 }
 0xb89   : > { %v5783_v5 = vpop.f32.mrf.mxu1 }
 0xb8a   : > { %v7418_v14 = vadd.f32 %v5322_v50, %v4346_v56  ;;  %v4344_v36 = vadd.f32 %v4313_v29, %v4240_v9  ;;  %v4251_v27 = vadd.f32 %v5783_v5, %v5773_v10 }
 0xb8b   : > { %v4242_v19 = vpop.f32.mrf.mxu1 }
 0xb8c   : > { %v5325_v38 = vmul.f32 -1.442695, %v7418_v14  ;;  %v7421_v39 = vadd.f32 %v5322_v50, %v4344_v36  ;;  %v4347_v18 = vadd.f32 %v5793_v57, %v4251_v27  ;;  %v4243_v37 = vadd.f32 %v4242_v19, %v4171_v15 }
 0xb8d   : > { %v5786_v60 = vpop.f32.mrf.mxu1 }
 0xb8e   : > { %6114 = vpow2.f32 %v5325_v38  ;;  %v5323_v48 = vmul.f32 -1.442695, %v7421_v39  ;;  %v7424_v35 = vadd.f32 %v5322_v50, %v4347_v18  ;;  %v4345_v55 = vadd.f32 %v4316_v25, %v4243_v37 }
 0xb8f   : > { %v4264_v41 = vadd.f32 %v5786_v60, %v5776_v51  ;;  %v4255_v59 = vpop.f32.mrf.mxu1 }
 0xb90   : > { %6116 = vpow2.f32 %v5323_v48  ;;  %v5326_v53 = vmul.f32 -1.442695, %v7424_v35  ;;  %v7427_v1 = vadd.f32 %v5322_v50, %v4345_v55  ;;  %v4256_v2 = vadd.f32 %v4255_v59, %v4184_v26 }
 0xb91   : > { %v4350_v20 = vadd.f32 %v5796_v24, %v4264_v41  ;;  %v5787_v3 = vpop.f32.mrf.mxu1 }
 0xb92   : > { %6118 = vpow2.f32 %v5326_v53  ;;  %v5324_v16 = vmul.f32 -1.442695, %v7427_v1  ;;  %v4348_v11 = vadd.f32 %v4329_v49, %v4256_v2  ;;  %v4267_v21 = vadd.f32 %v5787_v3, %v5777_v28 }
 0xb93   : > { %v7430_v44 = vadd.f32 %v5322_v50, %v4350_v20  ;;  %v4258_v43 = vpop.f32.mrf.mxu1 }
 0xb94   : > { %6120 = vpow2.f32 %v5324_v16  ;;  %v7432_v23 = vadd.f32 %v5322_v50, %v4348_v11  ;;  %v4351_v0 = vadd.f32 %v5797_v6, %v4267_v21  ;;  %v4259_v61 = vadd.f32 %v4258_v43, %v4187_v45 }
 0xb95   : > { %v5329_v31 = vmul.f32 -1.442695, %v7430_v44 }
 0xb96   : > { %v5327_v8 = vmul.f32 -1.442695, %v7432_v23  ;;  %v7436_v17 = vadd.f32 %v5322_v50, %v4351_v0  ;;  %v4349_v22 = vadd.f32 %v4332_v46, %v4259_v61 }
 0xb97   : > { %6122 = vpow2.f32 %v5329_v31 }
 0xb98   : > { %6124 = vpow2.f32 %v5327_v8  ;;  %v5330_v47 = vmul.f32 -1.442695, %v7436_v17  ;;  %v7439_v63 = vadd.f32 %v5322_v50, %v4349_v22 }
 0xb9a   : > { %v5328_v34 = vmul.f32 -1.442695, %v7439_v63  ;;  %6126 = vpow2.f32 %v5330_v47 }
 0xb9b   : > { %v6115_v7 = vpop.eup %6114 }
 0xb9c   : > { %v4393_v52 = vadd.f32 1.0, %v6115_v7  ;;  %6128 = vpow2.f32 %v5328_v34 }
 0xb9d   : > { %v6117_v12 = vpop.eup %6116 }
 0xb9e   : > { %6130 = vrcp.f32 %v4393_v52  ;;  %v4391_v54 = vadd.f32 1.0, %v6117_v12 }
 0xb9f   : > { %v6119_v58 = vpop.eup %6118 }
 0xba0   : > { %v4394_v30 = vadd.f32 1.0, %v6119_v58  ;;  %6132 = vrcp.f32 %v4391_v54 }
 0xba1   : > { %v6121_v4 = vpop.eup %6120 }
 0xba2   : > { %6134 = vrcp.f32 %v4394_v30  ;;  %v4392_v32 = vadd.f32 1.0, %v6121_v4 }
 0xba4   : > { %v6123_v10 = vpop.eup %6122  ;;  %6136 = vrcp.f32 %v4392_v32 }
 0xba5   : > { %v6125_v13 = vpop.eup %6124  ;;  %v4397_v29 = vadd.f32 1.0, %v6123_v10 }
 0xba6   : > { %v4395_v15 = vadd.f32 1.0, %v6125_v13 }
 0xba7   : > { %v6127_v51 = vpop.eup %6126 }
 0xba8   : > { %6138 = vrcp.f32 %v4395_v15  ;;  %v4398_v45 = vadd.f32 1.0, %v6127_v51 }
 0xba9   : > { %v6129_v26 = vpop.eup %6128  ;;  %6140 = vrcp.f32 %v4397_v29 }
 0xbaa   : > { %v4396_v57 = vadd.f32 1.0, %v6129_v26 }
 0xbab   : > { %v6131_v28 = vpop.eup %6130 }
 0xbac   : > { %6142 = vrcp.f32 %v4396_v57  ;;  %4427 = vrot.lane.b32.xlu0 %v6131_v28, %s6204_s18 }
 0xbad   : > { %v6133_v25 = vpop.eup %6132  ;;  %6144 = vrcp.f32 %v4398_v45 }
 0xbaf   : > { %v6135_v42 = vpop.eup %6134 }
 0xbb0   : > { %4429 = vrot.lane.b32.xlu1 %v6135_v42, %s6204_s18  ;;  %4423 = vrot.lane.b32.xlu0 %v6133_v25, %s6204_s18 }
 0xbb1   : > { %v6137_v33 = vpop.eup %6136 }
 0xbb4   : > { %4425 = vrot.lane.b32.xlu1 %v6137_v33, %s6204_s18 }
 0xbb5   : > { %v6139_v50 = vpop.eup %6138 }
 0xbb6   : > { %4431 = vrot.lane.b32.xlu0 %v6139_v50, %s6204_s18  ;;  %v6141_v62 = vpop.eup %6140 }
 0xbb9   : > { %v6143_v56 = vpop.eup %6142 }
 0xbba   : > { %4433 = vrot.lane.b32.xlu1 %v6143_v56, %s6204_s18  ;;  %4435 = vrot.lane.b32.xlu0 %v6141_v62, %s6204_s18  ;;  %v6145_v9 = vpop.eup %6144 }
 0xbbe   : > { %4437 = vrot.lane.b32.xlu1 %v6145_v9, %s6204_s18  ;;  %s7612_s18 = sld [smem:[#allocation15_spill]] }
 0xc1e   : > { %v4428_v24 = vpop.permute.xlu0 %4427 }
 0xc1f   : > { %v4449_v5 = vmul.f32 %v4428_v24, %v7418_v14 }
 0xc21   : > { %v4461_v36 = vsel %vm1470_vm0, %v4449_v5, 0.0 }
 0xc22   : > { %v4430_v27 = vpop.permute.xlu1 %4429  ;;  %4462 = vadd.xlane.f32.xlu0 %v4461_v36  ;;  %v4424_v19 = vpop.permute.xlu0 %4423 }
 0xc23   : > { %v4450_v38 = vmul.f32 %v4430_v27, %v7424_v35  ;;  %v7454_v18 = vmul.f32 %v4424_v19, %v7421_v39 }
 0xc25   : > { %v4464_v37 = vsel %vm1470_vm0, %v4450_v38, 0.0  ;;  %v4455_v49 = vsel %vm1470_vm0, %v7454_v18, 0.0 }
 0xc26   : > { %4465 = vadd.xlane.f32.xlu1 %v4464_v37  ;;  %v4426_v60 = vpop.permute.xlu1 %4425  ;;  %4456 = vadd.xlane.f32.xlu0 %v4455_v49 }
 0xc27   : > { %v4448_v14 = vmul.f32 %v4426_v60, %v7427_v1 }
 0xc28   : > { %v4432_v48 = vpop.permute.xlu0 %4431 }
 0xc29   : > { %v7461_v55 = vmul.f32 %v4432_v48, %v7432_v23  ;;  %v4458_v41 = vsel %vm1470_vm0, %v4448_v14, 0.0 }
 0xc2a   : > { %4459 = vadd.xlane.f32.xlu0 %v4458_v41 }
 0xc2b   : > { %v4467_v39 = vsel %vm1470_vm0, %v7461_v55, 0.0 }
 0xc2c   : > { %v4434_v35 = vpop.permute.xlu1 %4433  ;;  %4468 = vadd.xlane.f32.xlu1 %v4467_v39  ;;  %v4436_v59 = vpop.permute.xlu0 %4435 }
 0xc2d   : > { %v7467_v53 = vmul.f32 %v4434_v35, %v7439_v63  ;;  %v7470_v2 = vmul.f32 %v4436_v59, %v7430_v44 }
 0xc2f   : > { %v4470_v1 = vsel %vm1470_vm0, %v7467_v53, 0.0  ;;  %v4473_v6 = vsel %vm1470_vm0, %v7470_v2, 0.0 }
 0xc30   : > { %v4438_v20 = vpop.permute.xlu1 %4437  ;;  %4471 = vadd.xlane.f32.xlu0 %v4470_v1  ;;  %4474 = vadd.xlane.f32.xlu1 %v4473_v6 }
 0xc31   : > { %v7477_v3 = vmul.f32 %v4438_v20, %v7436_v17 }
 0xc33   : > { %v4476_v16 = vsel %vm1470_vm0, %v7477_v3, 0.0 }
 0xc34   : > { %4477 = vadd.xlane.f32.xlu0 %v4476_v16 }
 0xcab   : > { %v4463_v11 = vpop.xlane.xlu0 %4462 }
 0xcaf   : > { %v4466_v21 = vpop.xlane.xlu1 %4465  ;;  %v4457_v44 = vpop.xlane.xlu0 %4456 }
 0xcb0   : > { %v4486_v43 = vadd.f32 %v4466_v21, %v4463_v11 }
 0xcb2   : > { %v4487_v23 = vrot.slane %v4486_v43, 4 }
 0xcb3   : > { %v4460_v0 = vpop.xlane.xlu0 %4459 }
 0xcb4   : > { %v4488_v61 = vadd.f32 %v4487_v23, %v4486_v43  ;;  %v4479_v46 = vadd.f32 %v4460_v0, %v4457_v44  ;;  %v5898_v43 = vld [vmem:[%s7608_s10 + $0x8] sm:$0xff]  }
 0xcb5   : > { %v4469_v22 = vpop.xlane.xlu1 %4468  ;;  %5799 = vmatpush3.bf16.msra.mxu1 %v5898_v43 }
 0xcb6   : > { %v4489_v31 = vrot.slane %v4488_v61, 2  ;;  %v4480_v8 = vrot.slane %v4479_v46, 4  ;;  %5810 = vmatprep.subr.bf16.mxu1 %v6205_v40 }
 0xcb8   : > { %v4490_v47 = vadd.f32 %v4489_v31, %v4488_v61  ;;  %v4481_v63 = vadd.f32 %v4480_v8, %v4479_v46 }
 0xcb9   : > { %v4472_v34 = vpop.xlane.xlu0 %4471  ;;  %v4475_v30 = vpop.xlane.xlu1 %4474 }
 0xcba   : > { %v4491_v17 = vrot.slane %v4490_v47, 1  ;;  %v4482_v7 = vrot.slane %v4481_v63, 2  ;;  %v4493_v52 = vadd.f32 %v4472_v34, %v4469_v22 }
 0xcbc   : > { %v4492_v12 = vadd.f32 %v4491_v17, %v4490_v47  ;;  %v4483_v54 = vadd.f32 %v4482_v7, %v4481_v63  ;;  %v4494_v58 = vrot.slane %v4493_v52, 4 }
 0xcbd   : > { %v4478_v4 = vpop.xlane.xlu0 %4477 }
 0xcbe   : > { %v4508_v32 = vmul.f32 0.00390625, %v4492_v12  ;;  %v4484_v10 = vrot.slane %v4483_v54, 1  ;;  %v4495_v13 = vadd.f32 %v4494_v58, %v4493_v52  ;;  %v4500_v15 = vadd.f32 %v4478_v4, %v4475_v30 }
 0xcc0   : > { %v4485_v29 = vadd.f32 %v4484_v10, %v4483_v54  ;;  %v4496_v51 = vrot.slane %v4495_v13, 2  ;;  %v4501_v26 = vrot.slane %v4500_v15, 4  ;;  %v7481_v57 = vsub.f32 %v4450_v38, %v4508_v32 }
 0xcc1   : > { %v7483_v28 = vsub.f32 %v4449_v5, %v4508_v32 }
 0xcc2   : > { %v4507_v45 = vmul.f32 0.00390625, %v4485_v29  ;;  %v4497_v25 = vadd.f32 %v4496_v51, %v4495_v13  ;;  %v4502_v42 = vadd.f32 %v4501_v26, %v4500_v15  ;;  %v4522_v33 = vmul.f32 %v7481_v57, %v7481_v57 }
 0xcc3   : > { %v4521_v50 = vmul.f32 %v7483_v28, %v7483_v28 }
 0xcc4   : > { %v4498_v62 = vrot.slane %v4497_v25, 1  ;;  %v4503_v56 = vrot.slane %v4502_v42, 2  ;;  %v4536_v9 = vsel %vm1470_vm0, %v4522_v33, 0.0  ;;  %v7490_v24 = vsub.f32 %v4448_v14, %v4507_v45 }
 0xcc5   : > { %4537 = vadd.xlane.f32.xlu0 %v4536_v9  ;;  %v4533_v36 = vsel %vm1470_vm0, %v4521_v50, 0.0  ;;  %v7494_v5 = vsub.f32 %v7454_v18, %v4507_v45 }
 0xcc6   : > { %v4499_v27 = vadd.f32 %v4498_v62, %v4497_v25  ;;  %v4504_v19 = vadd.f32 %v4503_v56, %v4502_v42  ;;  %4534 = vadd.xlane.f32.xlu1 %v4533_v36  ;;  %v4520_v38 = vmul.f32 %v7490_v24, %v7490_v24 }
 0xcc7   : > { %v4519_v37 = vmul.f32 %v7494_v5, %v7494_v5 }
 0xcc8   : > { %v4509_v49 = vmul.f32 0.00390625, %v4499_v27  ;;  %v4505_v60 = vrot.slane %v4504_v19, 1  ;;  %v4530_v14 = vsel %vm1470_vm0, %v4520_v38, 0.0 }
 0xcc9   : > { %4531 = vadd.xlane.f32.xlu0 %v4530_v14  ;;  %v4527_v48 = vsel %vm1470_vm0, %v4519_v37, 0.0 }
 0xcca   : > { %v4506_v41 = vadd.f32 %v4505_v60, %v4504_v19  ;;  %4528 = vadd.xlane.f32.xlu1 %v4527_v48  ;;  %v7503_v18 = vsub.f32 %v7467_v53, %v4509_v49  ;;  %v7506_v39 = vsub.f32 %v7461_v55, %v4509_v49 }
 0xccc   : > { %v4510_v35 = vmul.f32 0.00390625, %v4506_v41  ;;  %v4524_v59 = vmul.f32 %v7503_v18, %v7503_v18  ;;  %v4523_v1 = vmul.f32 %v7506_v39, %v7506_v39 }
 0xcce   : > { %v4542_v6 = vsel %vm1470_vm0, %v4524_v59, 0.0  ;;  %v4539_v20 = vsel %vm1470_vm0, %v4523_v1, 0.0  ;;  %v7515_v16 = vsub.f32 %v7477_v3, %v4510_v35  ;;  %v7518_v53 = vsub.f32 %v7470_v2, %v4510_v35  ;;  %v5899_v2 = vld [vmem:[%s7608_s10] sm:$0xff]   ;;  %v4600_v1 = vld [vmem:[%s7609_s7 + $0x8] sm:$0xff] }
 0xccf   : > { %4543 = vadd.xlane.f32.xlu0 %v4542_v6  ;;  %4540 = vadd.xlane.f32.xlu1 %v4539_v20  ;;  %v4599_v59 = vld [vmem:[%s7609_s7] sm:$0xff] }
 0xcd0   : > { %v4526_v55 = vmul.f32 %v7515_v16, %v7515_v16  ;;  %v4525_v11 = vmul.f32 %v7518_v53, %v7518_v53  ;;  %5805 = vmatpush3.bf16.msra.mxu0 %v5899_v2 }
 0xcd1   : > { %5816 = vmatprep.subr.bf16.mxu0 %v6205_v40 }
 0xcd2   : > { %v4548_v21 = vsel %vm1470_vm0, %v4526_v55, 0.0  ;;  %v4545_v44 = vsel %vm1470_vm0, %v4525_v11, 0.0  ;;  %v4609_v55 = vld [vmem:[%s7610_s11] sm:$0xff]  ;;  %v4610_v11 = vld [vmem:[%s7610_s11 + $0x8] sm:$0xff] }
 0xcd3   : > { %4549 = vadd.xlane.f32.xlu0 %v4548_v21  ;;  %4546 = vadd.xlane.f32.xlu1 %v4545_v44 }
 0xd4e   : > { %v4538_v3 = vpop.xlane.xlu0 %4537 }
 0xd4f   : > { %v4535_v23 = vpop.xlane.xlu1 %4534 }
 0xd50   : > { %v4558_v0 = vadd.f32 %v4538_v3, %v4535_v23 }
 0xd52   : > { %v4559_v61 = vrot.slane %v4558_v0, 4  ;;  %v4532_v46 = vpop.xlane.xlu0 %4531 }
 0xd53   : > { %v4529_v31 = vpop.xlane.xlu1 %4528 }
 0xd54   : > { %v4560_v8 = vadd.f32 %v4559_v61, %v4558_v0  ;;  %v4551_v22 = vadd.f32 %v4532_v46, %v4529_v31  ;;  %v5900_v61 = vld [vmem:[%s7608_s10 + $0x10] sm:$0xff]  }
 0xd56   : > { %v4561_v47 = vrot.slane %v4560_v8, 2  ;;  %v4552_v63 = vrot.slane %v4551_v22, 4 }
 0xd58   : > { %v4562_v34 = vadd.f32 %v4561_v47, %v4560_v8  ;;  %v4553_v17 = vadd.f32 %v4552_v63, %v4551_v22  ;;  %v4541_v7 = vpop.xlane.xlu1 %4540  ;;  %v4544_v52 = vpop.xlane.xlu0 %4543 }
 0xd59   : > { %v4565_v12 = vadd.f32 %v4544_v52, %v4541_v7 }
 0xd5a   : > { %v4563_v54 = vrot.slane %v4562_v34, 1  ;;  %v4554_v58 = vrot.slane %v4553_v17, 2 }
 0xd5b   : > { %v4566_v30 = vrot.slane %v4565_v12, 4 }
 0xd5c   : > { %v4564_v4 = vadd.f32 %v4563_v54, %v4562_v34  ;;  %v4555_v32 = vadd.f32 %v4554_v58, %v4553_v17  ;;  %v4547_v10 = vpop.xlane.xlu1 %4546  ;;  %v4550_v13 = vpop.xlane.xlu0 %4549 }
 0xd5d   : > { %v4567_v15 = vadd.f32 %v4566_v30, %v4565_v12  ;;  %v4572_v29 = vadd.f32 %v4550_v13, %v4547_v10 }
 0xd5e   : > { %v4580_v51 = vmul.f32 0.00390625, %v4564_v4  ;;  %v4556_v26 = vrot.slane %v4555_v32, 1 }
 0xd5f   : > { %v4568_v45 = vrot.slane %v4567_v15, 2  ;;  %v4573_v25 = vrot.slane %v4572_v29, 4 }
 0xd60   : > { %v4584_v42 = vadd.f32 1e-12, %v4580_v51  ;;  %v4557_v33 = vadd.f32 %v4556_v26, %v4555_v32 }
 0xd61   : > { %v4569_v50 = vadd.f32 %v4568_v45, %v4567_v15  ;;  %v4574_v62 = vadd.f32 %v4573_v25, %v4572_v29 }
 0xd62   : > { %6146 = vrsqrt.f32 %v4584_v42  ;;  %v4579_v56 = vmul.f32 0.00390625, %v4557_v33 }
 0xd63   : > { %v4570_v9 = vrot.slane %v4569_v50, 1  ;;  %v4575_v36 = vrot.slane %v4574_v62, 2 }
 0xd64   : > { %v4583_v27 = vadd.f32 1e-12, %v4579_v56 }
 0xd65   : > { %v4571_v19 = vadd.f32 %v4570_v9, %v4569_v50  ;;  %v4576_v38 = vadd.f32 %v4575_v36, %v4574_v62  ;;  %v5345_v9 = vld [vmem:[%s7611_s0] ss:$0 sm:$0xff] }
 0xd66   : > { %6148 = vrsqrt.f32 %v4583_v27 }
 0xd67   : > { %v4581_v37 = vmul.f32 0.00390625, %v4571_v19  ;;  %v4577_v49 = vrot.slane %v4576_v38, 1 }
 0xd69   : > { %v4585_v60 = vadd.f32 1e-12, %v4581_v37  ;;  %v4578_v14 = vadd.f32 %v4577_v49, %v4576_v38 }
 0xd6b   : > { %6150 = vrsqrt.f32 %v4585_v60  ;;  %v4582_v48 = vmul.f32 0.00390625, %v4578_v14 }
 0xd6d   : > { %v4586_v41 = vadd.f32 1e-12, %v4582_v48 }
 0xd6f   : > { %v6147_v35 = vpop.eup %6146  ;;  %6152 = vrsqrt.f32 %v4586_v41 }
 0xd70   : > { %v4593_v6 = vmul.f32 %v6147_v35, %v7483_v28  ;;  %v4594_v20 = vmul.f32 %v6147_v35, %v7481_v57 }
 0xd72   : > { %v4603_v21 = vmul.f32 %v4599_v59, %v4593_v6  ;;  %v4604_v44 = vmul.f32 %v4600_v1, %v4594_v20 }
 0xd73   : > { %v6149_v43 = vpop.eup %6148 }
 0xd74   : > { %v4591_v2 = vmul.f32 %v6149_v43, %v7494_v5  ;;  %v4592_v3 = vmul.f32 %v6149_v43, %v7490_v24  ;;  %v4613_v23 = vadd.f32 %v4609_v55, %v4603_v21  ;;  %v4614_v0 = vadd.f32 %v4610_v11, %v4604_v44  ;;  %v5901_v24 = vld [vmem:[%s7608_s10 + $0x18] sm:$0xff]  }
 0xd76   : > { %v4601_v46 = vmul.f32 %v4599_v59, %v4591_v2  ;;  %v4602_v31 = vmul.f32 %v4600_v1, %v4592_v3  ;;  %v4625_v8 = vpack.c.bf16 %v4614_v0, %v4613_v23 }
 0xd78   : > { %v6151_v22 = vpop.eup %6150  ;;  %5801 = vmatmul.mubr.msk.bf16.vlgmr.msra.gmra.mxu1 %vm1470_vm0, %v4625_v8  ;;  %v4611_v57 = vadd.f32 %v4609_v55, %v4601_v46  ;;  %v4612_v28 = vadd.f32 %v4610_v11, %v4602_v31 }
 0xd79   : > { %v4595_v47 = vmul.f32 %v6151_v22, %v7506_v39  ;;  %v4596_v63 = vmul.f32 %v6151_v22, %v7503_v18  ;;  %5811 = vmatpush3.bf16.msra.mxu1 %v5900_v61  ;;  %5812 = vmatprep.mubr.msk.bf16.mxu1 %vm6206_vm1, %v6205_v40 }
 0xd7a   : > { %v4621_v5 = vpack.c.bf16 %v4612_v28, %v4611_v57  ;;  %5822 = vmatprep.subr.bf16.mxu1 %v6205_v40 }
 0xd7b   : > { %v4605_v34 = vmul.f32 %v4599_v59, %v4595_v47  ;;  %v4606_v17 = vmul.f32 %v4600_v1, %v4596_v63 }
 0xd7c   : > { %v6153_v7 = vpop.eup %6152  ;;  %5807 = vmatmul.mubr.msk.bf16.vlgmr.msra.gmra.mxu0 %vm1470_vm0, %v4621_v5 }
 0xd7d   : > { %v4597_v52 = vmul.f32 %v6153_v7, %v7518_v53  ;;  %v4598_v12 = vmul.f32 %v6153_v7, %v7515_v16  ;;  %v4615_v39 = vadd.f32 %v4609_v55, %v4605_v34  ;;  %v4616_v54 = vadd.f32 %v4610_v11, %v4606_v17  ;;  %5817 = vmatpush3.bf16.msra.mxu0 %v5901_v24 }
 0xd7e   : > { %5818 = vmatprep.mubr.msk.bf16.mxu0 %vm6206_vm1, %v6205_v40  ;;  %5830 = vmatprep.subr.bf16.mxu0 %v6205_v40 }
 0xd7f   : > { %v4729_v18 = vpack.c.bf16 %v4616_v54, %v4615_v39  ;;  %v4607_v58 = vmul.f32 %v4599_v59, %v4597_v52  ;;  %v4608_v30 = vmul.f32 %v4600_v1, %v4598_v12  ;;  %v5902_v39 = vld [vmem:[%s7612_s18 + $0x8] sm:$0xff]   ;;  %v5903_v54 = vld [vmem:[%s7612_s18] sm:$0xff]  }
 0xd81   : > { %5813 = vmatmul.mubr.msk.bf16.vlgmr.msra.gmra.mxu1 %vm1470_vm0, %v4729_v18  ;;  %v4617_v4 = vadd.f32 %v4609_v55, %v4607_v58  ;;  %v4618_v32 = vadd.f32 %v4610_v11, %v4608_v30 }
 0xd82   : > { %5826 = vmatprep.mubr.msk.bf16.mxu1 %vm6206_vm1, %v6205_v40  ;;  %5823 = vmatpush3.bf16.msra.mxu1 %v5902_v39 }
 0xd83   : > { %v4785_v53 = vpack.c.bf16 %v4618_v32, %v4617_v4  ;;  %5824 = vmatprep.subr.bf16.mxu1 %v6205_v40 }
 0xd85   : > { %5819 = vmatmul.mubr.msk.bf16.vlgmr.msra.gmra.mxu0 %vm1470_vm0, %v4785_v53 }
 0xd86   : > { %5834 = vmatprep.mubr.msk.bf16.mxu0 %vm6206_vm1, %v6205_v40  ;;  %5825 = vmatpush3.bf16.msra.mxu1 %v5903_v54 }
 0xe38   : > { %v4669_v16 = vpop.f32.mrf.mxu1 }
 0xe3a   : > { %v5802_v10 = vpop.f32.mrf.mxu1 }
 0xe3c   : > { %v4672_v13 = vpop.f32.mrf.mxu1  ;;  %v4719_v15 = vpop.f32.mrf.mxu0 }
 0xe3d   : > { %v4720_v25 = vadd.f32 %v4719_v15, %v4669_v16 }
 0xe3e   : > { %v5803_v29 = vpop.f32.mrf.mxu1  ;;  %v5808_v51 = vpop.f32.mrf.mxu0 }
 0xe40   : > { %v4722_v26 = vpop.f32.mrf.mxu0 }
 0xe41   : > { %v4773_v45 = vpop.f32.mrf.mxu1  ;;  %v4723_v36 = vadd.f32 %v4722_v26, %v4672_v13  ;;  %v4907_v26 = vld [vmem:[%s7613_s22] sm:$0xff] }
 0xe42   : > { %v5809_v42 = vpop.f32.mrf.mxu0  ;;  %v4780_v50 = vadd.f32 %v4773_v45, %v4720_v25  ;;  %v4908_v45 = vld [vmem:[%s7613_s22 + $0x8] sm:$0xff] }
 0xe43   : > { %v5814_v33 = vpop.f32.mrf.mxu1 }
 0xe44   : > { %v4911_v33 = vld [vmem:[%s7614_s23] sm:$0xff] }
 0xe45   : > { %v4776_v62 = vpop.f32.mrf.mxu1  ;;  %v4829_v56 = vpop.f32.mrf.mxu0 }
 0xe46   : > { %v4836_v27 = vadd.f32 %v4829_v56, %v4780_v50  ;;  %v4781_v37 = vadd.f32 %v4776_v62, %v4723_v36  ;;  %v4912_v50 = vld [vmem:[%s7614_s23 + $0x8] sm:$0xff] }
 0xe47   : > { %v5815_v19 = vpop.f32.mrf.mxu1  ;;  %v5820_v38 = vpop.f32.mrf.mxu0 }
 0xe48   : > { %v4845_v49 = vadd.f32 %v5345_v9, %v4836_v27  ;;  %v5904_v19 = vld [vmem:[%s6356_s27 + $0x8] sm:$0xff]   ;;  %v5905_v38 = vld [vmem:[%s6356_s27] sm:$0xff]  }
 0xe49   : > { %v4832_v60 = vpop.f32.mrf.mxu0  ;;  %5831 = vmatpush3.bf16.msra.mxu0 %v5904_v19 }
 0xe4a   : > { %v5346_v14 = vmul.f32 -1.442695, %v4845_v49  ;;  %v4837_v48 = vadd.f32 %v4832_v60, %v4781_v37  ;;  %5832 = vmatprep.subr.bf16.mxu0 %v6205_v40  ;;  %v5348_v37 = vld [vmem:[%s6351_s20] ss:$0 sm:$0xff] }
 0xe4b   : > { %v5821_v41 = vpop.f32.mrf.mxu0 }
 0xe4c   : > { %6154 = vpow2.f32 %v5346_v14  ;;  %v4846_v35 = vadd.f32 %v5345_v9, %v4837_v48 }
 0xe4d   : > { %5833 = vmatpush3.bf16.msra.mxu0 %v5905_v38 }
 0xe4e   : > { %v5347_v59 = vmul.f32 -1.442695, %v4846_v35 }
 0xe50   : > { %6156 = vpow2.f32 %v5347_v59 }
 0xe59   : > { %v6155_v1 = vpop.eup %6154 }
 0xe5a   : > { %v4853_v6 = vadd.f32 1.0, %v6155_v1 }
 0xe5c   : > { %6158 = vrcp.f32 %v4853_v6 }
 0xe5d   : > { %v6157_v20 = vpop.eup %6156 }
 0xe5e   : > { %v4854_v55 = vadd.f32 1.0, %v6157_v20  ;;  %v5352_v20 = vld [vmem:[#allocation2] ss:$0 sm:$0xff] }
 0xe60   : > { %6160 = vrcp.f32 %v4854_v55 }
 0xe69   : > { %v6159_v11 = vpop.eup %6158 }
 0xe6a   : > { %4861 = vrot.lane.b32.xlu1 %v6159_v11, %s6207_s4 }
 0xe6d   : > { %v6161_v21 = vpop.eup %6160 }
 0xe6e   : > { %4863 = vrot.lane.b32.xlu0 %v6161_v21, %s6207_s4 }
 0xedc   : > { %v4862_v44 = vpop.permute.xlu1 %4861 }
 0xedd   : > { %v4867_v43 = vmul.f32 %v4862_v44, %v4845_v49 }
 0xedf   : > { %v4870_v2 = vsel %vm4869_vm4, %v4867_v43, 0.0 }
 0xee0   : > { %4871 = vadd.xlane.f32.xlu1 %v4870_v2  ;;  %v4864_v3 = vpop.permute.xlu0 %4863 }
 0xee1   : > { %v4868_v23 = vmul.f32 %v4864_v3, %v4846_v35 }
 0xee3   : > { %v4873_v0 = vsel %vm4869_vm4, %v4868_v23, 0.0 }
 0xee4   : > { %4874 = vadd.xlane.f32.xlu0 %v4873_v0 }
 0xf69   : > { %v4872_v61 = vpop.xlane.xlu1 %4871 }
 0xf6d   : > { %v4875_v46 = vpop.xlane.xlu0 %4874 }
 0xf6e   : > { %v4876_v31 = vadd.f32 %v4875_v46, %v4872_v61 }
 0xf70   : > { %v4877_v8 = vrot.slane %v4876_v31, 4 }
 0xf72   : > { %v4878_v22 = vadd.f32 %v4877_v8, %v4876_v31 }
 0xf74   : > { %v4879_v57 = vrot.slane %v4878_v22, 2 }
 0xf76   : > { %v4880_v28 = vadd.f32 %v4879_v57, %v4878_v22 }
 0xf78   : > { %v4881_v47 = vrot.slane %v4880_v28, 1 }
 0xf7a   : > { %v4882_v63 = vadd.f32 %v4881_v47, %v4880_v28 }
 0xf7c   : > { %v4884_v24 = vmul.f32 0.001953125, %v4882_v63 }
 0xf7e   : > { %v4886_v5 = vsub.f32 %v4868_v23, %v4884_v24  ;;  %v4885_v34 = vsub.f32 %v4867_v43, %v4884_v24 }
 0xf80   : > { %v4888_v17 = vmul.f32 %v4886_v5, %v4886_v5  ;;  %v4887_v7 = vmul.f32 %v4885_v34, %v4885_v34 }
 0xf82   : > { %v4892_v52 = vsel %vm4869_vm4, %v4888_v17, 0.0  ;;  %v4889_v12 = vsel %vm4869_vm4, %v4887_v7, 0.0 }
 0xf83   : > { %4893 = vadd.xlane.f32.xlu0 %v4892_v52  ;;  %4890 = vadd.xlane.f32.xlu1 %v4889_v12 }
0x100c   : > { %v4894_v18 = vpop.xlane.xlu0 %4893  ;;  %v4891_v58 = vpop.xlane.xlu1 %4890 }
0x100d   : > { %v4895_v30 = vadd.f32 %v4894_v18, %v4891_v58 }
0x100f   : > { %v4896_v4 = vrot.slane %v4895_v30, 4 }
0x1011   : > { %v4897_v32 = vadd.f32 %v4896_v4, %v4895_v30 }
0x1013   : > { %v4898_v53 = vrot.slane %v4897_v32, 2 }
0x1015   : > { %v4899_v16 = vadd.f32 %v4898_v53, %v4897_v32 }
0x1017   : > { %v4900_v10 = vrot.slane %v4899_v16, 1 }
0x1019   : > { %v4901_v13 = vadd.f32 %v4900_v10, %v4899_v16 }
0x101b   : > { %v4902_v15 = vmul.f32 0.001953125, %v4901_v13 }
0x101d   : > { %v4903_v29 = vadd.f32 1e-12, %v4902_v15 }
0x101f   : > { %6162 = vrsqrt.f32 %v4903_v29 }
0x102c   : > { %v6163_v51 = vpop.eup %6162 }
0x102d   : > { %v4905_v25 = vmul.f32 %v6163_v51, %v4885_v34  ;;  %v4906_v42 = vmul.f32 %v6163_v51, %v4886_v5 }
0x102f   : > { %v4909_v62 = vmul.f32 %v4907_v26, %v4905_v25  ;;  %v4910_v56 = vmul.f32 %v4908_v45, %v4906_v42 }
0x1031   : > { %v4913_v9 = vadd.f32 %v4911_v33, %v4909_v62  ;;  %v4914_v36 = vadd.f32 %v4912_v50, %v4910_v56 }
0x1033   : > { %v4919_v27 = vpack.c.bf16 %v4914_v36, %v4913_v9 }
0x1035   : > { %5827 = vmatmul.mubr.msk.bf16.vlgmr.msra.gmra.mxu1 %vm4869_vm4, %v4919_v27 }
0x10f5   : > { %v4976_v49 = vpop.f32.mrf.mxu1 }
0x10f6   : > { %v4977_v14 = vadd.f32 %v5348_v37, %v4976_v49 }
0x10f7   : > { %v5828_v60 = vpop.f32.mrf.mxu1 }
0x10f8   : > { %v4983_v59 = vmax.f32 %v4977_v14, 0.0 }
0x10f9   : > { %v4979_v48 = vpop.f32.mrf.mxu1 }
0x10fa   : > { %v4980_v41 = vadd.f32 %v5348_v37, %v4979_v48 }
0x10fb   : > { %v5829_v35 = vpop.f32.mrf.mxu1 }
0x10fc   : > { %v4984_v1 = vmax.f32 %v4980_v41, 0.0 }
0x10fe   : > { %v4989_v6 = vpack.c.bf16 %v4984_v1, %v4983_v59 }
0x1100   : > { %5835 = vmatmul.mubr.msk.bf16.vlgmr.msra.gmra.mxu0 %vm4869_vm4, %v4989_v6 }
0x11c0   : > { %v5046_v55 = vpop.f32.mrf.mxu0 }
0x11c1   : > { %v5047_v40 = vadd.f32 %v5352_v20, %v5046_v55 }
0x11c2   : > { %v5836_v11 = vpop.f32.mrf.mxu0 }
0x11c3   : > { %5054 = vst.msk [vmem:[%s932_s1] sm:$0xff] %vm5053_vm5, %v5047_v40 }
0x11c4   : > { %v5049_v21 = vpop.f32.mrf.mxu0 }
0x11c5   : > { %v5050_v44 = vadd.f32 %v5352_v20, %v5049_v21 }
0x11c6   : > { %v5837_v43 = vpop.f32.mrf.mxu0 }
0x11c7   : > { %5055 = vst.msk [vmem:[%s932_s1 + $0x8] sm:$0xff] %vm5053_vm5, %v5050_v44 }
0x11c8 PF: > { %s73_s15 = sadd.s32 1, %s6171_s15  }
0x11c9   : > { %p70_p4 = scmp.ge.s32.totalorder %s73_s15, 4  }
0x11cb   :  { %72 = sbr.rel (!%p70_p4) target bundleno = 56 (0x38), region = 211 }

</bundles_post_ra>
